<compile_context>
chip_gen: v7x
topology: tpu7x:2x2x1
jax: 0.10.0
libtpu: 0.0.40
codegen_flags: <defaults>
</compile_context>

<pallas_src>
import functools

import jax
import jax.numpy as jnp
from jax.experimental import pallas as pl
from jax.experimental.pallas import tpu as pltpu


def _round_up(n, m):
    return ((n + m - 1) // m) * m


def _conv_taps(src_scr, w_ref, out_len, mm_dtype):
    """sum_k src[:, k:k+out_len, :] @ w[k]  ->  (tb*out_len, cp) f32 accumulator.

    Taps are *ref* reads from a VMEM scratch (sublane shift handled by the load
    unit), so no value-level slice relayouts and no lane-axis concat."""
    k_taps = w_ref.shape[0]
    tb, _, src_c = src_scr.shape
    acc = None
    for k in range(k_taps):                                   # static unroll, K tiny
        tap = src_scr[:, pl.ds(k, out_len), :]
        tap = tap.astype(mm_dtype).reshape(tb * out_len, src_c)
        part = jnp.dot(tap, w_ref[k], preferred_element_type=jnp.float32)
        acc = part if acc is None else acc + part
    return acc


def cnn_forward_kernel(x_ref, w0_ref, b0_ref, w1_ref, b1_ref,
                       wf1_ref, bf1_ref, wf2_ref, bf2_ref, o_ref,
                       x_scr, y0_scr, p0_scr, y1_scr):
    """One batch tile: conv->relu->pool -> conv->relu->pool -> avgpool->fc->relu->fc."""
    tb, cin, seq = x_ref.shape
    k0 = w0_ref.shape[0]
    k1 = w1_ref.shape[0]
    cp = w0_ref.shape[2]                 # 128-padded channel / hidden lanes
    l0 = seq - k0 + 1
    h0 = l0 // 2
    l1 = h0 - k1 + 1
    h1 = l1 // 2
    mm_dtype = w0_ref.dtype              # bf16 fast path or f32 exact path

    # torch's x.view(b,c,l) block arrives channels-first; transpose once per tile
    # and stage channels-last in VMEM so the conv taps below are ref reads.
    # TODO(synk): if profiling shows this tiny-Cin XLU transpose binding, switch
    # conv0 to a length-on-lanes formulation (perf-review item #7).
    x_scr[...] = jnp.transpose(x_ref[...], (0, 2, 1)).astype(jnp.float32)

    # ---- conv0 + bias + ReLU: K tap matmuls accumulated in f32.  Output channels
    #      padded to `cp` lanes so this store and all following VPU ops are
    #      unmasked full-lane.
    y0 = jnp.maximum(_conv_taps(x_scr, w0_ref, l0, mm_dtype) + b0_ref[...], 0.0)
    y0_scr[...] = y0.reshape(tb, l0, cp)

    # MaxPool1d(2), floor mode: VPU max of even/odd strided sublane ref reads.
    p0_scr[...] = jnp.maximum(y0_scr[:, pl.ds(0, h0, stride=2), :],
                              y0_scr[:, pl.ds(1, h0, stride=2), :])

    # ---- conv1 + bias + ReLU: contraction depth = cp (one full 128-wide MXU block).
    y1 = jnp.maximum(_conv_taps(p0_scr, w1_ref, l1, mm_dtype) + b1_ref[...], 0.0)
    y1_scr[...] = y1.reshape(tb, l1, cp)
    p1 = jnp.maximum(y1_scr[:, pl.ds(0, h1, stride=2), :],
                     y1_scr[:, pl.ds(1, h1, stride=2), :])        # (tb, h1, cp)

    # ---- AdaptiveConcatPool1d: the reference uses AvgPool for BOTH branches, so
    #      cat([avg, avg]) @ Wf1 == avg @ (Wf1[:C1] + Wf1[C1:]); wf1_ref is
    #      pre-folded and padded to (cp, cp).
    avg = jnp.mean(p1, axis=1)                                    # (tb, cp) f32
    hid = jnp.maximum(jnp.dot(avg.astype(mm_dtype), wf1_ref[...],
                              preferred_element_type=jnp.float32) + bf1_ref[...], 0.0)
    # TODO(synk): nn.Dropout(p) treated as identity (inference/eval semantics).
    out = jnp.dot(hid.astype(mm_dtype), wf2_ref[...],
                  preferred_element_type=jnp.float32) + bf2_ref[...]
    o_ref[...] = out.astype(o_ref.dtype)                          # lane-dense store


def _prepare_params(params, mm_dtype, cp, out_pad):
    """Pad all channel/hidden dims to `cp` (=128) lanes, fold the avg+avg FC1, and
    pad FC2 to `out_pad` output lanes.  Padded bias lanes are zero so ReLU / avg
    keep padded lanes at exactly 0 through the whole pipeline."""
    f32 = jnp.float32
    w0 = params["w0"]                      # (K, Cin, C0)
    w1 = params["w1"]                      # (K, C0, C1)
    wf1 = params["wf1"]                    # (2*C1, C1)
    wf2 = params["wf2"]                    # (C1, n_features)
    k0, cin, c0 = w0.shape
    k1, c0_in, c1 = w1.shape
    n_out = wf2.shape[1]

    w0p = jnp.zeros((k0, cin, cp), f32).at[:, :, :c0].set(w0.astype(f32)).astype(mm_dtype)
    b0p = jnp.zeros((1, cp), f32).at[:, :c0].set(params["b0"].astype(f32).reshape(1, -1))

    w1p = jnp.zeros((k1, cp, cp), f32).at[:, :c0_in, :c1].set(w1.astype(f32)).astype(mm_dtype)
    b1p = jnp.zeros((1, cp), f32).at[:, :c1].set(params["b1"].astype(f32).reshape(1, -1))

    wf1f = (wf1[:c1, :] + wf1[c1:2 * c1, :]).astype(f32)           # avg + avg fold
    wf1p = jnp.zeros((cp, cp), f32).at[:c1, :c1].set(wf1f).astype(mm_dtype)
    bf1p = jnp.zeros((1, cp), f32).at[:, :c1].set(params["bf1"].astype(f32).reshape(1, -1))

    wf2p = jnp.zeros((cp, out_pad), f32).at[:c1, :n_out].set(wf2.astype(f32)).astype(mm_dtype)
    bf2p = jnp.zeros((1, out_pad), f32).at[:, :n_out].set(
        params["bf2"].astype(f32).reshape(1, -1))

    # Biases stay f32: added after the f32 MXU accumulation (VPU side, v5e-safe).
    return (w0p, b0p, w1p, b1p, wf1p, bf1p, wf2p, bf2p)


def _vmem_caps():
    """Generation-aware VMEM budgets (v5e/v6e: 128 MiB physical; v7x: 64 MiB/TC)."""
    try:
        cap = int(pltpu.get_tpu_info().vmem_capacity_bytes)
    except Exception:                       # fall back to the most conservative chip
        cap = 64 * 1024 * 1024
    if cap >= 96 * 1024 * 1024:
        vmem_limit = 96 * 1024 * 1024       # v5e / v6e: use most of the 128 MiB
    else:
        vmem_limit = 32 * 1024 * 1024       # v7x: stay within the scoped budget
    return vmem_limit, vmem_limit // 2      # (compiler limit, batch-tile budget)


def _choose_batch_tile(b, l, cin, k, cp, out_pad, in_bytes, tile_budget):
    """Largest batch tile whose working set fits `tile_budget` bytes.

    Only the streamed input/output blocks are double-buffered by the pipeline;
    VMEM scratches and live f32 temporaries are counted once (fixes the previous
    2x over-accounting and the missing live-value term)."""
    l0 = l - k + 1
    h0 = l0 // 2
    l1 = h0 - k + 1
    h1 = max(l1 // 2, 1)
    stream = 2 * (in_bytes * cin * l + 4 * out_pad)          # double-buffered blocks
    scratch = 4 * (l * cin + (l0 + h0 + l1) * cp)            # VMEM scratches
    live = 4 * (l0 + h0 + l1 + h1) * cp                      # in-flight f32 values
    tb = int(tile_budget // max(stream + scratch + live, 1))
    tb = max(1, min(tb, b))
    if b >= 16:
        # Keep >= 2 grid steps so both v7x TensorCores get work under
        # dimension_semantics=("parallel",); costs one ~0.35us step elsewhere.
        half = -(-b // 2)
        tb = min(tb, _round_up(half, 8))
    if tb < b:
        tb = min(max(8, (tb // 8) * 8), b)                   # sublane-aligned blocks
    return tb


@functools.partial(jax.jit,
                   static_argnames=("predict_time_steps", "compute_dtype", "batch_tile"))
def cnn_model_forward(x, params, predict_time_steps=1,
                      compute_dtype=jnp.bfloat16, batch_tile=None):
    """x: (b, l, c) exactly like the PyTorch module's input."""
    b, l, c = x.shape
    k0, cin, c0 = params["w0"].shape
    k1, _, c1 = params["w1"].shape
    n_features = params["wf2"].shape[1]
    cp = _round_up(max(c0, c1, 1), 128)            # padded channel / hidden lanes
    out_pad = _round_up(max(n_features, 1), 128)   # lane-dense output

    l0 = l - k0 + 1
    h0 = l0 // 2
    l1 = h0 - k1 + 1

    vmem_limit, tile_budget = _vmem_caps()
    if batch_tile is None:
        tb = _choose_batch_tile(b, l, cin, k0, cp, out_pad, x.dtype.itemsize, tile_budget)
    else:
        tb = int(min(batch_tile, b))
        if tb < b:
            tb = min(max(8, (tb // 8) * 8), b)
    nb = pl.cdiv(b, tb)

    # torch: x = x.view(b, c, l) — metadata-only reshape; stream x at its native
    # dtype (no wrapper-side f32 HBM copy) and upcast inside the kernel.
    xr = jnp.reshape(x, (b, c, l))

    weights = _prepare_params(params, compute_dtype, cp, out_pad)

    def resident(shape):
        # Constant index_map: same block every grid step -> fetched once, stays in
        # VMEM (no re-DMA across the batch grid).  pl.Buffered(1) would also drop
        # the (tiny) unused second buffer; left at default for compatibility.
        nd = len(shape)
        return pl.BlockSpec(shape, lambda i: (0,) * nd)

    in_specs = [pl.BlockSpec((tb, c, l), lambda i: (i, 0, 0))]
    in_specs += [resident(w.shape) for w in weights]

    out_padded = pl.pallas_call(
        cnn_forward_kernel,
        out_shape=jax.ShapeDtypeStruct((b, out_pad), jnp.float32),
        grid_spec=pltpu.PrefetchScalarGridSpec(
            num_scalar_prefetch=0,
            grid=(nb,),
            in_specs=in_specs,
            out_specs=pl.BlockSpec((tb, out_pad), lambda i: (i, 0)),
            scratch_shapes=[pltpu.VMEM((tb, l, cin), jnp.float32),   # x (channels-last)
                            pltpu.VMEM((tb, l0, cp), jnp.float32),   # conv0 out
                            pltpu.VMEM((tb, h0, cp), jnp.float32),   # pooled conv0
                            pltpu.VMEM((tb, l1, cp), jnp.float32)],  # conv1 out
        ),
        compiler_params=pltpu.CompilerParams(
            dimension_semantics=("parallel",),      # batch tiles are independent
            vmem_limit_bytes=vmem_limit,            # generation-aware limit
        ),
    )(xr, *weights)

    out = out_padded[:, :n_features]
    # outputs[t] = fc(conv(x)) — identical for every t in the reference module.
    return jnp.broadcast_to(out[None], (predict_time_steps, b, n_features))


# ---------------- pure-JAX reference (independent code path) ----------------
def reference_forward(x, p, predict_time_steps):
    b, l, c = x.shape
    xr = jnp.reshape(x, (b, c, l))                       # torch .view

    def conv1d(z, w, bias):                              # z (B,Cin,L), w (K,Cin,Cout)
        wt = jnp.transpose(w, (2, 1, 0))                 # (Cout, Cin, K)
        y = jax.lax.conv_general_dilated(
            z, wt, window_strides=(1,), padding="VALID",
            dimension_numbers=("NCH", "OIH", "NCH"))
        return y + bias.reshape(1, -1, 1)

    def maxpool(z):
        lp = z.shape[2] // 2
        return jnp.max(z[:, :, : 2 * lp].reshape(z.shape[0], z.shape[1], lp, 2),
                       axis=-1)

    y = maxpool(jax.nn.relu(conv1d(xr, p["w0"], p["b0"])))
    y = maxpool(jax.nn.relu(conv1d(y, p["w1"], p["b1"])))
    avg = jnp.mean(y, axis=2)                            # AdaptiveAvgPool1d(1)
    cat = jnp.concatenate([avg, avg], axis=1)            # both branches are avg
    h = jax.nn.relu(cat @ p["wf1"] + p["bf1"])
    out = h @ p["wf2"] + p["bf2"]
    return jnp.broadcast_to(out[None], (predict_time_steps,) + out.shape)


if __name__ == "__main__":
    # Module hyper-parameters (matching CNNModel defaults) at small shapes.
    n_features = 4          # input channels / output features
    num_channel = [32, 32, 40]
    kernel_size = 3
    predict_time_steps = 2
    b, l = 16, 16           # batch, sequence length

    key = jax.random.PRNGKey(0)
    keys = jax.random.split(key, 10)

    def init(k, shape, scale):
        return jax.random.normal(k, shape, jnp.float32) * scale

    params = {
        # conv0: Conv1d(n_features, num_channel[1]) -> weights stored (K, Cin, Cout)
        "w0": init(keys[0], (kernel_size, n_features, num_channel[1]), 0.2),
        "b0": init(keys[1], (1, num_channel[1]), 0.1),
        # conv1: Conv1d(num_channel[0], num_channel[2])
        "w1": init(keys[2], (kernel_size, num_channel[0], num_channel[2]), 0.1),
        "b1": init(keys[3], (1, num_channel[2]), 0.1),
        # fc: Linear(2*num_channel[-1], num_channel[-1]) stored (in, out)
        "wf1": init(keys[4], (2 * num_channel[2], num_channel[2]), 0.1),
        "bf1": init(keys[5], (1, num_channel[2]), 0.1),
        # fc: Linear(num_channel[-1], n_features)
        "wf2": init(keys[6], (num_channel[2], n_features), 0.1),
        "bf2": init(keys[7], (1, n_features), 0.1),
    }

    x = jax.random.normal(keys[8], (b, l, n_features), jnp.float32)
    ref = reference_forward(x, params, predict_time_steps)

    # Exact-numerics path (f32 matmuls), 2 grid steps of 8 examples.
    out_f32 = cnn_model_forward(x, params, predict_time_steps=predict_time_steps,
                                compute_dtype=jnp.float32, batch_tile=8)
    out_f32 = jax.block_until_ready(out_f32)
    assert out_f32.shape == (predict_time_steps, b, n_features), out_f32.shape
    assert jnp.allclose(out_f32, ref, atol=1e-4, rtol=1e-4), "f32 kernel != reference"

    # Fast path (bf16 matmul operands, f32 accumulation), auto batch tile.
    out_bf16 = cnn_model_forward(x, params, predict_time_steps=predict_time_steps,
                                 compute_dtype=jnp.bfloat16)
    out_bf16 = jax.block_until_ready(out_bf16)
    assert out_bf16.shape == (predict_time_steps, b, n_features), out_bf16.shape
    assert jnp.allclose(out_bf16, ref, atol=5e-2, rtol=5e-2), "bf16 kernel != reference"

    # Ragged batch (b % tile != 0): 20 examples, tile = 8 -> last block has 4 rows.
    b2 = 20
    x2 = jax.random.normal(keys[9], (b2, l, n_features), jnp.float32)
    ref2 = reference_forward(x2, params, predict_time_steps)
    out2 = cnn_model_forward(x2, params, predict_time_steps=predict_time_steps,
                             compute_dtype=jnp.float32, batch_tile=8)
    out2 = jax.block_until_ready(out2)
    assert out2.shape == (predict_time_steps, b2, n_features), out2.shape
    assert jnp.allclose(out2, ref2, atol=1e-4, rtol=1e-4), "ragged-batch kernel != reference"

    print("KERNEL_OK")
</pallas_src>

<mosaic_0001>
module attributes {stable_mosaic.version = 11 : i64} {
  func.func @cnn_forward_kernel(%arg0: i32, %arg1: memref<8x4x16xf32, #tpu.memory_space<vmem>>, %arg2: memref<3x4x128xf32, #tpu.memory_space<vmem>>, %arg3: memref<1x128xf32, #tpu.memory_space<vmem>>, %arg4: memref<3x128x128xf32, #tpu.memory_space<vmem>>, %arg5: memref<1x128xf32, #tpu.memory_space<vmem>>, %arg6: memref<128x128xf32, #tpu.memory_space<vmem>>, %arg7: memref<1x128xf32, #tpu.memory_space<vmem>>, %arg8: memref<128x128xf32, #tpu.memory_space<vmem>>, %arg9: memref<1x128xf32, #tpu.memory_space<vmem>>, %arg10: memref<8x128xf32, #tpu.memory_space<vmem>>, %arg11: memref<8x16x4xf32, #tpu.memory_space<vmem>>, %arg12: memref<8x14x128xf32, #tpu.memory_space<vmem>>, %arg13: memref<8x7x128xf32, #tpu.memory_space<vmem>>, %arg14: memref<8x5x128xf32, #tpu.memory_space<vmem>>) attributes {dimension_semantics = [#tpu.dimension_semantics<parallel>], iteration_bounds = array<i64: 2>, scalar_prefetch = 0 : i64, scratch_operands = 4 : i64, tpu.core_type = #tpu.core_type<tc>, window_params = [{transform_indices = @transform_0, window_bounds = array<i64: 8, 4, 16>}, {pipeline_mode = #tpu.pipeline_mode<synchronous>, transform_indices = @transform_1, window_bounds = array<i64: 3, 4, 128>}, {pipeline_mode = #tpu.pipeline_mode<synchronous>, transform_indices = @transform_2, window_bounds = array<i64: 1, 128>}, {pipeline_mode = #tpu.pipeline_mode<synchronous>, transform_indices = @transform_3, window_bounds = array<i64: 3, 128, 128>}, {pipeline_mode = #tpu.pipeline_mode<synchronous>, transform_indices = @transform_4, window_bounds = array<i64: 1, 128>}, {pipeline_mode = #tpu.pipeline_mode<synchronous>, transform_indices = @transform_5, window_bounds = array<i64: 128, 128>}, {pipeline_mode = #tpu.pipeline_mode<synchronous>, transform_indices = @transform_6, window_bounds = array<i64: 1, 128>}, {pipeline_mode = #tpu.pipeline_mode<synchronous>, transform_indices = @transform_7, window_bounds = array<i64: 128, 128>}, {pipeline_mode = #tpu.pipeline_mode<synchronous>, transform_indices = @transform_8, window_bounds = array<i64: 1, 128>}, {transform_indices = @transform_9, window_bounds = array<i64: 8, 128>}]} {
    %c0 = arith.constant 0 : index
    %c0_0 = arith.constant 0 : index
    %c0_1 = arith.constant 0 : index
    %0 = vector.load %arg1[%c0, %c0_0, %c0_1] : memref<8x4x16xf32, #tpu.memory_space<vmem>>, vector<8x4x16xf32>
    %1 = tpu.transpose %0, [0, 2, 1] : vector<8x4x16xf32> -> vector<8x16x4xf32>
    %c0_2 = arith.constant 0 : index
    %c0_3 = arith.constant 0 : index
    %c0_4 = arith.constant 0 : index
    %2 = vector.load %arg11[%c0_2, %c0_3, %c0_4] : memref<8x16x4xf32, #tpu.memory_space<vmem>>, vector<8x16x4xf32>
    tpu.vector_store %arg11[%c0_2, %c0_3, %c0_4], %1 {strides = array<i32>} : memref<8x16x4xf32, #tpu.memory_space<vmem>>, vector<8x16x4xf32>,
    %c0_5 = arith.constant 0 : index
    %c0_6 = arith.constant 0 : index
    %c0_7 = arith.constant 0 : index
    %3 = vector.load %arg11[%c0_5, %c0_6, %c0_7] : memref<8x16x4xf32, #tpu.memory_space<vmem>>, vector<8x14x4xf32>
    %4 = vector.shape_cast %3 : vector<8x14x4xf32> to vector<112x4xf32>
    %c0_8 = arith.constant 0 : index
    %c0_9 = arith.constant 0 : index
    %c0_10 = arith.constant 0 : index
    %5 = vector.load %arg2[%c0_8, %c0_9, %c0_10] : memref<3x4x128xf32, #tpu.memory_space<vmem>>, vector<1x4x128xf32>
    %6 = vector.shape_cast %5 : vector<1x4x128xf32> to vector<4x128xf32>
    %cst = arith.constant dense<0.000000e+00> : vector<112x128xf32>
    %7 = tpu.matmul %4, %6, %cst {dimension_numbers = #tpu.dot_dimension_numbers<[1], [0], [0], [1], [0, 0, 1, 1], [], []>} : vector<112x4xf32>, vector<4x128xf32>, vector<112x128xf32> -> vector<112x128xf32>
    %c0_11 = arith.constant 0 : index
    %c1 = arith.constant 1 : index
    %c0_12 = arith.constant 0 : index
    %8 = vector.load %arg11[%c0_11, %c1, %c0_12] : memref<8x16x4xf32, #tpu.memory_space<vmem>>, vector<8x14x4xf32>
    %9 = vector.shape_cast %8 : vector<8x14x4xf32> to vector<112x4xf32>
    %c1_13 = arith.constant 1 : index
    %c0_14 = arith.constant 0 : index
    %c0_15 = arith.constant 0 : index
    %10 = vector.load %arg2[%c1_13, %c0_14, %c0_15] : memref<3x4x128xf32, #tpu.memory_space<vmem>>, vector<1x4x128xf32>
    %11 = vector.shape_cast %10 : vector<1x4x128xf32> to vector<4x128xf32>
    %cst_16 = arith.constant dense<0.000000e+00> : vector<112x128xf32>
    %12 = tpu.matmul %9, %11, %cst_16 {dimension_numbers = #tpu.dot_dimension_numbers<[1], [0], [0], [1], [0, 0, 1, 1], [], []>} : vector<112x4xf32>, vector<4x128xf32>, vector<112x128xf32> -> vector<112x128xf32>
    %13 = arith.addf %7, %12 : vector<112x128xf32>
    %c0_17 = arith.constant 0 : index
    %c2 = arith.constant 2 : index
    %c0_18 = arith.constant 0 : index
    %14 = vector.load %arg11[%c0_17, %c2, %c0_18] : memref<8x16x4xf32, #tpu.memory_space<vmem>>, vector<8x14x4xf32>
    %15 = vector.shape_cast %14 : vector<8x14x4xf32> to vector<112x4xf32>
    %c2_19 = arith.constant 2 : index
    %c0_20 = arith.constant 0 : index
    %c0_21 = arith.constant 0 : index
    %16 = vector.load %arg2[%c2_19, %c0_20, %c0_21] : memref<3x4x128xf32, #tpu.memory_space<vmem>>, vector<1x4x128xf32>
    %17 = vector.shape_cast %16 : vector<1x4x128xf32> to vector<4x128xf32>
    %cst_22 = arith.constant dense<0.000000e+00> : vector<112x128xf32>
    %18 = tpu.matmul %15, %17, %cst_22 {dimension_numbers = #tpu.dot_dimension_numbers<[1], [0], [0], [1], [0, 0, 1, 1], [], []>} : vector<112x4xf32>, vector<4x128xf32>, vector<112x128xf32> -> vector<112x128xf32>
    %19 = arith.addf %13, %18 : vector<112x128xf32>
    %c0_23 = arith.constant 0 : index
    %c0_24 = arith.constant 0 : index
    %20 = vector.load %arg3[%c0_23, %c0_24] : memref<1x128xf32, #tpu.memory_space<vmem>>, vector<1x128xf32>
    %21 = vector.broadcast %20 : vector<1x128xf32> to vector<112x128xf32>
    %22 = arith.addf %19, %21 : vector<112x128xf32>
    %cst_25 = arith.constant 0.000000e+00 : f32
    %23 = vector.broadcast %cst_25 : f32 to vector<112x128xf32>
    %24 = arith.maximumf %22, %23 : vector<112x128xf32>
    %25 = vector.shape_cast %24 : vector<112x128xf32> to vector<8x14x128xf32>
    %c0_26 = arith.constant 0 : index
    %c0_27 = arith.constant 0 : index
    %c0_28 = arith.constant 0 : index
    %26 = vector.load %arg12[%c0_26, %c0_27, %c0_28] : memref<8x14x128xf32, #tpu.memory_space<vmem>>, vector<8x14x128xf32>
    tpu.vector_store %arg12[%c0_26, %c0_27, %c0_28], %25 {strides = array<i32>} : memref<8x14x128xf32, #tpu.memory_space<vmem>>, vector<8x14x128xf32>,
    %c0_29 = arith.constant 0 : index
    %c0_30 = arith.constant 0 : index
    %c0_31 = arith.constant 0 : index
    %27 = tpu.strided_load %arg12[%c0_29, %c0_30, %c0_31] {strides = array<i32: 1, 2, 1>} : memref<8x14x128xf32, #tpu.memory_space<vmem>>, vector<8x7x128xf32>
    %c0_32 = arith.constant 0 : index
    %c1_33 = arith.constant 1 : index
    %c0_34 = arith.constant 0 : index
    %28 = tpu.strided_load %arg12[%c0_32, %c1_33, %c0_34] {strides = array<i32: 1, 2, 1>} : memref<8x14x128xf32, #tpu.memory_space<vmem>>, vector<8x7x128xf32>
    %29 = arith.maximumf %27, %28 : vector<8x7x128xf32>
    %c0_35 = arith.constant 0 : index
    %c0_36 = arith.constant 0 : index
    %c0_37 = arith.constant 0 : index
    %30 = vector.load %arg13[%c0_35, %c0_36, %c0_37] : memref<8x7x128xf32, #tpu.memory_space<vmem>>, vector<8x7x128xf32>
    tpu.vector_store %arg13[%c0_35, %c0_36, %c0_37], %29 {strides = array<i32>} : memref<8x7x128xf32, #tpu.memory_space<vmem>>, vector<8x7x128xf32>,
    %c0_38 = arith.constant 0 : index
    %c0_39 = arith.constant 0 : index
    %c0_40 = arith.constant 0 : index
    %31 = vector.load %arg13[%c0_38, %c0_39, %c0_40] : memref<8x7x128xf32, #tpu.memory_space<vmem>>, vector<8x5x128xf32>
    %32 = vector.shape_cast %31 : vector<8x5x128xf32> to vector<40x128xf32>
    %c0_41 = arith.constant 0 : index
    %c0_42 = arith.constant 0 : index
    %c0_43 = arith.constant 0 : index
    %33 = vector.load %arg4[%c0_41, %c0_42, %c0_43] : memref<3x128x128xf32, #tpu.memory_space<vmem>>, vector<1x128x128xf32>
    %34 = vector.shape_cast %33 : vector<1x128x128xf32> to vector<128x128xf32>
    %cst_44 = arith.constant dense<0.000000e+00> : vector<40x128xf32>
    %35 = tpu.matmul %32, %34, %cst_44 {dimension_numbers = #tpu.dot_dimension_numbers<[1], [0], [0], [1], [0, 0, 1, 1], [], []>} : vector<40x128xf32>, vector<128x128xf32>, vector<40x128xf32> -> vector<40x128xf32>
    %c0_45 = arith.constant 0 : index
    %c1_46 = arith.constant 1 : index
    %c0_47 = arith.constant 0 : index
    %36 = vector.load %arg13[%c0_45, %c1_46, %c0_47] : memref<8x7x128xf32, #tpu.memory_space<vmem>>, vector<8x5x128xf32>
    %37 = vector.shape_cast %36 : vector<8x5x128xf32> to vector<40x128xf32>
    %c1_48 = arith.constant 1 : index
    %c0_49 = arith.constant 0 : index
    %c0_50 = arith.constant 0 : index
    %38 = vector.load %arg4[%c1_48, %c0_49, %c0_50] : memref<3x128x128xf32, #tpu.memory_space<vmem>>, vector<1x128x128xf32>
    %39 = vector.shape_cast %38 : vector<1x128x128xf32> to vector<128x128xf32>
    %cst_51 = arith.constant dense<0.000000e+00> : vector<40x128xf32>
    %40 = tpu.matmul %37, %39, %cst_51 {dimension_numbers = #tpu.dot_dimension_numbers<[1], [0], [0], [1], [0, 0, 1, 1], [], []>} : vector<40x128xf32>, vector<128x128xf32>, vector<40x128xf32> -> vector<40x128xf32>
    %41 = arith.addf %35, %40 : vector<40x128xf32>
    %c0_52 = arith.constant 0 : index
    %c2_53 = arith.constant 2 : index
    %c0_54 = arith.constant 0 : index
    %42 = vector.load %arg13[%c0_52, %c2_53, %c0_54] : memref<8x7x128xf32, #tpu.memory_space<vmem>>, vector<8x5x128xf32>
    %43 = vector.shape_cast %42 : vector<8x5x128xf32> to vector<40x128xf32>
    %c2_55 = arith.constant 2 : index
    %c0_56 = arith.constant 0 : index
    %c0_57 = arith.constant 0 : index
    %44 = vector.load %arg4[%c2_55, %c0_56, %c0_57] : memref<3x128x128xf32, #tpu.memory_space<vmem>>, vector<1x128x128xf32>
    %45 = vector.shape_cast %44 : vector<1x128x128xf32> to vector<128x128xf32>
    %cst_58 = arith.constant dense<0.000000e+00> : vector<40x128xf32>
    %46 = tpu.matmul %43, %45, %cst_58 {dimension_numbers = #tpu.dot_dimension_numbers<[1], [0], [0], [1], [0, 0, 1, 1], [], []>} : vector<40x128xf32>, vector<128x128xf32>, vector<40x128xf32> -> vector<40x128xf32>
    %47 = arith.addf %41, %46 : vector<40x128xf32>
    %c0_59 = arith.constant 0 : index
    %c0_60 = arith.constant 0 : index
    %48 = vector.load %arg5[%c0_59, %c0_60] : memref<1x128xf32, #tpu.memory_space<vmem>>, vector<1x128xf32>
    %49 = vector.broadcast %48 : vector<1x128xf32> to vector<40x128xf32>
    %50 = arith.addf %47, %49 : vector<40x128xf32>
    %cst_61 = arith.constant 0.000000e+00 : f32
    %51 = vector.broadcast %cst_61 : f32 to vector<40x128xf32>
    %52 = arith.maximumf %50, %51 : vector<40x128xf32>
    %53 = vector.shape_cast %52 : vector<40x128xf32> to vector<8x5x128xf32>
    %c0_62 = arith.constant 0 : index
    %c0_63 = arith.constant 0 : index
    %c0_64 = arith.constant 0 : index
    %54 = vector.load %arg14[%c0_62, %c0_63, %c0_64] : memref<8x5x128xf32, #tpu.memory_space<vmem>>, vector<8x5x128xf32>
    tpu.vector_store %arg14[%c0_62, %c0_63, %c0_64], %53 {strides = array<i32>} : memref<8x5x128xf32, #tpu.memory_space<vmem>>, vector<8x5x128xf32>,
    %c0_65 = arith.constant 0 : index
    %c0_66 = arith.constant 0 : index
    %c0_67 = arith.constant 0 : index
    %55 = tpu.strided_load %arg14[%c0_65, %c0_66, %c0_67] {strides = array<i32: 1, 2, 1>} : memref<8x5x128xf32, #tpu.memory_space<vmem>>, vector<8x2x128xf32>
    %c0_68 = arith.constant 0 : index
    %c1_69 = arith.constant 1 : index
    %c0_70 = arith.constant 0 : index
    %56 = tpu.strided_load %arg14[%c0_68, %c1_69, %c0_70] {strides = array<i32: 1, 2, 1>} : memref<8x5x128xf32, #tpu.memory_space<vmem>>, vector<8x2x128xf32>
    %57 = arith.maximumf %55, %56 : vector<8x2x128xf32>
    %cst_71 = arith.constant dense<0.000000e+00> : vector<8x128xf32>
    %58 = vector.multi_reduction <add>, %57, %cst_71 [1] : vector<8x2x128xf32> to vector<8x128xf32>
    %cst_72 = arith.constant 2.000000e+00 : f32
    %59 = vector.broadcast %cst_72 : f32 to vector<8x128xf32>
    %60 = arith.divf %58, %59 : vector<8x128xf32>
    %c0_73 = arith.constant 0 : index
    %c0_74 = arith.constant 0 : index
    %61 = vector.load %arg6[%c0_73, %c0_74] : memref<128x128xf32, #tpu.memory_space<vmem>>, vector<128x128xf32>
    %cst_75 = arith.constant dense<0.000000e+00> : vector<8x128xf32>
    %62 = tpu.matmul %60, %61, %cst_75 {dimension_numbers = #tpu.dot_dimension_numbers<[1], [0], [0], [1], [0, 0, 1, 1], [], []>} : vector<8x128xf32>, vector<128x128xf32>, vector<8x128xf32> -> vector<8x128xf32>
    %c0_76 = arith.constant 0 : index
    %c0_77 = arith.constant 0 : index
    %63 = vector.load %arg7[%c0_76, %c0_77] : memref<1x128xf32, #tpu.memory_space<vmem>>, vector<1x128xf32>
    %64 = vector.broadcast %63 : vector<1x128xf32> to vector<8x128xf32>
    %65 = arith.addf %62, %64 : vector<8x128xf32>
    %cst_78 = arith.constant 0.000000e+00 : f32
    %66 = vector.broadcast %cst_78 : f32 to vector<8x128xf32>
    %67 = arith.maximumf %65, %66 : vector<8x128xf32>
    %c0_79 = arith.constant 0 : index
    %c0_80 = arith.constant 0 : index
    %68 = vector.load %arg8[%c0_79, %c0_80] : memref<128x128xf32, #tpu.memory_space<vmem>>, vector<128x128xf32>
    %cst_81 = arith.constant dense<0.000000e+00> : vector<8x128xf32>
    %69 = tpu.matmul %67, %68, %cst_81 {dimension_numbers = #tpu.dot_dimension_numbers<[1], [0], [0], [1], [0, 0, 1, 1], [], []>} : vector<8x128xf32>, vector<128x128xf32>, vector<8x128xf32> -> vector<8x128xf32>
    %c0_82 = arith.constant 0 : index
    %c0_83 = arith.constant 0 : index
    %70 = vector.load %arg9[%c0_82, %c0_83] : memref<1x128xf32, #tpu.memory_space<vmem>>, vector<1x128xf32>
    %71 = vector.broadcast %70 : vector<1x128xf32> to vector<8x128xf32>
    %72 = arith.addf %69, %71 : vector<8x128xf32>
    %c0_84 = arith.constant 0 : index
    %c0_85 = arith.constant 0 : index
    %73 = vector.load %arg10[%c0_84, %c0_85] : memref<8x128xf32, #tpu.memory_space<vmem>>, vector<8x128xf32>
    tpu.vector_store %arg10[%c0_84, %c0_85], %72 {strides = array<i32>} : memref<8x128xf32, #tpu.memory_space<vmem>>, vector<8x128xf32>,
    return
  }
  func.func @transform_0(%arg0: i32) -> (i32, i32, i32) {
    %c0_i32 = arith.constant 0 : i32
    %c0_i32_0 = arith.constant 0 : i32
    %c0_i32_1 = arith.constant 0 : i32
    return %arg0, %c0_i32, %c0_i32_0 : i32, i32, i32
  }
  func.func @transform_1(%arg0: i32) -> (i32, i32, i32) {
    %c0_i32 = arith.constant 0 : i32
    %c0_i32_0 = arith.constant 0 : i32
    %c0_i32_1 = arith.constant 0 : i32
    %c0_i32_2 = arith.constant 0 : i32
    return %c0_i32, %c0_i32_0, %c0_i32_1 : i32, i32, i32
  }
  func.func @transform_2(%arg0: i32) -> (i32, i32) {
    %c0_i32 = arith.constant 0 : i32
    %c0_i32_0 = arith.constant 0 : i32
    %c0_i32_1 = arith.constant 0 : i32
    return %c0_i32, %c0_i32_0 : i32, i32
  }
  func.func @transform_3(%arg0: i32) -> (i32, i32, i32) {
    %c0_i32 = arith.constant 0 : i32
    %c0_i32_0 = arith.constant 0 : i32
    %c0_i32_1 = arith.constant 0 : i32
    %c0_i32_2 = arith.constant 0 : i32
    return %c0_i32, %c0_i32_0, %c0_i32_1 : i32, i32, i32
  }
  func.func @transform_4(%arg0: i32) -> (i32, i32) {
    %c0_i32 = arith.constant 0 : i32
    %c0_i32_0 = arith.constant 0 : i32
    %c0_i32_1 = arith.constant 0 : i32
    return %c0_i32, %c0_i32_0 : i32, i32
  }
  func.func @transform_5(%arg0: i32) -> (i32, i32) {
    %c0_i32 = arith.constant 0 : i32
    %c0_i32_0 = arith.constant 0 : i32
    %c0_i32_1 = arith.constant 0 : i32
    return %c0_i32, %c0_i32_0 : i32, i32
  }
  func.func @transform_6(%arg0: i32) -> (i32, i32) {
    %c0_i32 = arith.constant 0 : i32
    %c0_i32_0 = arith.constant 0 : i32
    %c0_i32_1 = arith.constant 0 : i32
    return %c0_i32, %c0_i32_0 : i32, i32
  }
  func.func @transform_7(%arg0: i32) -> (i32, i32) {
    %c0_i32 = arith.constant 0 : i32
    %c0_i32_0 = arith.constant 0 : i32
    %c0_i32_1 = arith.constant 0 : i32
    return %c0_i32, %c0_i32_0 : i32, i32
  }
  func.func @transform_8(%arg0: i32) -> (i32, i32) {
    %c0_i32 = arith.constant 0 : i32
    %c0_i32_0 = arith.constant 0 : i32
    %c0_i32_1 = arith.constant 0 : i32
    return %c0_i32, %c0_i32_0 : i32, i32
  }
  func.func @transform_9(%arg0: i32) -> (i32, i32) {
    %c0_i32 = arith.constant 0 : i32
    %c0_i32_0 = arith.constant 0 : i32
    return %arg0, %c0_i32 : i32, i32
  }
}

</mosaic_0001>

<bundles_post_ra>
// kernel: cnn_model_forward.1
= control target key start
LH: loop header
LB: loop body
LE: loop exit
PB: predicated region body
PF: predicated region fallthrough
CT: control target
= control target key end

     0   :  { %s7213_s30 = smov 0   ;;  %s8409_s0 = inlined_call_operand.vmem [shape: f32[16,4,16], index: 0, kind: input, shape index: {}]   ;;  %s8410_s1 = inlined_call_operand.vmem [shape: f32[3,4,128], index: 1, kind: input, shape index: {}]   ;;  %s8411_s2 = inlined_call_operand.vmem [shape: f32[1,128], index: 2, kind: input, shape index: {}]   ;;  %s8412_s3 = inlined_call_operand.vmem [shape: f32[3,128,128], index: 3, kind: input, shape index: {}]   ;;  %s8413_s4 = inlined_call_operand.vmem [shape: f32[1,128], index: 4, kind: input, shape index: {}]   ;;  %s8414_s5 = inlined_call_operand.vmem [shape: f32[128,128], index: 5, kind: input, shape index: {}]   ;;  %s8415_s6 = inlined_call_operand.vmem [shape: f32[1,128], index: 6, kind: input, shape index: {}]   ;;  %s8416_s7 = inlined_call_operand.vmem [shape: f32[128,128], index: 7, kind: input, shape index: {}]   ;;  %s8417_s8 = inlined_call_operand.vmem [shape: f32[1,128], index: 8, kind: input, shape index: {}]   ;;  %s8418_s9 = inlined_call_operand.vmem [shape: f32[16,128], index: 9, kind: output, shape index: {}]  }
   0x1 LB: > { %s7219_s10 = sadd.s32 4294967295, %s7156_s30   ;;  %p6391_p0 = scmp.ge.s32.totalorder %s7156_s30, 1  ;;  %s7156_s30 = sphi %s7213_s30, %s19_s30  }
   0x2   : > { %p288_p1 = scmp.lt.s32.totalorder %s7156_s30, 3 }
   0x4   : > { %p289_p2 = pnand %p6391_p0, %p288_p1 }
   0x5   : > { %s6392_s11 = sshll.u32 (!%p289_p2), %s7219_s10, 3  ;;  %v910_v8 = vld [vmem:[%s8410_s1] sm:$0xf] (!%p289_p2)  ;;  %vm1475_vm0 = vcmask (!%p289_p2), 1043456   ;;  %v7235_v9 = vld [vmem:[%s8410_s1 + $0x8] sm:$0xf] (!%p289_p2)  ;;  %v650_v13 = vlaneseq (!%p289_p2) }
   0x6   : > { %292 = sbr.rel (%p289_p2) target bundleno = 1307 (0x51b), region = 56  ;;  %p324_p3 = scmp.lt.s32.totalorder (!%p289_p2), %s6392_s11, 15  ;;  %6661 = vmatprep.subr.msk.mxu0 (!%p289_p2), %vm1475_vm0, %v910_v8  ;;  %v6395_v10 = vld [vmem:[%s8410_s1 + $0x4] sm:$0xf] (!%p289_p2)  ;;  %v7158_v11 = vmov (!%p289_p2), 1983009808  }
   0x7   : > { %6662 = vmatpush3.msk.msra.mxu0 (!%p289_p2), %vm1475_vm0, %v910_v8  ;;  %6638 = vmatprep.subr.msk.mxu1 (!%p289_p2), %vm1475_vm0, %v6395_v10  ;;  %v648_v12 = vunpack.c.l.s4 (!%p289_p2), %v7158_v11  ;;  %vm597_vm1 = vcmask (!%p289_p2), 31744   ;;  %v7246_v17 = vshrl.u32 (!%p289_p2), %v650_v13, 7  ;;  %vm7160_vm2 = vmmov (!%p289_p2), 0   ;;  %p329_p4 = scmp.lt.s32.totalorder (!%p289_p2), %s7219_s10, 1 }
   0x8   : > { %6684 = vmatprep.subr.msk.mxu0 (!%p289_p2), %vm1475_vm0, %v7235_v9  ;;  %6639 = vmatpush3.msk.msra.mxu1 (!%p289_p2), %vm1475_vm0, %v6395_v10  ;;  %vm6057_vm3 = vcmask (!%p289_p2), 1041408   ;;  %vm6154_vm4 = vcmask (!%p289_p2), 1041409   ;;  %vm6156_vm5 = vcmask (!%p289_p2), 1042434   ;;  %vm6158_vm6 = vcmask (!%p289_p2), 1043459  }
   0x9   : > { %v649_v16 = vunpack.c.0.s8 (!%p289_p2), %v648_v12  ;;  %vm6160_vm7 = vcmask (!%p289_p2), 1044484   ;;  %vm6162_vm8 = vcmask (!%p289_p2), 1045509   ;;  %vm6164_vm9 = vcmask (!%p289_p2), 1046534  }
   0xa   : > { %vm6166_vm10 = vcmask (!%p289_p2), 1047559  }
   0xb   : > { %v7251_v20 = vsub.s32 (!%p289_p2), %v649_v16, %v7246_v17 }
   0xd   : > { %s8420_s11 = smov (!%p324_p3, %s6392_s11), 15  ;;  %s8422_s10 = smov (!%p329_p4, %s7219_s10), 1 }
   0xe   : > { %s6393_s12 = sshll.u32 %s8420_s11, 2  ;;  %s6394_s17 = sshll.u32 %s8422_s10, 3 }
   0xf   : > { %s327_s15 = scalar_lea.vmem %s8409_s0, %s6393_s12  ;;  %s332_s22 = scalar_lea.vmem %s8418_s9, %s6394_s17 }
  0x10   : > { %v335_v0 = vld [vmem:[%s327_s15 + $0x8] sm:$0xf]  ;;  %v333_v1 = vld [vmem:[%s327_s15] sm:$0xf]  ;;  %v336_v2 = vld [vmem:[%s327_s15 + $0xc] sm:$0xf] }
  0x11   : > { %405 = vxpose.xlu1.b32.start.end [1/1] (short) (narrow) %v335_v0, 16  ;;  %341 = vxpose.xlu0.b32.start.end [1/1] (short) (narrow) %v333_v1, 16  ;;  %v334_v3 = vld [vmem:[%s327_s15 + $0x4] sm:$0xf]  ;;  %v338_v4 = vld [vmem:[%s327_s15 + $0x14] sm:$0xf] }
  0x12   : > { %v337_v5 = vld [vmem:[%s327_s15 + $0x10] sm:$0xf]  ;;  %v340_v6 = vld [vmem:[%s327_s15 + $0x1c] sm:$0xf]  ;;  %v339_v7 = vld [vmem:[%s327_s15 + $0x18] sm:$0xf] }
  0x16   : > { %437 = vxpose.xlu1.b32.start.end [1/1] (short) (narrow) %v336_v2, 16  ;;  %373 = vxpose.xlu0.b32.start.end [1/1] (short) (narrow) %v334_v3, 16 }
  0x1b   : > { %501 = vxpose.xlu1.b32.start.end [1/1] (short) (narrow) %v338_v4, 16  ;;  %469 = vxpose.xlu0.b32.start.end [1/1] (short) (narrow) %v337_v5, 16 }
  0x20   : > { %565 = vxpose.xlu1.b32.start.end [1/1] (short) (narrow) %v340_v6, 16  ;;  %533 = vxpose.xlu0.b32.start.end [1/1] (short) (narrow) %v339_v7, 16 }
  0x91   : > { %v421_v14 = vpop.trf.xlu1  ;;  %v357_v15 = vpop.trf.xlu0 }
  0x92   : > { %602 = vst.msk [vmem:[#allocation2 + $0x20] sm:$0xff] %vm597_vm1, %v421_v14  ;;  %598 = vst.msk [vmem:[#allocation2] sm:$0xff] %vm597_vm1, %v357_v15 }
  0x95   : > { %v422_v18 = vpop.trf.xlu1  ;;  %v358_v19 = vpop.trf.xlu0 }
  0x96   : > { %603 = vst.msk [vmem:[#allocation2 + $0x28] sm:$0xff] %vm597_vm1, %v422_v18  ;;  %599 = vst.msk [vmem:[#allocation2 + $0x8] sm:$0xff] %vm597_vm1, %v358_v19 }
  0x99   : > { %v453_v21 = vpop.trf.xlu1  ;;  %v389_v22 = vpop.trf.xlu0  ;;  %v614_v23 = vld [vmem:[#allocation2] sm:$0xff] }
  0x9a   : > { %v618_v24 = vld [vmem:[#allocation2 + $0x20] sm:$0xff]  ;;  %604 = vst.msk [vmem:[#allocation2 + $0x30] sm:$0xff] %vm597_vm1, %v453_v21  ;;  %600 = vst.msk [vmem:[#allocation2 + $0x10] sm:$0xff] %vm597_vm1, %v389_v22  ;;  %v646_v25 = vcombine.high %v614_v23, %v614_v23  ;;  %v653_v26 = vrot.slane %v614_v23, %v7251_v20 }
  0x9b   : > { %v719_v27 = vrot.slane %v618_v24, %v7251_v20  ;;  %v712_v28 = vcombine.high %v618_v24, %v618_v24 }
  0x9c   : > { %v660_v29 = vrot.slane %v646_v25, %v7251_v20  ;;  %v661_v30 = vcombine.high %v653_v26, %v653_v26 }
  0x9d   : > { %v454_v31 = vpop.trf.xlu1  ;;  %v390_v32 = vpop.trf.xlu0  ;;  %v911_v33 = vld [vmem:[#allocation2 + $0x1] sm:$0xff]  ;;  %v912_v35 = vld [vmem:[#allocation2 + $0x9] sm:$0x3f]  ;;  %v727_v36 = vcombine.high %v719_v27, %v719_v27  ;;  %v7259_v37 = vrot.slane %v712_v28, %v7251_v20 }
  0x9e   : > { %v615_v34 = vld [vmem:[#allocation2 + $0x8] sm:$0x3f]  ;;  %605 = vst.msk [vmem:[#allocation2 + $0x38] sm:$0xff] %vm597_vm1, %v454_v31  ;;  %601 = vst.msk [vmem:[#allocation2 + $0x18] sm:$0xff] %vm597_vm1, %v390_v32  ;;  %v662_v38 = vcombine.high %v660_v29, %v660_v29  ;;  %v1614_v39 = vcombine.low %v653_v26, %v661_v30  ;;  %v943_v40 = vcombine.high %v911_v33, %v911_v33 }
  0x9f   : > { %v950_v41 = vrot.slane %v911_v33, %v7251_v20  ;;  %v663_v42 = vcombine.high %v615_v34, %v615_v34  ;;  %v670_v43 = vrot.slane %v615_v34, %v7251_v20  ;;  %v960_v44 = vcombine.high %v912_v35, %v912_v35  ;;  %v7289_v24 = vld [vmem:[#allocation2 + $0x28] sm:$0x3f] }
  0xa0   : > { %v967_v45 = vrot.slane %v912_v35, %v7251_v20  ;;  %v1615_v46 = vcombine.low %v660_v29, %v662_v38  ;;  %v1622_v47 = vrot.slane %v1614_v39, %v7251_v20  ;;  %v957_v48 = vrot.slane %v943_v40, %v7251_v20 }
  0xa1   : > { %v958_v49 = vcombine.high %v950_v41, %v950_v41  ;;  %v517_v50 = vpop.trf.xlu1  ;;  %v485_v51 = vpop.trf.xlu0  ;;  %v616_v52 = vld [vmem:[#allocation2 + $0x10] sm:$0xff]  ;;  %v677_v53 = vrot.slane %v663_v42, %v7251_v20  ;;  %v678_v54 = vcombine.high %v670_v43, %v670_v43  ;;  %v974_v55 = vrot.slane %v960_v44, %v7251_v20 }
  0xa2   : > { %v975_v56 = vcombine.high %v967_v45, %v967_v45  ;;  %608 = vst.msk [vmem:[#allocation2 + $0x50] sm:$0xff] %vm597_vm1, %v517_v50  ;;  %606 = vst.msk [vmem:[#allocation2 + $0x40] sm:$0xff] %vm597_vm1, %v485_v51  ;;  %v1629_v57 = vrot.slane %v1615_v46, %v7251_v20  ;;  %v959_v58 = vcombine.high %v957_v48, %v957_v48 }
  0xa3   : > { %v1209_v59 = vcombine.low %v950_v41, %v958_v49  ;;  %v686_v60 = vrot.slane %v616_v52, %v7251_v20  ;;  %v1631_v61 = vcombine.low %v670_v43, %v678_v54  ;;  %v679_v63 = vcombine.high %v616_v52, %v616_v52  ;;  %v7310_v54 = vld [vmem:[#allocation2 + $0x29] sm:$0x3f] }
  0xa4   : > { %v1226_v62 = vcombine.low %v967_v45, %v975_v56  ;;  %v7274_v0 = vcombine.low %v719_v27, %v727_v36  ;;  %v1630_v1 = vcombine.low %v1622_v47, %v1629_v57  ;;  %v1210_v2 = vcombine.low %v957_v48, %v959_v58  ;;  %v915_v48 = vld [vmem:[#allocation2 + $0x21] sm:$0xff] }
  0xa5   : > { %v1217_v3 = vrot.slane %v1209_v59, %v7251_v20  ;;  %v1632_v4 = vcombine.low %v677_v53, %v686_v60  ;;  %v518_v5 = vpop.trf.xlu1  ;;  %v486_v6 = vpop.trf.xlu0  ;;  %v1639_v7 = vrot.slane %v1631_v61, %v7251_v20  ;;  %v913_v8 = vld [vmem:[#allocation2 + $0x11] sm:$0xff]  ;;  %v693_v12 = vrot.slane %v679_v63, %v7251_v20  ;;  %v914_v35 = vld [vmem:[#allocation2 + $0x19] sm:$0x3f] }
  0xa6   : > { %v1234_v10 = vrot.slane %v1226_v62, %v7251_v20  ;;  %v617_v11 = vld [vmem:[#allocation2 + $0x18] sm:$0x3f]  ;;  %v694_v13 = vcombine.high %v686_v60, %v686_v60  ;;  %609 = vst.msk [vmem:[#allocation2 + $0x58] sm:$0xff] %vm597_vm1, %v518_v5  ;;  %607 = vst.msk [vmem:[#allocation2 + $0x48] sm:$0xff] %vm597_vm1, %v486_v6  ;;  %6663 = vmatprep.mubr.msk.f32.mxu0 %vm597_vm1, %v1630_v1  ;;  %v1224_v14 = vrot.slane %v1210_v2, %v7251_v20  ;;  %v620_v62 = vld [vmem:[#allocation2 + $0x30] sm:$0xff] }
  0xa7   : > { %v1646_v15 = vrot.slane %v1632_v4, %v7251_v20  ;;  %v983_v16 = vrot.slane %v913_v8, %v7251_v20  ;;  %v703_v18 = vrot.slane %v617_v11, %v7251_v20  ;;  %v695_v19 = vcombine.high %v693_v12, %v693_v12 }
  0xa8   : > { %v1648_v21 = vcombine.low %v694_v13, %v693_v12  ;;  %v696_v22 = vcombine.high %v617_v11, %v617_v11  ;;  %v1680_v23 = vrot.slane %v7274_v0, %v7251_v20  ;;  %v1225_v25 = vcombine.low %v1217_v3, %v1224_v14  ;;  %v621_v12 = vld [vmem:[#allocation2 + $0x38] sm:$0x3f] }
  0xa9   : > { %v1647_v26 = vcombine.low %v1639_v7, %v1646_v15  ;;  %v1227_v27 = vcombine.low %v974_v55, %v983_v16  ;;  %v711_v28 = vcombine.high %v703_v18, %v703_v18  ;;  %v581_v29 = vpop.trf.xlu1  ;;  %v549_v30 = vpop.trf.xlu0  ;;  %v1649_v31 = vcombine.low %v695_v19, %v703_v18 }
  0xaa   : > { %v1656_v32 = vrot.slane %v1648_v21, %v7251_v20  ;;  %v710_v33 = vrot.slane %v696_v22, %v7251_v20  ;;  %v728_v34 = vcombine.high %v7259_v37, %v7259_v37  ;;  %612 = vst.msk [vmem:[#allocation2 + $0x70] sm:$0xff] %vm597_vm1, %v581_v29  ;;  %610 = vst.msk [vmem:[#allocation2 + $0x60] sm:$0xff] %vm597_vm1, %v549_v30  ;;  %6640 = vmatprep.mubr.msk.f32.mxu1 %vm597_vm1, %v1225_v25 }
  0xab   : > { %6664 = vmatmul.mubr.msk.f32.vlgmr.msra.gmra.mrb[0].mxu0 %vm597_vm1, %v1647_v26  ;;  %v1241_v36 = vrot.slane %v1227_v27, %v7251_v20  ;;  %v736_v38 = vrot.slane %v7289_v24, %v7251_v20  ;;  %v976_v39 = vcombine.high %v913_v8, %v913_v8  ;;  %v1663_v40 = vrot.slane %v1649_v31, %v7251_v20  ;;  %v917_v31 = vld [vmem:[#allocation2 + $0x31] sm:$0xff] }
  0xac   : > { %6685 = vmatpush3.msk.msra.mxu0 %vm1475_vm0, %v7235_v9  ;;  %v1665_v41 = vcombine.low %v711_v28, %v710_v33  ;;  %v1682_v42 = vcombine.low %v7259_v37, %v728_v34  ;;  %v991_v43 = vcombine.high %v983_v16, %v983_v16  ;;  %v1000_v47 = vrot.slane %v914_v35, %v7251_v20 }
  0xad   : > { %v1242_v44 = vcombine.low %v1234_v10, %v1241_v36  ;;  %v744_v45 = vcombine.high %v736_v38, %v736_v38  ;;  %v990_v46 = vrot.slane %v976_v39, %v7251_v20  ;;  %v582_v49 = vpop.trf.xlu1  ;;  %v550_v50 = vpop.trf.xlu0  ;;  %v1664_v51 = vcombine.low %v1656_v32, %v1663_v40  ;;  %v918_v36 = vld [vmem:[#allocation2 + $0x39] sm:$0x3f] }
  0xae   : > { %v1673_v52 = vrot.slane %v1665_v41, %v7251_v20  ;;  %v1690_v9 = vrot.slane %v1682_v42, %v7251_v20  ;;  %v993_v53 = vcombine.high %v914_v35, %v914_v35  ;;  %613 = vst.msk [vmem:[#allocation2 + $0x78] sm:$0xff] %vm597_vm1, %v582_v49  ;;  %611 = vst.msk [vmem:[#allocation2 + $0x68] sm:$0xff] %vm597_vm1, %v550_v50 }
  0xaf   : > { %6641 = vmatmul.mubr.msk.f32.vlgmr.msra.gmra.mrb[0].mxu1 %vm597_vm1, %v1242_v44  ;;  %v1683_v37 = vcombine.low %v736_v38, %v744_v45  ;;  %v992_v55 = vcombine.high %v990_v46, %v990_v46  ;;  %v1243_v56 = vcombine.low %v991_v43, %v990_v46  ;;  %v1008_v57 = vcombine.high %v1000_v47, %v1000_v47  ;;  %v622_v46 = vld [vmem:[#allocation2 + $0x40] sm:$0xff] }
  0xb0   : > { %6666 = vmatprep.mubr.msk.f32.mxu0 %vm597_vm1, %v1664_v51  ;;  %v1681_v58 = vcombine.low %v1673_v52, %v1680_v23  ;;  %v1007_v59 = vrot.slane %v993_v53, %v7251_v20  ;;  %v1016_v60 = vrot.slane %v915_v48, %v7251_v20  ;;  %v1009_v61 = vcombine.high %v915_v48, %v915_v48 }
  0xb1   : > { %v1697_v63 = vrot.slane %v1683_v37, %v7251_v20  ;;  %v1244_v0 = vcombine.low %v992_v55, %v1000_v47  ;;  %v1251_v1 = vrot.slane %v1243_v56, %v7251_v20  ;;  %v1033_v2 = vrot.slane %v7310_v54, %v7251_v20 }
  0xb2   : > { %6667 = vmatmul.mubr.msk.f32.gmra.mrb[2].mxu0 %vm597_vm1, %v1681_v58  ;;  %v1024_v3 = vcombine.high %v1016_v60, %v1016_v60  ;;  %v1260_v4 = vcombine.low %v1008_v57, %v1007_v59  ;;  %v1023_v5 = vrot.slane %v1009_v61, %v7251_v20  ;;  %v729_v6 = vcombine.high %v7289_v24, %v7289_v24 }
  0xb3   : > { %v1698_v7 = vcombine.low %v1690_v9, %v1697_v63  ;;  %v1258_v8 = vrot.slane %v1244_v0, %v7251_v20  ;;  %v1041_v10 = vcombine.high %v1033_v2, %v1033_v2  ;;  %v745_v11 = vcombine.high %v620_v62, %v620_v62 }
  0xb4   : > { %v1261_v13 = vcombine.low %v1016_v60, %v1024_v3  ;;  %v1268_v14 = vrot.slane %v1260_v4, %v7251_v20  ;;  %v1025_v15 = vcombine.high %v1023_v5, %v1023_v5  ;;  %v743_v16 = vrot.slane %v729_v6, %v7251_v20 }
  0xb5   : > { %6669 = vmatprep.mubr.msk.f32.mxu0 %vm597_vm1, %v1698_v7  ;;  %v1259_v18 = vcombine.low %v1251_v1, %v1258_v8  ;;  %v1278_v19 = vcombine.low %v1033_v2, %v1041_v10  ;;  %v752_v21 = vrot.slane %v620_v62, %v7251_v20  ;;  %v759_v22 = vrot.slane %v745_v11, %v7251_v20  ;;  %v919_v7 = vld [vmem:[#allocation2 + $0x41] sm:$0xff] }
  0xb6   : > { %v1275_v23 = vrot.slane %v1261_v13, %v7251_v20  ;;  %v1277_v24 = vcombine.low %v1023_v5, %v1025_v15  ;;  %v762_v25 = vcombine.high %v621_v12, %v621_v12  ;;  %v769_v26 = vrot.slane %v621_v12, %v7251_v20  ;;  %v624_v5 = vld [vmem:[#allocation2 + $0x50] sm:$0xff]  ;;  %v920_v13 = vld [vmem:[#allocation2 + $0x49] sm:$0x3f] }
  0xb7   : > { %6643 = vmatprep.mubr.msk.f32.mxu1 %vm597_vm1, %v1259_v18  ;;  %v1292_v27 = vrot.slane %v1278_v19, %v7251_v20  ;;  %v760_v28 = vcombine.high %v752_v21, %v752_v21  ;;  %v1699_v29 = vcombine.low %v743_v16, %v752_v21  ;;  %v761_v30 = vcombine.high %v759_v22, %v759_v22 }
  0xb8   : > { %v1276_v32 = vcombine.low %v1268_v14, %v1275_v23  ;;  %v1285_v33 = vrot.slane %v1277_v24, %v7251_v20  ;;  %v776_v34 = vrot.slane %v762_v25, %v7251_v20  ;;  %v777_v35 = vcombine.high %v769_v26, %v769_v26 }
  0xb9   : > { %v1700_v38 = vcombine.low %v760_v28, %v759_v22  ;;  %v1707_v39 = vrot.slane %v1699_v29, %v7251_v20  ;;  %v1716_v40 = vcombine.low %v761_v30, %v769_v26  ;;  %v1026_v41 = vcombine.high %v7310_v54, %v7310_v54  ;;  %v623_v54 = vld [vmem:[#allocation2 + $0x48] sm:$0x3f] }
  0xba   : > { %6644 = vmatmul.mubr.msk.f32.gmra.mrb[2].mxu1 %vm597_vm1, %v1276_v32  ;;  %v1293_v42 = vcombine.low %v1285_v33, %v1292_v27  ;;  %v1717_v43 = vcombine.low %v777_v35, %v776_v34  ;;  %v1042_v44 = vcombine.high %v917_v31, %v917_v31  ;;  %v1049_v45 = vrot.slane %v917_v31, %v7251_v20  ;;  %v921_v27 = vld [vmem:[#allocation2 + $0x51] sm:$0xff] }
  0xbb   : > { %v1714_v47 = vrot.slane %v1700_v38, %v7251_v20  ;;  %v1724_v48 = vrot.slane %v1716_v40, %v7251_v20  ;;  %v1040_v49 = vrot.slane %v1026_v41, %v7251_v20  ;;  %v1059_v50 = vcombine.high %v918_v36, %v918_v36  ;;  %v625_v38 = vld [vmem:[#allocation2 + $0x58] sm:$0x3f] }
  0xbc   : > { %6646 = vmatprep.mubr.msk.f32.mxu1 %vm597_vm1, %v1293_v42  ;;  %v1731_v51 = vrot.slane %v1717_v43, %v7251_v20  ;;  %v1056_v52 = vrot.slane %v1042_v44, %v7251_v20  ;;  %v1057_v9 = vcombine.high %v1049_v45, %v1049_v45  ;;  %v1066_v53 = vrot.slane %v918_v36, %v7251_v20  ;;  %v626_v43 = vld [vmem:[#allocation2 + $0x60] sm:$0xff] }
  0xbd   : > { %v1715_v37 = vcombine.low %v1707_v39, %v1714_v47  ;;  %v1294_v55 = vcombine.low %v1040_v49, %v1049_v45  ;;  %v1073_v56 = vrot.slane %v1059_v50, %v7251_v20  ;;  %v778_v57 = vcombine.high %v622_v46, %v622_v46 }
  0xbe   : > { %v1732_v58 = vcombine.low %v1724_v48, %v1731_v51  ;;  %v1295_v59 = vcombine.low %v1057_v9, %v1056_v52  ;;  %v1058_v60 = vcombine.high %v1056_v52, %v1056_v52  ;;  %v1074_v61 = vcombine.high %v1066_v53, %v1066_v53 }
  0xbf   : > { %6670 = vmatmul.mubr.msk.f32.gmra.mrb[4].mxu0 %vm597_vm1, %v1715_v37  ;;  %v1302_v62 = vrot.slane %v1294_v55, %v7251_v20  ;;  %v785_v63 = vrot.slane %v622_v46, %v7251_v20  ;;  %v792_v0 = vrot.slane %v778_v57, %v7251_v20  ;;  %v795_v1 = vcombine.high %v623_v54, %v623_v54 }
  0xc0   : > { %6672 = vmatprep.mubr.msk.f32.mxu0 %vm597_vm1, %v1732_v58  ;;  %v1309_v2 = vrot.slane %v1295_v59, %v7251_v20  ;;  %v1311_v3 = vcombine.low %v1058_v60, %v1066_v53  ;;  %v1312_v4 = vcombine.low %v1074_v61, %v1073_v56  ;;  %v802_v6 = vrot.slane %v623_v54, %v7251_v20 }
  0xc1   : > { %v793_v8 = vcombine.high %v785_v63, %v785_v63  ;;  %v794_v10 = vcombine.high %v792_v0, %v792_v0  ;;  %v809_v11 = vrot.slane %v795_v1, %v7251_v20  ;;  %v818_v12 = vrot.slane %v624_v5, %v7251_v20 }
  0xc2   : > { %v1310_v14 = vcombine.low %v1302_v62, %v1309_v2  ;;  %v1319_v15 = vrot.slane %v1311_v3, %v7251_v20  ;;  %v1326_v16 = vrot.slane %v1312_v4, %v7251_v20  ;;  %v810_v18 = vcombine.high %v802_v6, %v802_v6  ;;  %v922_v62 = vld [vmem:[#allocation2 + $0x59] sm:$0x3f]  ;;  %v923_v3 = vld [vmem:[#allocation2 + $0x61] sm:$0xff] }
  0xc3   : > { %v1733_v19 = vcombine.low %v785_v63, %v793_v8  ;;  %v1734_v21 = vcombine.low %v792_v0, %v794_v10  ;;  %v1751_v22 = vcombine.low %v809_v11, %v818_v12  ;;  %v1075_v23 = vcombine.high %v919_v7, %v919_v7 }
  0xc4   : > { %6647 = vmatmul.mubr.msk.f32.gmra.mrb[4].mxu1 %vm597_vm1, %v1310_v14  ;;  %v1327_v24 = vcombine.low %v1319_v15, %v1326_v16  ;;  %v1750_v25 = vcombine.low %v802_v6, %v810_v18  ;;  %v1082_v26 = vrot.slane %v919_v7, %v7251_v20  ;;  %v1092_v28 = vcombine.high %v920_v13, %v920_v13  ;;  %v627_v16 = vld [vmem:[#allocation2 + $0x68] sm:$0x3f] }
  0xc5   : > { %v1741_v29 = vrot.slane %v1733_v19, %v7251_v20  ;;  %v1748_v30 = vrot.slane %v1734_v21, %v7251_v20  ;;  %v1765_v31 = vrot.slane %v1751_v22, %v7251_v20  ;;  %v1089_v32 = vrot.slane %v1075_v23, %v7251_v20 }
  0xc6   : > { %6649 = vmatprep.mubr.msk.f32.mxu1 %vm597_vm1, %v1327_v24  ;;  %v1758_v33 = vrot.slane %v1750_v25, %v7251_v20  ;;  %v1090_v34 = vcombine.high %v1082_v26, %v1082_v26  ;;  %v1099_v35 = vrot.slane %v920_v13, %v7251_v20  ;;  %v1106_v36 = vrot.slane %v1092_v28, %v7251_v20  ;;  %v628_v24 = vld [vmem:[#allocation2 + $0x70] sm:$0xff] }
  0xc7   : > { %v1749_v39 = vcombine.low %v1741_v29, %v1748_v30  ;;  %v1091_v40 = vcombine.high %v1089_v32, %v1089_v32  ;;  %v1115_v41 = vrot.slane %v921_v27, %v7251_v20  ;;  %v811_v42 = vcombine.high %v624_v5, %v624_v5 }
  0xc8   : > { %v1766_v44 = vcombine.low %v1758_v33, %v1765_v31  ;;  %v1328_v45 = vcombine.low %v1082_v26, %v1090_v34  ;;  %v1107_v46 = vcombine.high %v1099_v35, %v1099_v35  ;;  %v826_v47 = vcombine.high %v818_v12, %v818_v12 }
  0xc9   : > { %6673 = vmatmul.mubr.msk.f32.gmra.mrb[6].mxu0 %vm597_vm1, %v1749_v39  ;;  %v1329_v48 = vcombine.low %v1089_v32, %v1091_v40  ;;  %v1346_v49 = vcombine.low %v1106_v36, %v1115_v41  ;;  %v825_v50 = vrot.slane %v811_v42, %v7251_v20  ;;  %v835_v51 = vrot.slane %v625_v38, %v7251_v20  ;;  %v924_v42 = vld [vmem:[#allocation2 + $0x69] sm:$0x3f] }
  0xca   : > { %6675 = vmatprep.mubr.msk.f32.mxu0 %vm597_vm1, %v1766_v44  ;;  %v1336_v52 = vrot.slane %v1328_v45, %v7251_v20  ;;  %v1345_v9 = vcombine.low %v1099_v35, %v1107_v46  ;;  %v828_v53 = vcombine.high %v625_v38, %v625_v38  ;;  %v851_v54 = vrot.slane %v626_v43, %v7251_v20 }
  0xcb   : > { %v1343_v37 = vrot.slane %v1329_v48, %v7251_v20  ;;  %v1360_v55 = vrot.slane %v1346_v49, %v7251_v20  ;;  %v827_v56 = vcombine.high %v825_v50, %v825_v50  ;;  %v1767_v57 = vcombine.low %v826_v47, %v825_v50 }
  0xcc   : > { %v1353_v58 = vrot.slane %v1345_v9, %v7251_v20  ;;  %v842_v59 = vrot.slane %v828_v53, %v7251_v20  ;;  %v843_v60 = vcombine.high %v835_v51, %v835_v51  ;;  %v859_v61 = vcombine.high %v851_v54, %v851_v54 }
  0xcd   : > { %v1344_v63 = vcombine.low %v1336_v52, %v1343_v37  ;;  %v1768_v0 = vcombine.low %v827_v56, %v835_v51  ;;  %v1775_v1 = vrot.slane %v1767_v57, %v7251_v20  ;;  %v1108_v2 = vcombine.high %v921_v27, %v921_v27  ;;  %v925_v51 = vld [vmem:[#allocation2 + $0x71] sm:$0xff] }
  0xce   : > { %v1361_v4 = vcombine.low %v1353_v58, %v1360_v55  ;;  %v1784_v5 = vcombine.low %v843_v60, %v842_v59  ;;  %v1785_v6 = vcombine.low %v851_v54, %v859_v61  ;;  %v1123_v7 = vcombine.high %v1115_v41, %v1115_v41 }
  0xcf   : > { %6650 = vmatmul.mubr.msk.f32.gmra.mrb[6].mxu1 %vm597_vm1, %v1344_v63  ;;  %v1782_v8 = vrot.slane %v1768_v0, %v7251_v20  ;;  %v1122_v10 = vrot.slane %v1108_v2, %v7251_v20  ;;  %v1132_v11 = vrot.slane %v922_v62, %v7251_v20  ;;  %v1125_v12 = vcombine.high %v922_v62, %v922_v62  ;;  %v629_v62 = vld [vmem:[#allocation2 + $0x78] sm:$0x3f] }
  0xd0   : > { %6652 = vmatprep.mubr.msk.f32.mxu1 %vm597_vm1, %v1361_v4  ;;  %v1792_v13 = vrot.slane %v1784_v5, %v7251_v20  ;;  %v1799_v14 = vrot.slane %v1785_v6, %v7251_v20  ;;  %v1148_v15 = vrot.slane %v923_v3, %v7251_v20  ;;  %v844_v18 = vcombine.high %v626_v43, %v626_v43 }
  0xd1   : > { %v1783_v19 = vcombine.low %v1775_v1, %v1782_v8  ;;  %v1124_v21 = vcombine.high %v1122_v10, %v1122_v10  ;;  %v1362_v22 = vcombine.low %v1123_v7, %v1122_v10  ;;  %v1139_v23 = vrot.slane %v1125_v12, %v7251_v20 }
  0xd2   : > { %v1800_v25 = vcombine.low %v1792_v13, %v1799_v14  ;;  %v1140_v26 = vcombine.high %v1132_v11, %v1132_v11  ;;  %v1156_v27 = vcombine.high %v1148_v15, %v1148_v15  ;;  %v858_v28 = vrot.slane %v844_v18, %v7251_v20  ;;  %v926_v18 = vld [vmem:[#allocation2 + $0x79] sm:$0x3f] }
  0xd3   : > { %6676 = vmatmul.mubr.msk.f32.gmra.mrb[8].mxu0 %vm597_vm1, %v1783_v19  ;;  %v1363_v29 = vcombine.low %v1124_v21, %v1132_v11  ;;  %v1370_v30 = vrot.slane %v1362_v22, %v7251_v20  ;;  %v868_v31 = vrot.slane %v627_v16, %v7251_v20  ;;  %v861_v32 = vcombine.high %v627_v16, %v627_v16 }
  0xd4   : > { %6678 = vmatprep.mubr.msk.f32.mxu0 %vm597_vm1, %v1800_v25  ;;  %v1379_v33 = vcombine.low %v1140_v26, %v1139_v23  ;;  %v1380_v34 = vcombine.low %v1148_v15, %v1156_v27  ;;  %v860_v35 = vcombine.high %v858_v28, %v858_v28  ;;  %v877_v36 = vcombine.high %v628_v24, %v628_v24 }
  0xd5   : > { %v1377_v38 = vrot.slane %v1363_v29, %v7251_v20  ;;  %v876_v39 = vcombine.high %v868_v31, %v868_v31  ;;  %v875_v40 = vrot.slane %v861_v32, %v7251_v20  ;;  %v884_v41 = vrot.slane %v628_v24, %v7251_v20 }
  0xd6   : > { %v1387_v43 = vrot.slane %v1379_v33, %v7251_v20  ;;  %v1394_v44 = vrot.slane %v1380_v34, %v7251_v20  ;;  %v1801_v45 = vcombine.low %v858_v28, %v860_v35  ;;  %v891_v46 = vrot.slane %v877_v36, %v7251_v20  ;;  %v2019_v28 = vld [vmem:[#allocation2 + $0xa] sm:$0x3f]  ;;  %v2020_v33 = vld [vmem:[#allocation2 + $0x12] sm:$0xff] }
  0xd7   : > { %v1378_v47 = vcombine.low %v1370_v30, %v1377_v38  ;;  %v1802_v48 = vcombine.low %v868_v31, %v876_v39  ;;  %v892_v49 = vcombine.high %v884_v41, %v884_v41  ;;  %v1818_v50 = vcombine.low %v875_v40, %v884_v41 }
  0xd8   : > { %v1395_v52 = vcombine.low %v1387_v43, %v1394_v44  ;;  %v1809_v9 = vrot.slane %v1801_v45, %v7251_v20  ;;  %v1141_v53 = vcombine.high %v923_v3, %v923_v3  ;;  %v1165_v54 = vrot.slane %v924_v42, %v7251_v20  ;;  %v2018_v3 = vld [vmem:[#allocation2 + $0x2] sm:$0xff] }
  0xd9   : > { %6653 = vmatmul.mubr.msk.f32.gmra.mrb[8].mxu1 %vm597_vm1, %v1378_v47  ;;  %v1816_v37 = vrot.slane %v1802_v48, %v7251_v20  ;;  %v1819_v55 = vcombine.low %v892_v49, %v891_v46  ;;  %v1826_v56 = vrot.slane %v1818_v50, %v7251_v20  ;;  %v1158_v57 = vcombine.high %v924_v42, %v924_v42 }
  0xda   : > { %6655 = vmatprep.mubr.msk.f32.mxu1 %vm597_vm1, %v1395_v52  ;;  %v1155_v58 = vrot.slane %v1141_v53, %v7251_v20  ;;  %v1173_v59 = vcombine.high %v1165_v54, %v1165_v54  ;;  %v1174_v60 = vcombine.high %v925_v51, %v925_v51  ;;  %v1181_v61 = vrot.slane %v925_v51, %v7251_v20  ;;  %v2021_v51 = vld [vmem:[#allocation2 + $0x1a] sm:$0x3f] }
  0xdb   : > { %v1817_v63 = vcombine.low %v1809_v9, %v1816_v37  ;;  %v1833_v0 = vrot.slane %v1819_v55, %v7251_v20  ;;  %v1172_v1 = vrot.slane %v1158_v57, %v7251_v20  ;;  %v893_v2 = vcombine.high %v891_v46, %v891_v46  ;;  %v2022_v37 = vld [vmem:[#allocation2 + $0x22] sm:$0xff] }
  0xdc   : > { %v1157_v4 = vcombine.high %v1155_v58, %v1155_v58  ;;  %v1397_v5 = vcombine.low %v1165_v54, %v1173_v59  ;;  %v1188_v6 = vrot.slane %v1174_v60, %v7251_v20  ;;  %v1189_v7 = vcombine.high %v1181_v61, %v1181_v61 }
  0xdd   : > { %6679 = vmatmul.mubr.msk.f32.gmra.mrb[10].mxu0 %vm597_vm1, %v1817_v63  ;;  %v1834_v8 = vcombine.low %v1826_v56, %v1833_v0  ;;  %v1413_v10 = vcombine.low %v1172_v1, %v1181_v61  ;;  %v894_v11 = vcombine.high %v629_v62, %v629_v62  ;;  %v901_v12 = vrot.slane %v629_v62, %v7251_v20 }
  0xde   : > { %v1396_v13 = vcombine.low %v1155_v58, %v1157_v4  ;;  %v1411_v14 = vrot.slane %v1397_v5, %v7251_v20  ;;  %v1414_v15 = vcombine.low %v1189_v7, %v1188_v6  ;;  %v2050_v16 = vcombine.high %v2018_v3, %v2018_v3 }
  0xdf   : > { %6681 = vmatprep.mubr.msk.f32.mxu0 %vm597_vm1, %v1834_v8  ;;  %v1421_v19 = vrot.slane %v1413_v10, %v7251_v20  ;;  %v908_v21 = vrot.slane %v894_v11, %v7251_v20  ;;  %v909_v22 = vcombine.high %v901_v12, %v901_v12  ;;  %v1835_v23 = vcombine.low %v893_v2, %v901_v12 }
  0xe0   : > { %v1404_v24 = vrot.slane %v1396_v13, %v7251_v20  ;;  %v1428_v25 = vrot.slane %v1414_v15, %v7251_v20  ;;  %v2057_v26 = vrot.slane %v2018_v3, %v7251_v20  ;;  %v2064_v27 = vrot.slane %v2050_v16, %v7251_v20  ;;  %v2023_v3 = vld [vmem:[#allocation2 + $0x2a] sm:$0x3f]  ;;  %v2024_v13 = vld [vmem:[#allocation2 + $0x32] sm:$0xff] }
  0xe1   : > { %v1836_v29 = vcombine.low %v909_v22, %v908_v21  ;;  %v1843_v30 = vrot.slane %v1835_v23, %v7251_v20  ;;  %v1190_v31 = vcombine.high %v1188_v6, %v1188_v6  ;;  %v1191_v32 = vcombine.high %v926_v18, %v926_v18 }
  0xe2   : > { %v1412_v34 = vcombine.low %v1404_v24, %v1411_v14  ;;  %v1429_v35 = vcombine.low %v1421_v19, %v1428_v25  ;;  %v2065_v36 = vcombine.high %v2057_v26, %v2057_v26  ;;  %v2066_v38 = vcombine.high %v2064_v27, %v2064_v27 }
  0xe3   : > { %v1850_v39 = vrot.slane %v1836_v29, %v7251_v20  ;;  %v1198_v40 = vrot.slane %v926_v18, %v7251_v20  ;;  %v1205_v41 = vrot.slane %v1191_v32, %v7251_v20  ;;  %v2067_v42 = vcombine.high %v2019_v28, %v2019_v28 }
  0xe4   : > { %6656 = vmatmul.mubr.msk.f32.gmra.mrb[10].mxu1 %vm597_vm1, %v1412_v34  ;;  %v2316_v43 = vcombine.low %v2057_v26, %v2065_v36  ;;  %v2317_v44 = vcombine.low %v2064_v27, %v2066_v38  ;;  %v2074_v45 = vrot.slane %v2019_v28, %v7251_v20  ;;  %v2090_v46 = vrot.slane %v2020_v33, %v7251_v20  ;;  %v2025_v28 = vld [vmem:[#allocation2 + $0x3a] sm:$0x3f]  ;;  %v2026_v38 = vld [vmem:[#allocation2 + $0x42] sm:$0xff] }
  0xe5   : > { %6658 = vmatprep.mubr.msk.f32.mxu1 %vm597_vm1, %v1429_v35  ;;  %v1851_v47 = vcombine.low %v1843_v30, %v1850_v39  ;;  %v1206_v48 = vcombine.high %v1198_v40, %v1198_v40  ;;  %v1430_v49 = vcombine.low %v1190_v31, %v1198_v40  ;;  %v2081_v50 = vrot.slane %v2067_v42, %v7251_v20 }
  0xe6   : > { %v2324_v52 = vrot.slane %v2316_v43, %v7251_v20  ;;  %v2331_v9 = vrot.slane %v2317_v44, %v7251_v20  ;;  %v2082_v53 = vcombine.high %v2074_v45, %v2074_v45  ;;  %v2083_v54 = vcombine.high %v2020_v33, %v2020_v33 }
  0xe7   : > { %6682 = vmatmul.mubr.msk.f32.gmra.mrb[12].mxu0 %vm597_vm1, %v1851_v47  ;;  %v1431_v55 = vcombine.low %v1206_v48, %v1205_v41  ;;  %v1438_v56 = vrot.slane %v1430_v49, %v7251_v20  ;;  %v2334_v57 = vcombine.low %v2081_v50, %v2090_v46  ;;  %v2098_v58 = vcombine.high %v2090_v46, %v2090_v46  ;;  %v2027_v47 = vld [vmem:[#allocation2 + $0x4a] sm:$0x3f] }
  0xe8   : > { %v2332_v59 = vcombine.low %v2324_v52, %v2331_v9  ;;  %v2333_v60 = vcombine.low %v2074_v45, %v2082_v53  ;;  %v2097_v61 = vrot.slane %v2083_v54, %v7251_v20  ;;  %v2107_v62 = vrot.slane %v2021_v51, %v7251_v20 }
  0xe9   : > { %v1445_v63 = vrot.slane %v1431_v55, %v7251_v20  ;;  %v2348_v0 = vrot.slane %v2334_v57, %v7251_v20  ;;  %v2100_v1 = vcombine.high %v2021_v51, %v2021_v51  ;;  %v2123_v2 = vrot.slane %v2022_v37, %v7251_v20 }
  0xea   : > { %6686 = vmatprep.mubr.msk.f32.mxu0 %vm597_vm1, %v2332_v59  ;;  %v2341_v4 = vrot.slane %v2333_v60, %v7251_v20  ;;  %v2099_v5 = vcombine.high %v2097_v61, %v2097_v61  ;;  %v2350_v6 = vcombine.low %v2098_v58, %v2097_v61  ;;  %v2115_v7 = vcombine.high %v2107_v62, %v2107_v62  ;;  %v2029_v59 = vld [vmem:[#allocation2 + $0x5a] sm:$0x3f] }
  0xeb   : > { %v1446_v8 = vcombine.low %v1438_v56, %v1445_v63  ;;  %v2114_v10 = vrot.slane %v2100_v1, %v7251_v20  ;;  %v2131_v11 = vcombine.high %v2123_v2, %v2123_v2  ;;  %v2116_v12 = vcombine.high %v2022_v37, %v2022_v37  ;;  %v2028_v37 = vld [vmem:[#allocation2 + $0x52] sm:$0xff] }
  0xec   : > { %v2349_v14 = vcombine.low %v2341_v4, %v2348_v0  ;;  %v2351_v15 = vcombine.low %v2099_v5, %v2107_v62  ;;  %v2358_v16 = vrot.slane %v2350_v6, %v7251_v20  ;;  %v2140_v18 = vrot.slane %v2023_v3, %v7251_v20 }
  0xed   : > { %6659 = vmatmul.mubr.msk.f32.gmra.mrb[12].mxu1 %vm597_vm1, %v1446_v8  ;;  %v2367_v19 = vcombine.low %v2115_v7, %v2114_v10  ;;  %v2368_v21 = vcombine.low %v2123_v2, %v2131_v11  ;;  %v2130_v22 = vrot.slane %v2116_v12, %v7251_v20  ;;  %v2133_v23 = vcombine.high %v2023_v3, %v2023_v3 }
  0xee   : > { %6687 = vmatmul.mubr.msk.f32.vlgmr.msra.gmra.mrb[0].mxu0 %vm597_vm1, %v2349_v14  ;;  %v2365_v24 = vrot.slane %v2351_v15, %v7251_v20  ;;  %v2148_v25 = vcombine.high %v2140_v18, %v2140_v18  ;;  %v2149_v26 = vcombine.high %v2024_v13, %v2024_v13  ;;  %v2156_v27 = vrot.slane %v2024_v13, %v7251_v20  ;;  %v2030_v13 = vld [vmem:[#allocation2 + $0x62] sm:$0xff] }
  0xef   : > { %v2375_v29 = vrot.slane %v2367_v19, %v7251_v20  ;;  %v2382_v30 = vrot.slane %v2368_v21, %v7251_v20  ;;  %v2132_v31 = vcombine.high %v2130_v22, %v2130_v22  ;;  %v2147_v32 = vrot.slane %v2133_v23, %v7251_v20  ;;  %v2031_v19 = vld [vmem:[#allocation2 + $0x6a] sm:$0x3f] }
  0xf0   : > { %v2366_v33 = vcombine.low %v2358_v16, %v2365_v24  ;;  %v2385_v34 = vcombine.low %v2140_v18, %v2148_v25  ;;  %v2163_v35 = vrot.slane %v2149_v26, %v7251_v20  ;;  %v2164_v36 = vcombine.high %v2156_v27, %v2156_v27 }
  0xf1   : > { %v2383_v39 = vcombine.low %v2375_v29, %v2382_v30  ;;  %v2384_v40 = vcombine.low %v2130_v22, %v2132_v31  ;;  %v2401_v41 = vcombine.low %v2147_v32, %v2156_v27  ;;  %v2166_v42 = vcombine.high %v2025_v28, %v2025_v28  ;;  %v2032_v29 = vld [vmem:[#allocation2 + $0x72] sm:$0xff] }
  0xf2   : > { %6689 = vmatprep.mubr.msk.f32.mxu0 %vm597_vm1, %v2366_v33  ;;  %v2399_v43 = vrot.slane %v2385_v34, %v7251_v20  ;;  %v2402_v44 = vcombine.low %v2164_v36, %v2163_v35  ;;  %v2165_v45 = vcombine.high %v2163_v35, %v2163_v35  ;;  %v2173_v46 = vrot.slane %v2025_v28, %v7251_v20 }
  0xf3   : > { %6690 = vmatmul.mubr.msk.f32.gmra.mrb[2].mxu0 %vm597_vm1, %v2383_v39  ;;  %v2392_v48 = vrot.slane %v2384_v40, %v7251_v20  ;;  %v2409_v49 = vrot.slane %v2401_v41, %v7251_v20  ;;  %v2180_v50 = vrot.slane %v2166_v42, %v7251_v20  ;;  %v2182_v51 = vcombine.high %v2026_v38, %v2026_v38 }
  0xf4   : > { %v2416_v52 = vrot.slane %v2402_v44, %v7251_v20  ;;  %v2181_v9 = vcombine.high %v2173_v46, %v2173_v46  ;;  %v2418_v53 = vcombine.low %v2165_v45, %v2173_v46  ;;  %v2189_v54 = vrot.slane %v2026_v38, %v7251_v20 }
  0xf5   : > { %v2400_v55 = vcombine.low %v2392_v48, %v2399_v43  ;;  %v2196_v56 = vrot.slane %v2182_v51, %v7251_v20  ;;  %v2199_v57 = vcombine.high %v2027_v47, %v2027_v47  ;;  %v2206_v58 = vrot.slane %v2027_v47, %v7251_v20  ;;  %v2033_v43 = vld [vmem:[#allocation2 + $0x7a] sm:$0x3f] }
  0xf6   : > { %v2417_v60 = vcombine.low %v2409_v49, %v2416_v52  ;;  %v2419_v61 = vcombine.low %v2181_v9, %v2180_v50  ;;  %v2426_v62 = vrot.slane %v2418_v53, %v7251_v20  ;;  %v2197_v63 = vcombine.high %v2189_v54, %v2189_v54 }
  0xf7   : > { %6692 = vmatprep.mubr.msk.f32.mxu0 %vm597_vm1, %v2400_v55  ;;  %v2198_v0 = vcombine.high %v2196_v56, %v2196_v56  ;;  %v2213_v1 = vrot.slane %v2199_v57, %v7251_v20  ;;  %v2214_v2 = vcombine.high %v2206_v58, %v2206_v58  ;;  %v2222_v3 = vrot.slane %v2028_v37, %v7251_v20 }
  0xf8   : > { %6693 = vmatmul.mubr.msk.f32.gmra.mrb[4].mxu0 %vm597_vm1, %v2417_v60  ;;  %v2433_v4 = vrot.slane %v2419_v61, %v7251_v20  ;;  %v2435_v5 = vcombine.low %v2189_v54, %v2197_v63  ;;  %v2215_v6 = vcombine.high %v2028_v37, %v2028_v37  ;;  %v2239_v7 = vrot.slane %v2029_v59, %v7251_v20 }
  0xf9   : > { %v2436_v8 = vcombine.low %v2196_v56, %v2198_v0  ;;  %v2452_v10 = vcombine.low %v2206_v58, %v2214_v2  ;;  %v2453_v11 = vcombine.low %v2213_v1, %v2222_v3  ;;  %v2230_v12 = vcombine.high %v2222_v3, %v2222_v3 }
  0xfa   : > { %v2434_v14 = vcombine.low %v2426_v62, %v2433_v4  ;;  %v2443_v15 = vrot.slane %v2435_v5, %v7251_v20  ;;  %v2229_v16 = vrot.slane %v2215_v6, %v7251_v20  ;;  %v2232_v18 = vcombine.high %v2029_v59, %v2029_v59 }
  0xfb   : > { %v2450_v21 = vrot.slane %v2436_v8, %v7251_v20  ;;  %v2460_v22 = vrot.slane %v2452_v10, %v7251_v20  ;;  %v2467_v23 = vrot.slane %v2453_v11, %v7251_v20  ;;  %v2247_v24 = vcombine.high %v2239_v7, %v2239_v7  ;;  %v6443_v10 = vld [vmem:[%s8412_s3 + $0x80] sm:$0xff]  ;;  %v6444_v11 = vld [vmem:[%s8412_s3 + $0x88] sm:$0xff] }
  0xfc   : > { %6695 = vmatprep.mubr.msk.f32.mxu0 %vm597_vm1, %v2434_v14  ;;  %v2231_v25 = vcombine.high %v2229_v16, %v2229_v16  ;;  %v2469_v26 = vcombine.low %v2230_v12, %v2229_v16  ;;  %v2246_v27 = vrot.slane %v2232_v18, %v7251_v20  ;;  %v2255_v28 = vrot.slane %v2030_v13, %v7251_v20  ;;  %v6468_v14 = vld [vmem:[%s8412_s3 + $0x108] sm:$0xff] }
  0xfd   : > { %v2451_v30 = vcombine.low %v2443_v15, %v2450_v21  ;;  %v2468_v31 = vcombine.low %v2460_v22, %v2467_v23  ;;  %v2248_v32 = vcombine.high %v2030_v13, %v2030_v13  ;;  %v2272_v33 = vrot.slane %v2031_v19, %v7251_v20  ;;  %v6467_v13 = vld [vmem:[%s8412_s3 + $0x100] sm:$0xff]  ;;  %v6445_v21 = vld [vmem:[%s8412_s3 + $0x90] sm:$0xff]  ;;  %v6446_v22 = vld [vmem:[%s8412_s3 + $0x98] sm:$0xff] }
  0xfe   : > { %v2470_v34 = vcombine.low %v2231_v25, %v2239_v7  ;;  %v2477_v35 = vrot.slane %v2469_v26, %v7251_v20  ;;  %v2263_v36 = vcombine.high %v2255_v28, %v2255_v28  ;;  %v2486_v38 = vcombine.low %v2247_v24, %v2246_v27  ;;  %v6469_v24 = vld [vmem:[%s8412_s3 + $0x110] sm:$0xff]  ;;  %v6470_v25 = vld [vmem:[%s8412_s3 + $0x118] sm:$0xff]  ;;  %v6447_v27 = vld [vmem:[%s8412_s3 + $0xa0] sm:$0xff] }
  0xff   : > { %6696 = vmatmul.mubr.msk.f32.gmra.mrb[6].mxu0 %vm597_vm1, %v2451_v30  ;;  %v2262_v39 = vrot.slane %v2248_v32, %v7251_v20  ;;  %v2280_v40 = vcombine.high %v2272_v33, %v2272_v33  ;;  %v2265_v41 = vcombine.high %v2031_v19, %v2031_v19  ;;  %v2281_v42 = vcombine.high %v2032_v29, %v2032_v29  ;;  %v6471_v30 = vld [vmem:[%s8412_s3 + $0x120] sm:$0xff]  ;;  %v6449_v32 = vld [vmem:[%s8412_s3 + $0xb0] sm:$0xff] }
 0x100   : > { %6698 = vmatprep.mubr.msk.f32.mxu0 %vm597_vm1, %v2468_v31  ;;  %v2484_v44 = vrot.slane %v2470_v34, %v7251_v20  ;;  %v2487_v45 = vcombine.low %v2255_v28, %v2263_v36  ;;  %v2494_v46 = vrot.slane %v2486_v38, %v7251_v20  ;;  %v2288_v47 = vrot.slane %v2032_v29, %v7251_v20  ;;  %v6448_v28 = vld [vmem:[%s8412_s3 + $0xa8] sm:$0xff]  ;;  %v6450_v34 = vld [vmem:[%s8412_s3 + $0xb8] sm:$0xff] }
 0x101   : > { %v2264_v48 = vcombine.high %v2262_v39, %v2262_v39  ;;  %v2504_v49 = vcombine.low %v2272_v33, %v2280_v40  ;;  %v2279_v50 = vrot.slane %v2265_v41, %v7251_v20  ;;  %v2295_v51 = vrot.slane %v2281_v42, %v7251_v20  ;;  %v6472_v31 = vld [vmem:[%s8412_s3 + $0x128] sm:$0xff]  ;;  %v6474_v36 = vld [vmem:[%s8412_s3 + $0x138] sm:$0xff]  ;;  %v6451_v41 = vld [vmem:[%s8412_s3 + $0xc0] sm:$0xff] }
 0x102   : > { %v2485_v52 = vcombine.low %v2477_v35, %v2484_v44  ;;  %v2501_v9 = vrot.slane %v2487_v45, %v7251_v20  ;;  %v2296_v53 = vcombine.high %v2288_v47, %v2288_v47  ;;  %v2298_v54 = vcombine.high %v2033_v43, %v2033_v43  ;;  %v6473_v35 = vld [vmem:[%s8412_s3 + $0x130] sm:$0xff]  ;;  %v6452_v42 = vld [vmem:[%s8412_s3 + $0xc8] sm:$0xff] }
 0x103   : > { %v2503_v37 = vcombine.low %v2262_v39, %v2264_v48  ;;  %v2520_v55 = vcombine.low %v2279_v50, %v2288_v47  ;;  %v2297_v56 = vcombine.high %v2295_v51, %v2295_v51  ;;  %v2305_v59 = vrot.slane %v2033_v43, %v7251_v20  ;;  %v6475_v43 = vld [vmem:[%s8412_s3 + $0x140] sm:$0xff]  ;;  %v6476_v44 = vld [vmem:[%s8412_s3 + $0x148] sm:$0xff]  ;;  %v6454_v50 = vld [vmem:[%s8412_s3 + $0xd8] sm:$0xff] }
 0x104   : > { %6699 = vmatmul.mubr.msk.f32.gmra.mrb[8].mxu0 %vm597_vm1, %v2485_v52  ;;  %v2502_v57 = vcombine.low %v2494_v46, %v2501_v9  ;;  %v2521_v58 = vcombine.low %v2296_v53, %v2295_v51  ;;  %v2312_v60 = vrot.slane %v2298_v54, %v7251_v20  ;;  %v2518_v62 = vrot.slane %v2504_v49, %v7251_v20  ;;  %v6453_v49 = vld [vmem:[%s8412_s3 + $0xd0] sm:$0xff]  ;;  %v6478_v52 = vld [vmem:[%s8412_s3 + $0x158] sm:$0xff]  ;;  %v6455_v54 = vld [vmem:[%s8412_s3 + $0xe0] sm:$0xff] }
 0x105   : > { %v2511_v61 = vrot.slane %v2503_v37, %v7251_v20  ;;  %v2528_v63 = vrot.slane %v2520_v55, %v7251_v20  ;;  %v2313_v1 = vcombine.high %v2305_v59, %v2305_v59  ;;  %v2537_v2 = vcombine.low %v2297_v56, %v2305_v59  ;;  %v6477_v51 = vld [vmem:[%s8412_s3 + $0x150] sm:$0xff]  ;;  %v6456_v37 = vld [vmem:[%s8412_s3 + $0xe8] sm:$0xff]  ;;  %v6479_v55 = vld [vmem:[%s8412_s3 + $0x160] sm:$0xff] }
 0x106   : > { %6701 = vmatprep.mubr.msk.f32.mxu0 %vm597_vm1, %v2502_v57  ;;  %v2535_v0 = vrot.slane %v2521_v58, %v7251_v20  ;;  %v6919_v12 = vpack.c.bf16 %v6444_v11, %v6443_v10  ;;  %v7159_v15 = vmov 0.0|0.0   ;;  %v6967_v16 = vpack.c.bf16 %v6468_v14, %v6467_v13  ;;  %v6480_v56 = vld [vmem:[%s8412_s3 + $0x168] sm:$0xff] }
 0x107   : > { %v2519_v3 = vcombine.low %v2511_v61, %v2518_v62  ;;  %v2538_v5 = vcombine.low %v2313_v1, %v2312_v60  ;;  %v2545_v6 = vrot.slane %v2537_v2, %v7251_v20  ;;  %6918 = vmatprep.subr.bf16.mxu1 %v7159_v15  ;;  %6966 = vmatprep.subr.bf16.mxu0 %v7159_v15  ;;  %v7161_v38 = vmov 0.0   ;;  %v6457_v60 = vld [vmem:[%s8412_s3 + $0xf0] sm:$0xff]  ;;  %v6458_v61 = vld [vmem:[%s8412_s3 + $0xf8] sm:$0xff] }
 0x108   : > { %v2536_v4 = vcombine.low %v2528_v63, %v2535_v0  ;;  %6920 = vmatpush3.bf16.msra.mxu1 %v6919_v12  ;;  %6968 = vmatpush3.bf16.msra.mxu0 %v6967_v16  ;;  %v6922_v23 = vpack.c.bf16 %v6446_v22, %v6445_v21  ;;  %v6970_v26 = vpack.c.bf16 %v6470_v25, %v6469_v24  ;;  %v6481_v63 = vld [vmem:[%s8412_s3 + $0x170] sm:$0xff]  ;;  %v6482_v0 = vld [vmem:[%s8412_s3 + $0x178] sm:$0xff]  ;;  %v7162_v10 = vmov 1966171168   ;;  %v7656_v16 = vld [vmem:[%s8411_s2] ss:$0 sm:$0xff] }
 0x109   : > { %6702 = vmatmul.mubr.msk.f32.gmra.mrb[10].mxu0 %vm597_vm1, %v2519_v3  ;;  %v2552_v7 = vrot.slane %v2538_v5, %v7251_v20  ;;  %6921 = vmatprep.subr.bf16.mxu1 %v7159_v15  ;;  %v6925_v29 = vpack.c.bf16 %v6448_v28, %v6447_v27  ;;  %v6973_v33 = vpack.c.bf16 %v6472_v31, %v6471_v30  ;;  %v3382_v11 = vunpack.c.l.s4 %v7162_v10  ;;  %v7663_v25 = vld [vmem:[%s8412_s3] sm:$0xff]  ;;  %v7673_v27 = vld [vmem:[%s8412_s3 + $0x10] sm:$0xff] }
 0x10a   : > { %6704 = vmatprep.mubr.msk.f32.mxu0 %vm597_vm1, %v2536_v4  ;;  %6969 = vmatprep.subr.bf16.mxu0 %v7159_v15  ;;  %v6928_v39 = vpack.c.bf16 %v6450_v34, %v6449_v32  ;;  %v6976_v40 = vpack.c.bf16 %v6474_v36, %v6473_v35  ;;  %v6931_v47 = vpack.c.bf16 %v6452_v42, %v6451_v41  ;;  %v7684_v28 = vld [vmem:[%s8412_s3 + $0x20] sm:$0xff]  ;;  %v7695_v31 = vld [vmem:[%s8412_s3 + $0x30] sm:$0xff]  ;;  %v7700_v32 = vld [vmem:[%s8412_s3 + $0x38] sm:$0xff] }
 0x10b   : > { %v2553_v8 = vcombine.low %v2545_v6, %v2552_v7  ;;  %6739 = vmatprep.mubr.msk.f32.mxu1 %vm7160_vm2, %v7161_v38  ;;  %v6979_v48 = vpack.c.bf16 %v6476_v44, %v6475_v43  ;;  %v6934_v9 = vpack.c.bf16 %v6454_v50, %v6453_v49  ;;  %v6982_v53 = vpack.c.bf16 %v6478_v52, %v6477_v51  ;;  %v7739_v52 = vld [vmem:[%s8412_s3 + $0x60] sm:$0xff] }
 0x10c   : > { %6923 = vmatpush3.bf16.msra.mxu1 %v6922_v23  ;;  %6971 = vmatpush3.bf16.msra.mxu0 %v6970_v26  ;;  %v6937_v57 = vpack.c.bf16 %v6456_v37, %v6455_v54  ;;  %v6985_v59 = vpack.c.bf16 %v6480_v56, %v6479_v55  ;;  %v6940_v1 = vpack.c.bf16 %v6458_v61, %v6457_v60  ;;  %v3383_v21 = vunpack.c.0.s8 %v3382_v11  ;;  %v7668_v26 = vld [vmem:[%s8412_s3 + $0x8] sm:$0xff] }
 0x10d   : > { %6705 = vmatmul.mubr.msk.f32.gmra.mrb[12].mxu0 %vm597_vm1, %v2553_v8  ;;  %6924 = vmatprep.subr.bf16.mxu1 %v7159_v15  ;;  %v6988_v2 = vpack.c.bf16 %v6482_v0, %v6481_v63  ;;  %v6943_v36 = vpack.c.bf16 %v7668_v26, %v7663_v25  ;;  %v6952_v51 = vpack.c.bf16 %v7700_v32, %v7695_v31 }
 0x10e   : > { %6972 = vmatprep.subr.bf16.mxu0 %v7159_v15  ;;  %6833 = vmatprep.mubr.msk.f32.mxu0 %vm7160_vm2, %v7161_v38 }
 0x110   : > { %6926 = vmatpush3.bf16.msra.mxu1 %v6925_v29  ;;  %6974 = vmatpush3.bf16.msra.mxu0 %v6973_v33  ;;  %v7689_v29 = vld [vmem:[%s8412_s3 + $0x28] sm:$0xff]  ;;  %v7703_v33 = vsub.s32 %v3383_v21, %v7246_v17 }
 0x111   : > { %6927 = vmatprep.subr.bf16.mxu1 %v7159_v15  ;;  %6975 = vmatprep.subr.bf16.mxu0 %v7159_v15  ;;  %v6949_v44 = vpack.c.bf16 %v7689_v29, %v7684_v28 }
 0x114   : > { %6929 = vmatpush3.bf16.msra.mxu1 %v6928_v39  ;;  %6977 = vmatpush3.bf16.msra.mxu0 %v6976_v40  ;;  %v7710_v39 = vld [vmem:[%s8412_s3 + $0x40] sm:$0xff]  ;;  %v7715_v40 = vld [vmem:[%s8412_s3 + $0x48] sm:$0xff] }
 0x115   : > { %6930 = vmatprep.subr.bf16.mxu1 %v7159_v15  ;;  %6978 = vmatprep.subr.bf16.mxu0 %v7159_v15 }
 0x118   : > { %6932 = vmatpush3.bf16.msra.mxu1 %v6931_v47  ;;  %6980 = vmatpush3.bf16.msra.mxu0 %v6979_v48  ;;  %v7725_v47 = vld [vmem:[%s8412_s3 + $0x50] sm:$0xff]  ;;  %v7730_v48 = vld [vmem:[%s8412_s3 + $0x58] sm:$0xff] }
 0x119   : > { %6933 = vmatprep.subr.bf16.mxu1 %v7159_v15  ;;  %6981 = vmatprep.subr.bf16.mxu0 %v7159_v15 }
 0x11c   : > { %6935 = vmatpush3.bf16.msra.mxu1 %v6934_v9  ;;  %6983 = vmatpush3.bf16.msra.mxu0 %v6982_v53  ;;  %v7744_v9 = vld [vmem:[%s8412_s3 + $0x68] sm:$0xff] }
 0x11d   : > { %6936 = vmatprep.subr.bf16.mxu1 %v7159_v15  ;;  %6984 = vmatprep.subr.bf16.mxu0 %v7159_v15 }
 0x120   : > { %6938 = vmatpush3.bf16.msra.mxu1 %v6937_v57  ;;  %6986 = vmatpush3.bf16.msra.mxu0 %v6985_v59  ;;  %v6958_v59 = vpack.c.bf16 %v7730_v48, %v7725_v47 }
 0x121   : > { %6939 = vmatprep.subr.bf16.mxu1 %v7159_v15  ;;  %6987 = vmatprep.subr.bf16.mxu0 %v7159_v15 }
 0x124   : > { %6941 = vmatpush3.bf16.msra.mxu1 %v6940_v1  ;;  %6989 = vmatpush3.bf16.msra.mxu0 %v6988_v2  ;;  %v6961_v1 = vpack.c.bf16 %v7744_v9, %v7739_v52 }
 0x125   : > { %6942 = vmatprep.subr.bf16.mxu1 %v7159_v15  ;;  %7014 = vmatprep.subr.bf16.mxu0 %v7159_v15 }
 0x182   : > { %v7521_v18 = vpop.f32.mrb[0].mxu1 }
 0x183   : > { %v7523_v19 = vpop.f32.mrb[1].mxu1 }
 0x18d   : > { %v7583_v45 = vpop.f32.mrb[2].mxu1 }
 0x18e   : > { %v7585_v46 = vpop.f32.mrb[3].mxu1 }
 0x197   : > { %v7615_v58 = vpop.f32.mrb[4].mxu1 }
 0x198   : > { %v7624_v62 = vpop.f32.mrb[5].mxu1 }
 0x1a2   : > { %v7637_v3 = vpop.f32.mrb[6].mxu1 }
 0x1a3   : > { %v7639_v4 = vpop.f32.mrb[7].mxu1 }
 0x1ac   : > { %v7641_v5 = vpop.f32.mrb[8].mxu1 }
 0x1ad   : > { %v7643_v6 = vpop.f32.mrb[9].mxu1 }
 0x1b7   : > { %v7645_v7 = vpop.f32.mrb[10].mxu1 }
 0x1b8   : > { %v7647_v8 = vpop.f32.mrb[11].mxu1 }
 0x1c0   : > { %v7649_v12 = vpop.f32.mrb[12].mxu1 }
 0x1c1   : > { %v7651_v13 = vpop.f32.mrb[13].mxu1  ;;  %v6688_v14 = vpop.f32.mrb[0].mxu0 }
 0x1c2   : > { %v7038_v22 = vadd.f32 %v6688_v14, %v7521_v18  ;;  %v2651_v23 = vpop.f32.mrb[1].mxu0 }
 0x1c3   : > { %v7039_v24 = vadd.f32 %v2651_v23, %v7523_v19  ;;  %v7679_v19 = vld [vmem:[%s8412_s3 + $0x18] sm:$0xff] }
 0x1c4   : > { %v2742_v18 = vadd.f32 %v7038_v22, %v7656_v16  ;;  %v6946_v43 = vpack.c.bf16 %v7679_v19, %v7673_v27 }
 0x1c5   : > { %v2741_v30 = vadd.f32 %v7039_v24, %v7656_v16 }
 0x1c6   : > { %v2756_v34 = vmax.f32 %v2742_v18, 0.0  ;;  %v6691_v35 = vpop.f32.mrb[2].mxu0 }
 0x1c7   : > { %v2755_v41 = vmax.f32 %v2741_v30, 0.0  ;;  %v7040_v42 = vadd.f32 %v6691_v35, %v7583_v45  ;;  %v2661_v17 = vpop.f32.mrb[3].mxu0 }
 0x1c8   : > { %v2800_v49 = vcombine.high %v2756_v34, %v2756_v34  ;;  %v2807_v45 = vrot.slane %v2756_v34, %v7251_v20  ;;  %v7041_v50 = vadd.f32 %v2661_v17, %v7585_v46  ;;  %v6955_v46 = vpack.c.bf16 %v7715_v40, %v7710_v39 }
 0x1c9   : > { %v2783_v53 = vcombine.high %v2755_v41, %v2755_v41  ;;  %v2790_v54 = vrot.slane %v2755_v41, %v7251_v20  ;;  %v2744_v37 = vadd.f32 %v7040_v42, %v7656_v16 }
 0x1ca   : > { %v2814_v55 = vrot.slane %v2800_v49, %v7251_v20  ;;  %v2815_v56 = vcombine.high %v2807_v45, %v2807_v45  ;;  %v2743_v57 = vadd.f32 %v7041_v50, %v7656_v16 }
 0x1cb   : > { %v2797_v60 = vrot.slane %v2783_v53, %v7251_v20  ;;  %v2798_v61 = vcombine.high %v2790_v54, %v2790_v54  ;;  %v2758_v63 = vmax.f32 %v2744_v37, 0.0  ;;  %v6694_v0 = vpop.f32.mrb[4].mxu0 }
 0x1cc   : > { %v3038_v2 = vcombine.low %v2807_v45, %v2815_v56  ;;  %v3052_v10 = vrot.slane %v2814_v55, %v7251_v20  ;;  %v2757_v11 = vmax.f32 %v2743_v57, 0.0  ;;  %v2816_v14 = vcombine.high %v2814_v55, %v2814_v55  ;;  %v2671_v21 = vpop.f32.mrb[5].mxu0 }
 0x1cd   : > { %v2799_v22 = vcombine.high %v2797_v60, %v2797_v60  ;;  %v3021_v23 = vcombine.low %v2790_v54, %v2798_v61  ;;  %v2834_v24 = vcombine.high %v2758_v63, %v2758_v63  ;;  %v2841_v18 = vrot.slane %v2758_v63, %v7251_v20 }
 0x1ce   : > { %v3045_v30 = vrot.slane %v3038_v2, %v7251_v20  ;;  %v2817_v34 = vcombine.high %v2757_v11, %v2757_v11  ;;  %v2824_v35 = vrot.slane %v2757_v11, %v7251_v20  ;;  %v7042_v41 = vadd.f32 %v6694_v0, %v7615_v58 }
 0x1cf   : > { %v3022_v42 = vcombine.low %v2797_v60, %v2799_v22  ;;  %v3029_v17 = vrot.slane %v3021_v23, %v7251_v20  ;;  %v2848_v49 = vrot.slane %v2834_v24, %v7251_v20  ;;  %v2849_v45 = vcombine.high %v2841_v18, %v2841_v18 }
 0x1d0   : > { %v3053_v50 = vcombine.low %v3045_v30, %v3052_v10  ;;  %v2831_v53 = vrot.slane %v2817_v34, %v7251_v20  ;;  %v2832_v54 = vcombine.high %v2824_v35, %v2824_v35  ;;  %v3054_v37 = vcombine.low %v2816_v14, %v2824_v35 }
 0x1d1   : > { %v3036_v55 = vrot.slane %v3022_v42, %v7251_v20  ;;  %v2850_v56 = vcombine.high %v2848_v49, %v2848_v49  ;;  %v3085_v57 = vrot.slane %v2849_v45, %v7251_v20  ;;  %v2746_v61 = vadd.f32 %v7042_v41, %v7656_v16 }
 0x1d2   : > { %3302 = vst [vmem:[#allocation3 + $0x8] sm:$0x3f] %v3053_v50  ;;  %v2833_v58 = vcombine.high %v2831_v53, %v2831_v53  ;;  %v3055_v60 = vcombine.low %v2832_v54, %v2831_v53  ;;  %v3062_v63 = vrot.slane %v3054_v37, %v7251_v20  ;;  %v7043_v0 = vadd.f32 %v2671_v21, %v7624_v62  ;;  %v6697_v2 = vpop.f32.mrb[6].mxu0 }
 0x1d3   : > { %v3037_v10 = vcombine.low %v3029_v17, %v3036_v55  ;;  %v7770_v11 = vcombine.low %v2848_v49, %v2850_v56  ;;  %v2760_v22 = vmax.f32 %v2746_v61, 0.0  ;;  %v7044_v14 = vadd.f32 %v6697_v2, %v7637_v3  ;;  %v2681_v23 = vpop.f32.mrb[7].mxu0 }
 0x1d4   : > { %v3069_v24 = vrot.slane %v3055_v60, %v7251_v20  ;;  %v3071_v30 = vcombine.low %v2833_v58, %v2841_v18  ;;  %v2745_v34 = vadd.f32 %v7043_v0, %v7656_v16  ;;  %v7045_v35 = vadd.f32 %v2681_v23, %v7639_v4 }
 0x1d5   : > { %3301 = vst [vmem:[#allocation3] sm:$0xff] %v3037_v10  ;;  %v3095_v41 = vrot.slane %v7770_v11, %v7251_v20  ;;  %v2868_v62 = vcombine.high %v2760_v22, %v2760_v22  ;;  %v7779_v21 = vrot.slane %v2760_v22, %v7251_v20  ;;  %v2748_v42 = vadd.f32 %v7044_v14, %v7656_v16 }
 0x1d6   : > { %v3070_v17 = vcombine.low %v3062_v63, %v3069_v24  ;;  %v3078_v3 = vrot.slane %v3071_v30, %v7251_v20  ;;  %v2759_v49 = vmax.f32 %v2745_v34, 0.0  ;;  %v2747_v18 = vadd.f32 %v7045_v35, %v7656_v16 }
 0x1d7   : > { %v2882_v45 = vrot.slane %v2868_v62, %v7251_v20  ;;  %v2883_v4 = vcombine.high %v7779_v21, %v7779_v21  ;;  %v3118_v50 = vrot.slane %v7779_v21, %v7251_v20  ;;  %v2762_v53 = vmax.f32 %v2748_v42, 0.0  ;;  %v6700_v54 = vpop.f32.mrb[8].mxu0 }
 0x1d8   : > { %v3086_v37 = vcombine.low %v3078_v3, %v3085_v57  ;;  %3303 = vst [vmem:[#allocation3 + $0x10] sm:$0xff] %v3070_v17  ;;  %v2851_v55 = vcombine.high %v2759_v49, %v2759_v49  ;;  %v2858_v56 = vrot.slane %v2759_v49, %v7251_v20  ;;  %v2761_v61 = vmax.f32 %v2747_v18, 0.0  ;;  %v2691_v58 = vpop.f32.mrb[9].mxu0 }
 0x1d9   : > { %v3120_v60 = vcombine.low %v2883_v4, %v2882_v45  ;;  %v2902_v63 = vcombine.high %v2762_v53, %v2762_v53  ;;  %v2909_v0 = vrot.slane %v2762_v53, %v7251_v20  ;;  %v2884_v2 = vcombine.high %v2882_v45, %v2882_v45 }
 0x1da   : > { %3304 = vst [vmem:[#allocation3 + $0x18] sm:$0x3f] %v3086_v37  ;;  %v2865_v10 = vrot.slane %v2851_v55, %v7251_v20  ;;  %v2866_v11 = vcombine.high %v2858_v56, %v2858_v56  ;;  %v2885_v22 = vcombine.high %v2761_v61, %v2761_v61  ;;  %v2892_v14 = vrot.slane %v2761_v61, %v7251_v20 }
 0x1db   : > { %v3128_v57 = vrot.slane %v3120_v60, %v7251_v20  ;;  %v2916_v23 = vrot.slane %v2902_v63, %v7251_v20  ;;  %v2917_v24 = vcombine.high %v2909_v0, %v2909_v0  ;;  %v7046_v30 = vadd.f32 %v6700_v54, %v7641_v5 }
 0x1dc   : > { %v3317_v34 = vld [vmem:[#allocation3] ss:$2 sm:$0x7f]  ;;  %v3333_v35 = vld [vmem:[#allocation3 + $0x1] ss:$2 sm:$0x7f]  ;;  %v2867_v62 = vcombine.high %v2865_v10, %v2865_v10  ;;  %v3088_v21 = vcombine.low %v2858_v56, %v2866_v11  ;;  %v2899_v42 = vrot.slane %v2885_v22, %v7251_v20  ;;  %v2900_v17 = vcombine.high %v2892_v14, %v2892_v14 }
 0x1dd   : > { %v3348_v3 = vmax.f32 %v3317_v34, %v3333_v35  ;;  %v2918_v49 = vcombine.high %v2916_v23, %v2916_v23  ;;  %v3153_v18 = vcombine.low %v2909_v0, %v2917_v24  ;;  %v3121_v45 = vcombine.low %v2884_v2, %v2892_v14  ;;  %v6703_v4 = vpop.f32.mrb[10].mxu0 }
 0x1de   : > { %v3102_v53 = vrot.slane %v3088_v21, %v7251_v20  ;;  %v3104_v37 = vcombine.low %v2865_v10, %v2867_v62  ;;  %v2901_v55 = vcombine.high %v2899_v42, %v2899_v42  ;;  %v3137_v61 = vcombine.low %v2900_v17, %v2899_v42  ;;  %v2701_v60 = vpop.f32.mrb[11].mxu0  ;;  %v7810_v17 = vld [vmem:[%s8412_s3 + $0x70] sm:$0xff] }
 0x1df   : > { %3356 = vst [vmem:[#allocation4] sm:$0x7f] %v3348_v3  ;;  %v3154_v5 = vcombine.low %v2916_v23, %v2918_v49  ;;  %v3161_v54 = vrot.slane %v3153_v18, %v7251_v20  ;;  %v3135_v56 = vrot.slane %v3121_v45, %v7251_v20  ;;  %v2750_v63 = vadd.f32 %v7046_v30, %v7656_v16  ;;  %v7815_v3 = vld [vmem:[%s8412_s3 + $0x78] sm:$0xff] }
 0x1e0   : > { %v3103_v11 = vcombine.low %v3095_v41, %v3102_v53  ;;  %v3111_v22 = vrot.slane %v3104_v37, %v7251_v20  ;;  %v3144_v0 = vrot.slane %v3137_v61, %v7251_v20  ;;  %v3151_v2 = vrot.slane %v2901_v55, %v7251_v20  ;;  %v6706_v42 = vpop.f32.mrb[12].mxu0 }
 0x1e1   : > { %v3319_v14 = vld [vmem:[#allocation3 + $0x10] ss:$2 sm:$0x7f]  ;;  %v3335_v10 = vld [vmem:[#allocation3 + $0x11] ss:$2 sm:$0x7f]  ;;  %v3168_v24 = vrot.slane %v3154_v5, %v7251_v20  ;;  %v3136_v34 = vcombine.low %v3128_v57, %v3135_v56  ;;  %v7047_v23 = vadd.f32 %v2691_v58, %v7643_v6  ;;  %v7048_v35 = vadd.f32 %v6703_v4, %v7645_v7 }
 0x1e2   : > { %v3349_v62 = vmax.f32 %v3319_v14, %v3335_v10  ;;  %v3119_v21 = vcombine.low %v3111_v22, %v3118_v50  ;;  %3305 = vst [vmem:[#allocation3 + $0x20] sm:$0xff] %v3103_v11  ;;  %v3152_v30 = vcombine.low %v3144_v0, %v3151_v2  ;;  %v2764_v41 = vmax.f32 %v2750_v63, 0.0  ;;  %v2711_v58 = vpop.f32.mrb[13].mxu0 }
 0x1e3   : > { %v3169_v57 = vcombine.low %v3161_v54, %v3168_v24  ;;  %3307 = vst [vmem:[#allocation3 + $0x30] sm:$0xff] %v3136_v34  ;;  %v2749_v6 = vadd.f32 %v7047_v23, %v7656_v16  ;;  %v2752_v7 = vadd.f32 %v7048_v35, %v7656_v16  ;;  %v7049_v50 = vadd.f32 %v2701_v60, %v7647_v8 }
 0x1e4   : > { %3357 = vst [vmem:[#allocation4 + $0x8] sm:$0x7f] %v3349_v62  ;;  %3306 = vst [vmem:[#allocation3 + $0x28] sm:$0x3f] %v3119_v21  ;;  %v2936_v49 = vcombine.high %v2764_v41, %v2764_v41  ;;  %v2943_v18 = vrot.slane %v2764_v41, %v7251_v20  ;;  %v7050_v45 = vadd.f32 %v6706_v42, %v7649_v12 }
 0x1e5   : > { %3308 = vst [vmem:[#allocation3 + $0x38] sm:$0x3f] %v3152_v30  ;;  %v7051_v4 = vadd.f32 %v2711_v58, %v7651_v13  ;;  %3309 = vst [vmem:[#allocation3 + $0x40] sm:$0xff] %v3169_v57  ;;  %v2763_v53 = vmax.f32 %v2749_v6, 0.0  ;;  %v2766_v37 = vmax.f32 %v2752_v7, 0.0  ;;  %v2751_v55 = vadd.f32 %v7049_v50, %v7656_v16 }
 0x1e6   : > { %v6964_v61 = vpack.c.bf16 %v7815_v3, %v7810_v17  ;;  %v2950_v8 = vrot.slane %v2936_v49, %v7251_v20  ;;  %v2951_v60 = vcombine.high %v2943_v18, %v2943_v18  ;;  %v2754_v5 = vadd.f32 %v7050_v45, %v7656_v16 }
 0x1e7   : > { %v2753_v54 = vadd.f32 %v7051_v4, %v7656_v16  ;;  %v2919_v56 = vcombine.high %v2763_v53, %v2763_v53  ;;  %v2926_v12 = vrot.slane %v2763_v53, %v7251_v20  ;;  %v2970_v63 = vcombine.high %v2766_v37, %v2766_v37 }
 0x1e8   : > { %v2977_v13 = vrot.slane %v2766_v37, %v7251_v20  ;;  %v3187_v11 = vcombine.low %v2951_v60, %v2950_v8  ;;  %v2765_v22 = vmax.f32 %v2751_v55, 0.0  ;;  %v2952_v0 = vcombine.high %v2950_v8, %v2950_v8 }
 0x1e9   : > { %v2768_v2 = vmax.f32 %v2754_v5, 0.0  ;;  %v2933_v14 = vrot.slane %v2919_v56, %v7251_v20  ;;  %v2934_v10 = vcombine.high %v2926_v12, %v2926_v12  ;;  %v2984_v24 = vrot.slane %v2970_v63, %v7251_v20  ;;  %v3708_v63 = vld [vmem:[#allocation4 + $0x1] sm:$0x1f] }
 0x1ea   : > { %v2985_v34 = vcombine.high %v2977_v13, %v2977_v13  ;;  %v3201_v23 = vrot.slane %v3187_v11, %v7251_v20  ;;  %v2953_v35 = vcombine.high %v2765_v22, %v2765_v22  ;;  %v2960_v16 = vrot.slane %v2765_v22, %v7251_v20 }
 0x1eb   : > { %v3004_v62 = vcombine.high %v2768_v2, %v2768_v2  ;;  %v3321_v21 = vld [vmem:[#allocation3 + $0x20] ss:$2 sm:$0x7f]  ;;  %v3337_v30 = vld [vmem:[#allocation3 + $0x21] ss:$2 sm:$0x7f]  ;;  %v2935_v41 = vcombine.high %v2933_v14, %v2933_v14  ;;  %v3170_v42 = vcombine.low %v2926_v12, %v2934_v10  ;;  %v3184_v57 = vrot.slane %v2933_v14, %v7251_v20 }
 0x1ec   : > { %v2986_v6 = vcombine.high %v2984_v24, %v2984_v24  ;;  %v3350_v7 = vmax.f32 %v3321_v21, %v3337_v30  ;;  %v3323_v50 = vld [vmem:[#allocation3 + $0x30] ss:$2 sm:$0x7f]  ;;  %v3339_v58 = vld [vmem:[#allocation3 + $0x31] ss:$2 sm:$0x7f]  ;;  %v3220_v49 = vcombine.low %v2977_v13, %v2985_v34  ;;  %v2967_v45 = vrot.slane %v2953_v35, %v7251_v20 }
 0x1ed   : > { %v2968_v4 = vcombine.high %v2960_v16, %v2960_v16  ;;  %v3351_v53 = vmax.f32 %v3323_v50, %v3339_v58  ;;  %v3177_v37 = vrot.slane %v3170_v42, %v7251_v20  ;;  %v3186_v55 = vcombine.low %v2935_v41, %v2943_v18 }
 0x1ee   : > { %v3236_v8 = vcombine.low %v2984_v24, %v2986_v6  ;;  %3358 = vst [vmem:[#allocation4 + $0x10] sm:$0x7f] %v3350_v7  ;;  %v3234_v60 = vrot.slane %v3220_v49, %v7251_v20  ;;  %v2969_v5 = vcombine.high %v2967_v45, %v2967_v45  ;;  %v3203_v56 = vcombine.low %v2952_v0, %v2960_v16  ;;  %v7848_v6 = vld [vmem:[#allocation4 + $0x9] sm:$0x1f] }
 0x1ef   : > { %v3217_v12 = vrot.slane %v2968_v4, %v7251_v20  ;;  %3359 = vst [vmem:[#allocation4 + $0x18] sm:$0x7f] %v3351_v53  ;;  %v3185_v11 = vcombine.low %v3177_v37, %v3184_v57  ;;  %v3194_v13 = vrot.slane %v3186_v55, %v7251_v20  ;;  %v3011_v22 = vrot.slane %v2768_v2, %v7251_v20 }
 0x1f0   : > { %v3018_v14 = vrot.slane %v3004_v62, %v7251_v20  ;;  %v3210_v10 = vrot.slane %v3203_v56, %v7251_v20  ;;  %v3219_v18 = vcombine.low %v2967_v45, %v2969_v5  ;;  %v2767_v24 = vmax.f32 %v2753_v54, 0.0  ;;  %v4733_v45 = vld [vmem:[#allocation4 + $0x2] sm:$0x1f] }
 0x1f1   : > { %v3243_v34 = vrot.slane %v3236_v8, %v7251_v20  ;;  %v3202_v35 = vcombine.low %v3194_v13, %v3201_v23  ;;  %3310 = vst [vmem:[#allocation3 + $0x48] sm:$0x3f] %v3185_v11  ;;  %v3019_v0 = vcombine.high %v3011_v22, %v3011_v22  ;;  %v3724_v21 = vcombine.high %v3708_v63, %v3708_v63 }
 0x1f2   : > { %v3020_v16 = vcombine.high %v3018_v14, %v3018_v14  ;;  %v3218_v30 = vcombine.low %v3210_v10, %v3217_v12  ;;  %v3227_v41 = vrot.slane %v3219_v18, %v7251_v20  ;;  %v2987_v42 = vcombine.high %v2767_v24, %v2767_v24 }
 0x1f3   : > { %v2994_v57 = vrot.slane %v2767_v24, %v7251_v20  ;;  %3311 = vst [vmem:[#allocation3 + $0x50] sm:$0xff] %v3202_v35  ;;  %v3269_v2 = vcombine.low %v3019_v0, %v3018_v14  ;;  %v3731_v54 = vrot.slane %v3708_v63, %v7703_v33  ;;  %v3738_v23 = vrot.slane %v3724_v21, %v7703_v33 }
 0x1f4   : > { %v3283_v62 = vrot.slane %v3020_v16, %v7251_v20  ;;  %v3235_v7 = vcombine.low %v3227_v41, %v3234_v60  ;;  %3312 = vst [vmem:[#allocation3 + $0x58] sm:$0x3f] %v3218_v30  ;;  %v3001_v50 = vrot.slane %v2987_v42, %v7251_v20  ;;  %v3770_v60 = vrot.slane %v7848_v6, %v7703_v33 }
 0x1f5   : > { %v3002_v58 = vcombine.high %v2994_v57, %v2994_v57  ;;  %v3250_v49 = vrot.slane %v2994_v57, %v7251_v20  ;;  %v3276_v4 = vrot.slane %v3269_v2, %v7251_v20  ;;  %v3739_v53 = vcombine.high %v3731_v54, %v3731_v54 }
 0x1f6   : > { %v3746_v37 = vrot.slane %v3731_v54, %v7703_v33  ;;  %v3753_v55 = vrot.slane %v3738_v23, %v7703_v33  ;;  %3313 = vst [vmem:[#allocation3 + $0x60] sm:$0xff] %v3235_v7  ;;  %v3003_v8 = vcombine.high %v3001_v50, %v3001_v50  ;;  %v4749_v11 = vcombine.high %v4733_v45, %v4733_v45 }
 0x1f7   : > { %v3251_v5 = vcombine.low %v3243_v34, %v3250_v49  ;;  %v3252_v56 = vcombine.low %v3002_v58, %v3001_v50  ;;  %v3284_v12 = vcombine.low %v3276_v4, %v3283_v62  ;;  %v3760_v63 = vrot.slane %v3739_v53, %v7703_v33  ;;  %v7866_v62 = vld [vmem:[#allocation4 + $0xa] sm:$0x1f] }
 0x1f8   : > { %v4756_v13 = vrot.slane %v4733_v45, %v7703_v33  ;;  %v3325_v14 = vld [vmem:[#allocation3 + $0x40] ss:$2 sm:$0x7f]  ;;  %v3341_v10 = vld [vmem:[#allocation3 + $0x41] ss:$2 sm:$0x7f]  ;;  %v3253_v18 = vcombine.low %v3003_v8, %v3011_v22  ;;  %v3778_v35 = vcombine.high %v3770_v60, %v3770_v60  ;;  %v3785_v0 = vrot.slane %v3770_v60, %v7703_v33 }
 0x1f9   : > { %v3260_v24 = vrot.slane %v3252_v56, %v7251_v20  ;;  %3314 = vst [vmem:[#allocation3 + $0x68] sm:$0x3f] %v3251_v5  ;;  %v3352_v34 = vmax.f32 %v3325_v14, %v3341_v10  ;;  %3316 = vst [vmem:[#allocation3 + $0x78] sm:$0x3f] %v3284_v12  ;;  %v4053_v16 = vcombine.low %v3746_v37, %v3760_v63  ;;  %v3710_v22 = vld [vmem:[#allocation4 + $0x11] sm:$0x1f] }
 0x1fa   : > { %v6459_v21 = vcombine.high %v3746_v37, %v3760_v63  ;;  %v4763_v30 = vrot.slane %v4749_v11, %v7703_v33  ;;  %v3267_v41 = vrot.slane %v3253_v18, %v7251_v20  ;;  %v3799_v42 = vrot.slane %v3778_v35, %v7703_v33 }
 0x1fb   : > { %v3800_v57 = vcombine.high %v3785_v0, %v3785_v0  ;;  %v4055_v2 = vcombine.low %v3753_v55, %v3785_v0  ;;  %3360 = vst [vmem:[#allocation4 + $0x20] sm:$0x7f] %v3352_v34  ;;  %v3327_v54 = vld [vmem:[#allocation3 + $0x50] ss:$2 sm:$0x7f]  ;;  %v4063_v7 = vrot.slane %v4053_v16, %v7703_v33  ;;  %v4764_v58 = vcombine.high %v4756_v13, %v4756_v13 }
 0x1fc   : > { %v3343_v23 = vld [vmem:[#allocation3 + $0x51] ss:$2 sm:$0x7f]  ;;  %v4070_v50 = vrot.slane %v6459_v21, %v7703_v33  ;;  %v4771_v49 = vrot.slane %v4756_v13, %v7703_v33  ;;  %v3268_v4 = vcombine.low %v3260_v24, %v3267_v41  ;;  %v4778_v55 = vrot.slane %v4763_v30, %v7703_v33 }
 0x1fd   : > { %v3353_v45 = vmax.f32 %v3327_v54, %v3343_v23  ;;  %v4056_v20 = vcombine.low %v3799_v42, %v3800_v57  ;;  %v4077_v53 = vrot.slane %v4055_v2, %v7703_v33  ;;  %v4785_v8 = vrot.slane %v4764_v58, %v7703_v33  ;;  %v7881_v16 = vld [vmem:[#allocation4 + $0x19] sm:$0x1f] }
 0x1fe   : > { %v4085_v37 = vcombine.low %v4063_v7, %v4070_v50  ;;  %v4795_v5 = vrot.slane %v7866_v62, %v7703_v33  ;;  %3315 = vst [vmem:[#allocation3 + $0x70] sm:$0xff] %v3268_v4  ;;  %v3763_v60 = vcombine.high %v7848_v6, %v7848_v6  ;;  %v3801_v12 = vcombine.high %v3799_v42, %v3799_v42 }
 0x1ff   : > { %3361 = vst [vmem:[#allocation4 + $0x28] sm:$0x7f] %v3353_v45  ;;  %v4084_v56 = vrot.slane %v4056_v20, %v7703_v33  ;;  %v3802_v63 = vcombine.high %v3710_v22, %v3710_v22  ;;  %v5078_v24 = vcombine.low %v4771_v49, %v4785_v8  ;;  %v6483_v34 = vcombine.high %v4771_v49, %v4785_v8 }
 0x200   : > { %v3329_v11 = vld [vmem:[#allocation3 + $0x60] ss:$2 sm:$0x7f]  ;;  %v3345_v13 = vld [vmem:[#allocation3 + $0x61] ss:$2 sm:$0x7f]  ;;  %v4093_v14 = vrot.slane %v4085_v37, %v7703_v33  ;;  %v4803_v10 = vcombine.high %v4795_v5, %v4795_v5  ;;  %v4810_v18 = vrot.slane %v4795_v5, %v7703_v33  ;;  %v3777_v21 = vrot.slane %v3763_v60, %v7703_v33 }
 0x201   : > { %v3354_v35 = vmax.f32 %v3329_v11, %v3345_v13  ;;  %v4086_v0 = vcombine.low %v4077_v53, %v4084_v56  ;;  %v5088_v42 = vrot.slane %v5078_v24, %v7703_v33  ;;  %v5095_v2 = vrot.slane %v6483_v34, %v7703_v33  ;;  %v4735_v13 = vld [vmem:[#allocation4 + $0x12] sm:$0x1f]  ;;  %v4736_v24 = vld [vmem:[#allocation4 + $0x1a] sm:$0x1f] }
 0x202   : > { %v4824_v30 = vrot.slane %v4803_v10, %v7703_v33  ;;  %v4825_v6 = vcombine.high %v4810_v18, %v4810_v18  ;;  %v5080_v41 = vcombine.low %v4778_v55, %v4810_v18  ;;  %v3792_v54 = vrot.slane %v3777_v21, %v7703_v33 }
 0x203   : > { %3362 = vst [vmem:[#allocation4 + $0x30] sm:$0x7f] %v3354_v35  ;;  %v4100_v57 = vrot.slane %v4086_v0, %v7703_v33  ;;  %v3809_v23 = vrot.slane %v3710_v22, %v7703_v33  ;;  %v3816_v58 = vrot.slane %v3802_v63, %v7703_v33  ;;  %v7894_v49 = vrot.slane %v7881_v16, %v7703_v33 }
 0x204   : > { %v5081_v7 = vcombine.low %v4824_v30, %v4825_v6  ;;  %v5102_v50 = vrot.slane %v5080_v41, %v7703_v33  ;;  %v5110_v4 = vcombine.low %v5088_v42, %v5095_v2  ;;  %v4102_v56 = vcombine.low %v3801_v12, %v3792_v54 }
 0x205   : > { %v4101_v45 = vcombine.low %v4093_v14, %v4100_v57  ;;  %v3817_v20 = vcombine.high %v3809_v23, %v3809_v23  ;;  %v3824_v53 = vrot.slane %v3809_v23, %v7703_v33  ;;  %v3331_v37 = vld [vmem:[#allocation3 + $0x70] ss:$2 sm:$0x7f]  ;;  %v3347_v55 = vld [vmem:[#allocation3 + $0x71] ss:$2 sm:$0x7f]  ;;  %v3831_v22 = vrot.slane %v3816_v58, %v7703_v33 }
 0x206   : > { %v5109_v8 = vrot.slane %v5081_v7, %v7703_v33  ;;  %v7901_v5 = vrot.slane %v7894_v49, %v7703_v33  ;;  %v3355_v60 = vmax.f32 %v3331_v37, %v3347_v55  ;;  %v5118_v63 = vrot.slane %v5110_v4, %v7703_v33 }
 0x207   : > { %6740 = vmatmul.mubr.f32.vlgmr.msra.gmra.mrb[14].mxu1 %v4101_v45  ;;  %v3838_v11 = vrot.slane %v3817_v20, %v7703_v33  ;;  %v4788_v14 = vcombine.high %v7866_v62, %v7866_v62  ;;  %v4112_v18 = vrot.slane %v4102_v56, %v7703_v33  ;;  %v4826_v34 = vcombine.high %v4824_v30, %v4824_v30 }
 0x208   : > { %6944 = vmatpush3.bf16.msra.mxu1 %v6943_v36  ;;  %v5111_v10 = vcombine.low %v5102_v50, %v5109_v8  ;;  %6742 = vmatprep.mubr.msk.f32.mxu1 %vm7160_vm2, %v7161_v38  ;;  %v4105_v12 = vcombine.low %v3831_v22, %v7901_v5  ;;  %3363 = vst [vmem:[#allocation4 + $0x38] sm:$0x7f] %v3355_v60 }
 0x209   : > { %6945 = vmatprep.subr.bf16.mxu1 %v7159_v15  ;;  %v4103_v35 = vcombine.low %v3824_v53, %v3838_v11  ;;  %v6460_v0 = vcombine.high %v3824_v53, %v3838_v11  ;;  %v4802_v62 = vrot.slane %v4788_v14, %v7703_v33  ;;  %v4827_v36 = vcombine.high %v4735_v13, %v4735_v13  ;;  %v7932_v53 = vld [vmem:[#allocation4 + $0x21] sm:$0x1f] }
 0x20a   : > { %v5125_v25 = vrot.slane %v5111_v10, %v7703_v33  ;;  %v4133_v26 = vrot.slane %v4105_v12, %v7703_v33  ;;  %v4834_v21 = vrot.slane %v4735_v13, %v7703_v33  ;;  %v4873_v57 = vrot.slane %v4736_v24, %v7703_v33 }
 0x20b   : > { %v4119_v6 = vrot.slane %v4103_v35, %v7703_v33  ;;  %v4126_v41 = vrot.slane %v6460_v0, %v7703_v33  ;;  %v4817_v42 = vrot.slane %v4802_v62, %v7703_v33  ;;  %v4841_v30 = vrot.slane %v4827_v36, %v7703_v33 }
 0x20c   : > { %v5126_v2 = vcombine.low %v5118_v63, %v5125_v25  ;;  %6947 = vmatpush3.bf16.msra.mxu1 %v6946_v43  ;;  %v4842_v54 = vcombine.high %v4834_v21, %v4834_v21  ;;  %v4849_v23 = vrot.slane %v4834_v21, %v7703_v33  ;;  %v4888_v58 = vrot.slane %v4873_v57, %v7703_v33 }
 0x20d   : > { %v4134_v7 = vcombine.low %v4112_v18, %v4119_v6  ;;  %v4135_v50 = vcombine.low %v4126_v41, %v4133_v26  ;;  %v5127_v45 = vcombine.low %v4826_v34, %v4817_v42  ;;  %6948 = vmatprep.subr.bf16.mxu1 %v7159_v15  ;;  %v4856_v4 = vrot.slane %v4841_v30, %v7703_v33 }
 0x20e   : > { %6834 = vmatmul.mubr.f32.vlgmr.msra.gmra.mrb[14].mxu0 %v5126_v2  ;;  %v4863_v20 = vrot.slane %v4842_v54, %v7703_v33  ;;  %v3841_v27 = vcombine.high %v7881_v16, %v7881_v16  ;;  %v3856_v19 = vcombine.high %v7894_v49, %v7894_v49  ;;  %v3878_v8 = vcombine.high %v7901_v5, %v7901_v5 }
 0x20f   : > { %6836 = vmatprep.mubr.msk.f32.mxu0 %vm7160_vm2, %v7161_v38  ;;  %v4142_v43 = vrot.slane %v4134_v7, %v7703_v33  ;;  %v4149_v37 = vrot.slane %v4135_v50, %v7703_v33  ;;  %v5137_v55 = vrot.slane %v5127_v45, %v7703_v33  ;;  %v5130_v60 = vcombine.low %v4856_v4, %v4888_v58  ;;  %v4740_v17 = vld [vmem:[#allocation4 + $0x3a] sm:$0x1f] }
 0x210   : > { %v5128_v22 = vcombine.low %v4849_v23, %v4863_v20  ;;  %v6484_v56 = vcombine.high %v4849_v23, %v4863_v20  ;;  %6950 = vmatpush3.bf16.msra.mxu1 %v6949_v44  ;;  %v3855_v16 = vrot.slane %v3841_v27, %v7703_v33  ;;  %v3877_v63 = vrot.slane %v3856_v19, %v7703_v33  ;;  %v7980_v27 = vld [vmem:[#allocation4 + $0x31] sm:$0x1f] }
 0x211   : > { %v4150_v49 = vcombine.low %v4142_v43, %v4149_v37  ;;  %v3887_v11 = vrot.slane %v7932_v53, %v7703_v33  ;;  %v4866_v13 = vcombine.high %v4736_v24, %v4736_v24  ;;  %6951 = vmatprep.subr.bf16.mxu1 %v7159_v15  ;;  %v5158_v10 = vrot.slane %v5130_v60, %v7703_v33  ;;  %v7960_v24 = vld [vmem:[#allocation4 + $0x22] sm:$0x1f] }
 0x212   : > { %v5144_v5 = vrot.slane %v5128_v22, %v7703_v33  ;;  %v5151_v14 = vrot.slane %v6484_v56, %v7703_v33  ;;  %v3870_v28 = vrot.slane %v3855_v16, %v7703_v33  ;;  %v3879_v29 = vcombine.high %v3877_v63, %v3877_v63 }
 0x213   : > { %6743 = vmatmul.mubr.f32.gmra.mrb[16].mxu1 %v4150_v49  ;;  %v3895_v44 = vcombine.high %v3887_v11, %v3887_v11  ;;  %v3902_v12 = vrot.slane %v3887_v11, %v7703_v33  ;;  %v4151_v18 = vcombine.low %v3877_v63, %v3878_v8  ;;  %v4880_v62 = vrot.slane %v4866_v13, %v7703_v33 }
 0x214   : > { %v5159_v35 = vcombine.low %v5137_v55, %v5144_v5  ;;  %v5160_v0 = vcombine.low %v5151_v14, %v5158_v10  ;;  %6745 = vmatprep.mubr.msk.f32.mxu1 %vm7160_vm2, %v7161_v38  ;;  %v4881_v34 = vcombine.high %v4873_v57, %v4873_v57  ;;  %v4152_v26 = vcombine.low %v3879_v29, %v3870_v28 }
 0x215   : > { %v3916_v25 = vrot.slane %v3895_v44, %v7703_v33  ;;  %v4161_v36 = vrot.slane %v4151_v18, %v7703_v33  ;;  %v4903_v21 = vcombine.high %v4888_v58, %v4888_v58  ;;  %6953 = vmatpush3.bf16.msra.mxu1 %v6952_v51  ;;  %v4895_v42 = vrot.slane %v4880_v62, %v7703_v33  ;;  %v3713_v51 = vld [vmem:[#allocation4 + $0x29] sm:$0x1f] }
 0x216   : > { %v5167_v6 = vrot.slane %v5159_v35, %v7703_v33  ;;  %v5174_v41 = vrot.slane %v5160_v0, %v7703_v33  ;;  %v4902_v2 = vrot.slane %v4881_v34, %v7703_v33  ;;  %6954 = vmatprep.subr.bf16.mxu1 %v7159_v15  ;;  %v4168_v54 = vrot.slane %v4152_v26, %v7703_v33  ;;  %v4738_v18 = vld [vmem:[#allocation4 + $0x2a] sm:$0x1f] }
 0x217   : > { %v4153_v57 = vcombine.low %v3902_v12, %v3916_v25  ;;  %v6461_v30 = vcombine.high %v3902_v12, %v3916_v25  ;;  %v4912_v23 = vrot.slane %v7960_v24, %v7703_v33  ;;  %v3880_v50 = vcombine.high %v7932_v53, %v7932_v53 }
 0x218   : > { %v5175_v7 = vcombine.low %v5167_v6, %v5174_v41  ;;  %v4904_v31 = vcombine.high %v4902_v2, %v4902_v2  ;;  %v5176_v32 = vcombine.low %v4902_v2, %v4903_v21  ;;  %v4183_v4 = vcombine.low %v4161_v36, %v4168_v54  ;;  %v4739_v54 = vld [vmem:[#allocation4 + $0x32] sm:$0x1f] }
 0x219   : > { %v4175_v58 = vrot.slane %v4153_v57, %v7703_v33  ;;  %v4182_v45 = vrot.slane %v6461_v30, %v7703_v33  ;;  %v4920_v20 = vcombine.high %v4912_v23, %v4912_v23  ;;  %6956 = vmatpush3.bf16.msra.mxu1 %v6955_v46  ;;  %v4927_v19 = vrot.slane %v4912_v23, %v7703_v33 }
 0x21a   : > { %6837 = vmatmul.mubr.f32.gmra.mrb[16].mxu0 %v5175_v7  ;;  %v5177_v43 = vcombine.low %v4904_v31, %v4895_v42  ;;  %v5186_v37 = vrot.slane %v5176_v32, %v7703_v33  ;;  %v3894_v53 = vrot.slane %v3880_v50, %v7703_v33  ;;  %v4191_v8 = vrot.slane %v4183_v4, %v7703_v33 }
 0x21b   : > { %6839 = vmatprep.mubr.msk.f32.mxu0 %vm7160_vm2, %v7161_v38  ;;  %v4184_v55 = vcombine.low %v4175_v58, %v4182_v45  ;;  %v4941_v22 = vrot.slane %v4920_v20, %v7703_v33  ;;  %v3919_v56 = vcombine.high %v3713_v51, %v3713_v51  ;;  %v3926_v46 = vrot.slane %v3713_v51, %v7703_v33  ;;  %v3715_v58 = vld [vmem:[#allocation4 + $0x39] sm:$0x1f] }
 0x21c   : > { %v5193_v39 = vrot.slane %v5177_v43, %v7703_v33  ;;  %v3909_v40 = vrot.slane %v3894_v53, %v7703_v33  ;;  %v3965_v60 = vrot.slane %v7980_v27, %v7703_v33  ;;  %6957 = vmatprep.subr.bf16.mxu1 %v7159_v15  ;;  %v4905_v25 = vcombine.high %v7960_v24, %v7960_v24 }
 0x21d   : > { %v4198_v16 = vrot.slane %v4184_v55, %v7703_v33  ;;  %v5178_v49 = vcombine.low %v4927_v19, %v4941_v22  ;;  %v6485_v63 = vcombine.high %v4927_v19, %v4941_v22  ;;  %v3933_v11 = vrot.slane %v3919_v56, %v7703_v33  ;;  %6959 = vmatpush3.bf16.msra.mxu1 %v6958_v59 }
 0x21e   : > { %v5208_v13 = vcombine.low %v5186_v37, %v5193_v39  ;;  %v3934_v5 = vcombine.high %v3926_v46, %v3926_v46  ;;  %v3941_v14 = vrot.slane %v3926_v46, %v7703_v33  ;;  %v3973_v10 = vcombine.high %v3965_v60, %v3965_v60  ;;  %6960 = vmatprep.subr.bf16.mxu1 %v7159_v15 }
 0x21f   : > { %v4199_v28 = vcombine.low %v4191_v8, %v4198_v16  ;;  %v5200_v29 = vrot.slane %v5178_v49, %v7703_v33  ;;  %v5207_v44 = vrot.slane %v6485_v63, %v7703_v33  ;;  %v3948_v12 = vrot.slane %v3933_v11, %v7703_v33 }
 0x220   : > { %v5216_v35 = vrot.slane %v5208_v13, %v7703_v33  ;;  %v3955_v47 = vrot.slane %v3934_v5, %v7703_v33  ;;  %v3956_v48 = vcombine.high %v3941_v14, %v3941_v14  ;;  %v8011_v59 = vrot.slane %v3965_v60, %v7703_v33 }
 0x221   : > { %6746 = vmatmul.mubr.f32.gmra.mrb[18].mxu1 %v4199_v28  ;;  %v5209_v0 = vcombine.low %v5200_v29, %v5207_v44  ;;  %v8014_v62 = vrot.slane %v3973_v10, %v7703_v33  ;;  %v4200_v34 = vcombine.low %v3909_v40, %v3941_v14  ;;  %v4944_v21 = vcombine.high %v4738_v18, %v4738_v18 }
 0x222   : > { %6748 = vmatprep.mubr.msk.f32.mxu1 %vm7160_vm2, %v7161_v38  ;;  %v3957_v26 = vcombine.high %v3955_v47, %v3955_v47  ;;  %v4201_v36 = vcombine.low %v3955_v47, %v3956_v48  ;;  %v4951_v6 = vrot.slane %v4738_v18, %v7703_v33  ;;  %v4919_v57 = vrot.slane %v4905_v25, %v7703_v33 }
 0x223   : > { %v5223_v41 = vrot.slane %v5209_v0, %v7703_v33  ;;  %v4203_v42 = vcombine.low %v8011_v59, %v8014_v62  ;;  %v4210_v2 = vrot.slane %v4200_v34, %v7703_v33  ;;  %6962 = vmatpush3.bf16.msra.mxu1 %v6961_v1  ;;  %v4958_v23 = vrot.slane %v4944_v21, %v7703_v33 }
 0x224   : > { %v4202_v24 = vcombine.low %v3957_v26, %v3948_v12  ;;  %v4217_v30 = vrot.slane %v4201_v36, %v7703_v33  ;;  %v4959_v7 = vcombine.high %v4951_v6, %v4951_v6  ;;  %6963 = vmatprep.subr.bf16.mxu1 %v7159_v15  ;;  %v4934_v51 = vrot.slane %v4919_v57, %v7703_v33 }
 0x225   : > { %v5224_v31 = vcombine.low %v5216_v35, %v5223_v41  ;;  %v4231_v32 = vrot.slane %v4203_v42, %v7703_v33  ;;  %v4966_v50 = vrot.slane %v4951_v6, %v7703_v33  ;;  %v4973_v1 = vrot.slane %v4958_v23, %v7703_v33 }
 0x226   : > { %v4224_v52 = vrot.slane %v4202_v24, %v7703_v33  ;;  %v4232_v9 = vcombine.low %v4210_v2, %v4217_v30  ;;  %v4980_v45 = vrot.slane %v4959_v7, %v7703_v33  ;;  %v4990_v20 = vrot.slane %v4739_v54, %v7703_v33 }
 0x227   : > { %6840 = vmatmul.mubr.f32.gmra.mrb[18].mxu0 %v5224_v31  ;;  %v4981_v4 = vcombine.high %v4966_v50, %v4966_v50  ;;  %v5225_v19 = vcombine.low %v4934_v51, %v4966_v50  ;;  %v3958_v43 = vcombine.high %v7980_v27, %v7980_v27  ;;  %v3997_v8 = vcombine.high %v3715_v58, %v3715_v58 }
 0x228   : > { %6842 = vmatprep.mubr.msk.f32.mxu0 %vm7160_vm2, %v7161_v38  ;;  %v4233_v37 = vcombine.low %v4224_v52, %v4231_v32  ;;  %v4240_v53 = vrot.slane %v4232_v9, %v7703_v33  ;;  %v4982_v55 = vcombine.high %v4980_v45, %v4980_v45  ;;  %v4998_v22 = vcombine.high %v4990_v20, %v4990_v20  ;;  %v3365_v9 = vld [vmem:[#allocation4 + $0x8] sm:$0x1f] }
 0x229   : > { %v5005_v56 = vrot.slane %v4990_v20, %v7703_v33  ;;  %v5226_v39 = vcombine.low %v4980_v45, %v4981_v4  ;;  %v5235_v40 = vrot.slane %v5225_v19, %v7703_v33  ;;  %6965 = vmatpush3.bf16.msra.mxu1 %v6964_v61  ;;  %v3972_v60 = vrot.slane %v3958_v43, %v7703_v33 }
 0x22a   : > { %v4247_v27 = vrot.slane %v4233_v37, %v7703_v33  ;;  %v5227_v46 = vcombine.low %v4982_v55, %v4973_v1  ;;  %v4004_v16 = vrot.slane %v3715_v58, %v7703_v33  ;;  %6990 = vmatprep.subr.bf16.mxu1 %v7159_v15  ;;  %v5019_v49 = vrot.slane %v4998_v22, %v7703_v33 }
 0x22b   : > { %v5242_v63 = vrot.slane %v5226_v39, %v7703_v33  ;;  %v4011_v11 = vrot.slane %v3997_v8, %v7703_v33  ;;  %v6462_v13 = vcombine.high %v8011_v59, %v8014_v62  ;;  %v3987_v5 = vrot.slane %v3972_v60, %v7703_v33  ;;  %v3366_v60 = vld [vmem:[#allocation4 + $0x10] sm:$0x1f] }
 0x22c   : > { %v4248_v3 = vcombine.low %v4240_v53, %v4247_v27  ;;  %v5249_v61 = vrot.slane %v5227_v46, %v7703_v33  ;;  %v4012_v14 = vcombine.high %v4004_v16, %v4004_v16  ;;  %v5228_v10 = vcombine.low %v5005_v56, %v5019_v49 }
 0x22d   : > { %v5257_v28 = vcombine.low %v5235_v40, %v5242_v63  ;;  %v4019_v29 = vrot.slane %v4004_v16, %v7703_v33  ;;  %v4026_v44 = vrot.slane %v4011_v11, %v7703_v33  ;;  %v4259_v18 = vrot.slane %v6462_v13, %v7703_v33 }
 0x22e   : > { %6749 = vmatmul.mubr.f32.gmra.mrb[20].mxu1 %v4248_v3  ;;  %v4033_v12 = vrot.slane %v4012_v14, %v7703_v33  ;;  %v4983_v35 = vcombine.high %v4739_v54, %v4739_v54  ;;  %v5022_v47 = vcombine.high %v4740_v17, %v4740_v17  ;;  %v5256_v48 = vrot.slane %v5228_v10, %v7703_v33  ;;  %v3364_v54 = vld [vmem:[#allocation4] sm:$0x1f] }
 0x22f   : > { %v5265_v59 = vrot.slane %v5257_v28, %v7703_v33  ;;  %6751 = vmatprep.mubr.msk.f32.mxu1 %vm7160_vm2, %v7161_v38  ;;  %v4034_v0 = vcombine.high %v4019_v29, %v4019_v29  ;;  %v4250_v62 = vcombine.low %v3987_v5, %v4019_v29  ;;  %v5029_v26 = vrot.slane %v4740_v17, %v7703_v33 }
 0x230   : > { %v4035_v34 = vcombine.high %v4033_v12, %v4033_v12  ;;  %v4997_v25 = vrot.slane %v4983_v35, %v7703_v33  ;;  %v5036_v36 = vrot.slane %v5022_v47, %v7703_v33  ;;  %v5258_v21 = vcombine.low %v5249_v61, %v5256_v48  ;;  %v3367_v48 = vld [vmem:[#allocation4 + $0x18] sm:$0x1f] }
 0x231   : > { %v4251_v6 = vcombine.low %v4033_v12, %v4034_v0  ;;  %v4266_v41 = vrot.slane %v4250_v62, %v7703_v33  ;;  %v6486_v42 = vcombine.high %v5005_v56, %v5019_v49  ;;  %v5037_v24 = vcombine.high %v5029_v26, %v5029_v26 }
 0x232   : > { %v4252_v2 = vcombine.low %v4035_v34, %v4026_v44  ;;  %v5012_v57 = vrot.slane %v4997_v25, %v7703_v33  ;;  %v5044_v30 = vrot.slane %v5029_v26, %v7703_v33  ;;  %v5272_v23 = vrot.slane %v5258_v21, %v7703_v33 }
 0x233   : > { %v4273_v7 = vrot.slane %v4251_v6, %v7703_v33  ;;  %v4281_v31 = vcombine.low %v4259_v18, %v4266_v41  ;;  %v5051_v32 = vrot.slane %v5036_v36, %v7703_v33  ;;  %v5058_v50 = vrot.slane %v5037_v24, %v7703_v33 }
 0x234   : > { %v4280_v51 = vrot.slane %v4252_v2, %v7703_v33  ;;  %v5059_v58 = vcombine.high %v5044_v30, %v5044_v30  ;;  %v5275_v52 = vcombine.low %v5012_v57, %v5044_v30  ;;  %v5273_v1 = vcombine.low %v5265_v59, %v5272_v23 }
 0x235   : > { %v4289_v45 = vrot.slane %v4281_v31, %v7703_v33  ;;  %v5284_v4 = vrot.slane %v6486_v42, %v7703_v33  ;;  %v3380_v20 = vcombine.high %v3364_v54, %v3364_v54  ;;  %v5060_v43 = vcombine.high %v5058_v50, %v5058_v50  ;;  %v3368_v42 = vld [vmem:[#allocation4 + $0x20] sm:$0x1f] }
 0x236   : > { %v4282_v19 = vcombine.low %v4273_v7, %v4280_v51  ;;  %v5276_v37 = vcombine.low %v5058_v50, %v5059_v58  ;;  %v5291_v53 = vrot.slane %v5275_v52, %v7703_v33  ;;  %6843 = vmatmul.mubr.f32.gmra.mrb[20].mxu0 %v5273_v1  ;;  %v3387_v55 = vrot.slane %v3364_v54, %v7703_v33 }
 0x237   : > { %v3394_v8 = vrot.slane %v3380_v20, %v7703_v33  ;;  %v3426_v22 = vrot.slane %v3365_v9, %v7703_v33  ;;  %v3419_v56 = vcombine.high %v3365_v9, %v3365_v9  ;;  %6845 = vmatprep.mubr.msk.f32.mxu0 %vm7160_vm2, %v7161_v38  ;;  %v5277_v40 = vcombine.low %v5060_v43, %v5051_v32 }
 0x238   : > { %v4296_v39 = vrot.slane %v4282_v19, %v7703_v33  ;;  %v5298_v27 = vrot.slane %v5276_v37, %v7703_v33  ;;  %v5306_v46 = vcombine.low %v5284_v4, %v5291_v53  ;;  %v3395_v16 = vcombine.high %v3387_v55, %v3387_v55 }
 0x239   : > { %v3402_v49 = vrot.slane %v3387_v55, %v7703_v33  ;;  %v3409_v63 = vrot.slane %v3394_v8, %v7703_v33  ;;  %v3434_v11 = vcombine.high %v3426_v22, %v3426_v22  ;;  %v5305_v17 = vrot.slane %v5277_v40, %v7703_v33 }
 0x23a   : > { %v4297_v13 = vcombine.low %v4289_v45, %v4296_v39  ;;  %v5314_v3 = vrot.slane %v5306_v46, %v7703_v33  ;;  %v3441_v61 = vrot.slane %v3426_v22, %v7703_v33  ;;  %v3416_v5 = vrot.slane %v3395_v16, %v7703_v33  ;;  %v3369_v22 = vld [vmem:[#allocation4 + $0x28] sm:$0x1f] }
 0x23b   : > { %v3455_v14 = vrot.slane %v3434_v11, %v7703_v33  ;;  %v3433_v10 = vrot.slane %v3419_v56, %v7703_v33  ;;  %v3458_v28 = vcombine.high %v3366_v60, %v3366_v60  ;;  %v5307_v29 = vcombine.low %v5298_v27, %v5305_v17 }
 0x23c   : > { %6752 = vmatmul.mubr.f32.gmra.mrb[22].mxu1 %v4297_v13  ;;  %v3456_v44 = vcombine.high %v3441_v61, %v3441_v61  ;;  %v4395_v12 = vcombine.low %v3409_v63, %v3441_v61  ;;  %v3465_v18 = vrot.slane %v3366_v60, %v7703_v33  ;;  %v4393_v35 = vcombine.low %v3402_v49, %v3416_v5  ;;  %v3370_v13 = vld [vmem:[#allocation4 + $0x30] sm:$0x1f] }
 0x23d   : > { %6786 = vmatprep.mubr.msk.f32.mxu1 %vm7160_vm2, %v7161_v38  ;;  %v6463_v47 = vcombine.high %v3402_v49, %v3416_v5  ;;  %v3448_v59 = vrot.slane %v3433_v10, %v7703_v33  ;;  %v3457_v0 = vcombine.high %v3455_v14, %v3455_v14  ;;  %v5321_v62 = vrot.slane %v5307_v29, %v7703_v33 }
 0x23e   : > { %v4396_v34 = vcombine.low %v3455_v14, %v3456_v44  ;;  %v4417_v25 = vrot.slane %v4395_v12, %v7703_v33  ;;  %v3472_v26 = vrot.slane %v3458_v28, %v7703_v33  ;;  %v4403_v36 = vrot.slane %v4393_v35, %v7703_v33 }
 0x23f   : > { %v4410_v21 = vrot.slane %v6463_v47, %v7703_v33  ;;  %v3473_v6 = vcombine.high %v3465_v18, %v3465_v18  ;;  %v3480_v41 = vrot.slane %v3465_v18, %v7703_v33  ;;  %v5322_v2 = vcombine.low %v5314_v3, %v5321_v62 }
 0x240   : > { %v4424_v57 = vrot.slane %v4396_v34, %v7703_v33  ;;  %v3487_v24 = vrot.slane %v3472_v26, %v7703_v33  ;;  %v3504_v30 = vrot.slane %v3367_v48, %v7703_v33  ;;  %v4442_v7 = vcombine.low %v3457_v0, %v3448_v59 }
 0x241   : > { %v4425_v54 = vcombine.low %v4403_v36, %v4410_v21  ;;  %v3494_v23 = vrot.slane %v3473_v6, %v7703_v33  ;;  %v3497_v31 = vcombine.high %v3367_v48, %v3367_v48  ;;  %6846 = vmatmul.mubr.f32.gmra.mrb[22].mxu0 %v5322_v2  ;;  %v3543_v58 = vrot.slane %v3368_v42, %v7703_v33  ;;  %v3371_v6 = vld [vmem:[#allocation4 + $0x38] sm:$0x1f] }
 0x242   : > { %v4426_v32 = vcombine.low %v4417_v25, %v4424_v57  ;;  %v3519_v51 = vrot.slane %v3504_v30, %v7703_v33  ;;  %v3512_v50 = vcombine.high %v3504_v30, %v3504_v30  ;;  %v4452_v45 = vrot.slane %v4442_v7, %v7703_v33  ;;  %6915 = vmatprep.mubr.msk.f32.mxu0 %vm7160_vm2, %v7161_v38 }
 0x243   : > { %v4433_v52 = vrot.slane %v4425_v54, %v7703_v33  ;;  %v4443_v9 = vcombine.low %v3480_v41, %v3494_v23  ;;  %v6464_v1 = vcombine.high %v3480_v41, %v3494_v23  ;;  %v3511_v19 = vrot.slane %v3497_v31, %v7703_v33 }
 0x244   : > { %v4440_v4 = vrot.slane %v4426_v32, %v7703_v33  ;;  %v4445_v20 = vcombine.low %v3487_v24, %v3519_v51  ;;  %v3533_v43 = vrot.slane %v3512_v50, %v7703_v33  ;;  %v3534_v55 = vcombine.high %v3519_v51, %v3519_v51 }
 0x245   : > { %v4459_v37 = vrot.slane %v4443_v9, %v7703_v33  ;;  %v4466_v53 = vrot.slane %v6464_v1, %v7703_v33  ;;  %v3551_v8 = vcombine.high %v3543_v58, %v3543_v58  ;;  %v3526_v40 = vrot.slane %v3511_v19, %v7703_v33 }
 0x246   : > { %v4441_v56 = vcombine.low %v4433_v52, %v4440_v4  ;;  %v4473_v39 = vrot.slane %v4445_v20, %v7703_v33  ;;  %v3535_v27 = vcombine.high %v3533_v43, %v3533_v43  ;;  %v3558_v60 = vrot.slane %v3543_v58, %v7703_v33 }
 0x247   : > { %v4474_v46 = vcombine.low %v4452_v45, %v4459_v37  ;;  %v3572_v16 = vrot.slane %v3551_v8, %v7703_v33  ;;  %v4491_v49 = vcombine.low %v3533_v43, %v3534_v55  ;;  %v3536_v17 = vcombine.high %v3368_v42, %v3368_v42 }
 0x248   : > { %6787 = vmatmul.mubr.f32.vlgmr.msra.gmra.mrb[24].mxu1 %v4441_v56  ;;  %v4475_v63 = vcombine.low %v4466_v53, %v4473_v39  ;;  %v4492_v11 = vcombine.low %v3535_v27, %v3526_v40  ;;  %v3575_v3 = vcombine.high %v3369_v22, %v3369_v22  ;;  %v3582_v12 = vrot.slane %v3369_v22, %v7703_v33 }
 0x249   : > { %6789 = vmatprep.mubr.msk.f32.mxu1 %vm7160_vm2, %v7161_v38  ;;  %v4482_v61 = vrot.slane %v4474_v46, %v7703_v33  ;;  %v4493_v5 = vcombine.low %v3558_v60, %v3572_v16  ;;  %v6465_v14 = vcombine.high %v3558_v60, %v3572_v16  ;;  %v4501_v10 = vrot.slane %v4491_v49, %v7703_v33 }
 0x24a   : > { %v4489_v28 = vrot.slane %v4475_v63, %v7703_v33  ;;  %v4508_v29 = vrot.slane %v4492_v11, %v7703_v33  ;;  %v3550_v44 = vrot.slane %v3536_v17, %v7703_v33  ;;  %v3589_v47 = vrot.slane %v3575_v3, %v7703_v33 }
 0x24b   : > { %v4515_v18 = vrot.slane %v4493_v5, %v7703_v33  ;;  %v4522_v35 = vrot.slane %v6465_v14, %v7703_v33  ;;  %v3621_v48 = vrot.slane %v3370_v13, %v7703_v33  ;;  %v3590_v34 = vcombine.high %v3582_v12, %v3582_v12 }
 0x24c   : > { %v4490_v59 = vcombine.low %v4482_v61, %v4489_v28  ;;  %v4523_v0 = vcombine.low %v4501_v10, %v4508_v29  ;;  %v3565_v62 = vrot.slane %v3550_v44, %v7703_v33  ;;  %v3597_v26 = vrot.slane %v3582_v12, %v7703_v33  ;;  %v6123_v44 = vld [vmem:[%s8414_s5] sm:$0xff]  ;;  %v6124_v12 = vld [vmem:[%s8414_s5 + $0x8] sm:$0xff] }
 0x24d   : > { %v4524_v25 = vcombine.low %v4515_v18, %v4522_v35  ;;  %v3604_v36 = vrot.slane %v3589_v47, %v7703_v33  ;;  %v3629_v21 = vcombine.high %v3621_v48, %v3621_v48  ;;  %v3611_v42 = vrot.slane %v3590_v34, %v7703_v33  ;;  %v6125_v18 = vld [vmem:[%s8414_s5 + $0x10] sm:$0xff]  ;;  %v6126_v47 = vld [vmem:[%s8414_s5 + $0x18] sm:$0xff] }
 0x24e   : > { %6790 = vmatmul.mubr.f32.gmra.mrb[26].mxu1 %v4490_v59  ;;  %v4531_v41 = vrot.slane %v4523_v0, %v7703_v33  ;;  %v3636_v2 = vrot.slane %v3621_v48, %v7703_v33  ;;  %v3614_v57 = vcombine.high %v3370_v13, %v3370_v13  ;;  %v3612_v30 = vcombine.high %v3597_v26, %v3597_v26  ;;  %v6128_v59 = vld [vmem:[%s8414_s5 + $0x28] sm:$0xff] }
 0x24f   : > { %6792 = vmatprep.mubr.msk.f32.mxu1 %vm7160_vm2, %v7161_v38  ;;  %v4538_v24 = vrot.slane %v4524_v25, %v7703_v33  ;;  %v3650_v54 = vrot.slane %v3629_v21, %v7703_v33  ;;  %v4540_v23 = vcombine.low %v3565_v62, %v3597_v26  ;;  %v3613_v7 = vcombine.high %v3611_v42, %v3611_v42  ;;  %v6129_v25 = vld [vmem:[%s8414_s5 + $0x30] sm:$0xff]  ;;  %v6130_v26 = vld [vmem:[%s8414_s5 + $0x38] sm:$0xff]  ;;  %v6131_v21 = vld [vmem:[%s8414_s5 + $0x40] sm:$0xff] }
 0x250   : > { %v3628_v31 = vrot.slane %v3614_v57, %v7703_v33  ;;  %v3653_v32 = vcombine.high %v3371_v6, %v3371_v6  ;;  %v3660_v51 = vrot.slane %v3371_v6, %v7703_v33  ;;  %v4541_v58 = vcombine.low %v3611_v42, %v3612_v30  ;;  %v6132_v6 = vld [vmem:[%s8414_s5 + $0x48] sm:$0xff]  ;;  %v6133_v57 = vld [vmem:[%s8414_s5 + $0x50] sm:$0xff] }
 0x251   : > { %v4539_v50 = vcombine.low %v4531_v41, %v4538_v24  ;;  %v4543_v52 = vcombine.low %v3636_v2, %v3650_v54  ;;  %v4542_v9 = vcombine.low %v3613_v7, %v3604_v36  ;;  %v4550_v1 = vrot.slane %v4540_v23, %v7703_v33  ;;  %v6134_v24 = vld [vmem:[%s8414_s5 + $0x58] sm:$0xff]  ;;  %v6135_v7 = vld [vmem:[%s8414_s5 + $0x60] sm:$0xff] }
 0x252   : > { %v3667_v45 = vrot.slane %v3653_v32, %v7703_v33  ;;  %v3668_v4 = vcombine.high %v3660_v51, %v3660_v51  ;;  %v4557_v20 = vrot.slane %v4541_v58, %v7703_v33  ;;  %v3643_v43 = vrot.slane %v3628_v31, %v7703_v33  ;;  %v6136_v31 = vld [vmem:[%s8414_s5 + $0x68] sm:$0xff] }
 0x253   : > { %6793 = vmatmul.mubr.f32.gmra.mrb[28].mxu1 %v4539_v50  ;;  %v4571_v19 = vrot.slane %v4543_v52, %v7703_v33  ;;  %v3675_v37 = vrot.slane %v3660_v51, %v7703_v33  ;;  %v4564_v53 = vrot.slane %v4542_v9, %v7703_v33  ;;  %v6466_v8 = vcombine.high %v3636_v2, %v3650_v54  ;;  %v6137_v51 = vld [vmem:[%s8414_s5 + $0x70] sm:$0xff]  ;;  %v6138_v50 = vld [vmem:[%s8414_s5 + $0x78] sm:$0xff]  ;;  %v6240_v52 = vld [vmem:[%s8416_s7] sm:$0xff] }
 0x254   : > { %6795 = vmatprep.mubr.msk.f32.mxu1 %vm7160_vm2, %v7161_v38  ;;  %v3689_v55 = vrot.slane %v3668_v4, %v7703_v33  ;;  %v4572_v22 = vcombine.low %v4550_v1, %v4557_v20  ;;  %v3682_v27 = vrot.slane %v3667_v45, %v7703_v33  ;;  %v6991_v35 = vpack.c.bf16 %v6124_v12, %v6123_v44  ;;  %v6241_v9 = vld [vmem:[%s8416_s7 + $0x8] sm:$0xff]  ;;  %v6242_v1 = vld [vmem:[%s8416_s7 + $0x10] sm:$0xff] }
 0x255   : > { %v3690_v56 = vcombine.high %v3675_v37, %v3675_v37  ;;  %v4590_v39 = vcombine.low %v3643_v43, %v3675_v37  ;;  %v4573_v40 = vcombine.low %v4564_v53, %v4571_v19  ;;  %v4599_v13 = vrot.slane %v6466_v8, %v7703_v33  ;;  %v6243_v19 = vld [vmem:[%s8416_s7 + $0x18] sm:$0xff]  ;;  %v6244_v37 = vld [vmem:[%s8416_s7 + $0x20] sm:$0xff]  ;;  %v6245_v53 = vld [vmem:[%s8416_s7 + $0x28] sm:$0xff] }
 0x256   : > { %v3691_v46 = vcombine.high %v3689_v55, %v3689_v55  ;;  %v4580_v49 = vrot.slane %v4572_v22, %v7703_v33  ;;  %6992 = vmatpush3.bf16.msra.mxu1 %v6991_v35  ;;  %v6994_v48 = vpack.c.bf16 %v6126_v47, %v6125_v18  ;;  %v7000_v36 = vpack.c.bf16 %v6130_v26, %v6129_v25 }
 0x257   : > { %v4591_v60 = vcombine.low %v3689_v55, %v3690_v56  ;;  %v4606_v16 = vrot.slane %v4590_v39, %v7703_v33  ;;  %v4587_v63 = vrot.slane %v4573_v40, %v7703_v33  ;;  %6993 = vmatprep.subr.bf16.mxu1 %v7159_v15  ;;  %v7003_v2 = vpack.c.bf16 %v6132_v6, %v6131_v21  ;;  %v6246_v56 = vld [vmem:[%s8416_s7 + $0x30] sm:$0xff]  ;;  %v6247_v39 = vld [vmem:[%s8416_s7 + $0x38] sm:$0xff] }
 0x258   : > { %v4592_v11 = vcombine.low %v3691_v46, %v3682_v27  ;;  %v7006_v54 = vpack.c.bf16 %v6134_v24, %v6133_v57  ;;  %v7009_v32 = vpack.c.bf16 %v6136_v31, %v6135_v7  ;;  %v7012_v4 = vpack.c.bf16 %v6138_v50, %v6137_v51  ;;  %v6248_v27 = vld [vmem:[%s8416_s7 + $0x40] sm:$0xff]  ;;  %v6249_v46 = vld [vmem:[%s8416_s7 + $0x48] sm:$0xff] }
 0x259   : > { %v4588_v17 = vcombine.low %v4580_v49, %v4587_v63  ;;  %v4613_v3 = vrot.slane %v4591_v60, %v7703_v33  ;;  %v4621_v5 = vcombine.low %v4599_v13, %v4606_v16  ;;  %v7015_v20 = vpack.c.bf16 %v6241_v9, %v6240_v52  ;;  %v6250_v63 = vld [vmem:[%s8416_s7 + $0x50] sm:$0xff] }
 0x25a   : > { %v4620_v61 = vrot.slane %v4592_v11, %v7703_v33  ;;  %6995 = vmatpush3.bf16.msra.mxu1 %v6994_v48  ;;  %v7018_v43 = vpack.c.bf16 %v6243_v19, %v6242_v1  ;;  %v7021_v8 = vpack.c.bf16 %v6245_v53, %v6244_v37  ;;  %v7024_v40 = vpack.c.bf16 %v6247_v39, %v6246_v56  ;;  %v6251_v11 = vld [vmem:[%s8416_s7 + $0x58] sm:$0xff] }
 0x25b   : > { %6796 = vmatmul.mubr.f32.gmra.mrb[30].mxu1 %v4588_v17  ;;  %v4629_v10 = vrot.slane %v4621_v5, %v7703_v33  ;;  %6996 = vmatprep.subr.bf16.mxu1 %v7159_v15  ;;  %v7027_v49 = vpack.c.bf16 %v6249_v46, %v6248_v27  ;;  %v7030_v13 = vpack.c.bf16 %v6251_v11, %v6250_v63 }
 0x25c   : > { %v4622_v14 = vcombine.low %v4613_v3, %v4620_v61  ;;  %6798 = vmatprep.mubr.msk.f32.mxu1 %vm7160_vm2, %v7161_v38  ;;  %7016 = vmatpush3.bf16.msra.mxu0 %v7015_v20  ;;  %v6252_v3 = vld [vmem:[%s8416_s7 + $0x60] sm:$0xff]  ;;  %v6253_v61 = vld [vmem:[%s8416_s7 + $0x68] sm:$0xff] }
 0x25d   : > { %7017 = vmatprep.subr.bf16.mxu0 %v7159_v15 }
 0x25e   : > { %v4636_v28 = vrot.slane %v4622_v14, %v7703_v33  ;;  %v7033_v14 = vpack.c.bf16 %v6253_v61, %v6252_v3 }
 0x260   : > { %v4637_v29 = vcombine.low %v4629_v10, %v4636_v28  ;;  %7019 = vmatpush3.bf16.msra.mxu0 %v7018_v43 }
 0x261   : > { %7020 = vmatprep.subr.bf16.mxu0 %v7159_v15 }
 0x262   : > { %6799 = vmatmul.mubr.f32.gmra.mrb[32].mxu1 %v4637_v29 }
 0x263   : > { %6880 = vmatprep.mubr.msk.f32.mxu1 %vm7160_vm2, %v7161_v38  ;;  %v6127_v38 = vld [vmem:[%s8414_s5 + $0x20] sm:$0xff] }
 0x264   : > { %v6997_v62 = vpack.c.bf16 %v6128_v59, %v6127_v38  ;;  %7022 = vmatpush3.bf16.msra.mxu0 %v7021_v8  ;;  %v8297_v38 = vld [vmem:[%s8413_s4] ss:$0 sm:$0xff] }
 0x265   : > { %7023 = vmatprep.subr.bf16.mxu0 %v7159_v15 }
 0x266   : > { %6998 = vmatpush3.bf16.msra.mxu1 %v6997_v62 }
 0x267   : > { %6999 = vmatprep.subr.bf16.mxu1 %v7159_v15 }
 0x268   : > { %7025 = vmatpush3.bf16.msra.mxu0 %v7024_v40 }
 0x269   : > { %7026 = vmatprep.subr.bf16.mxu0 %v7159_v15 }
 0x26a   : > { %7001 = vmatpush3.bf16.msra.mxu1 %v7000_v36 }
 0x26b   : > { %7002 = vmatprep.subr.bf16.mxu1 %v7159_v15 }
 0x26c   : > { %7028 = vmatpush3.bf16.msra.mxu0 %v7027_v49 }
 0x26d   : > { %7029 = vmatprep.subr.bf16.mxu0 %v7159_v15 }
 0x26e   : > { %7004 = vmatpush3.bf16.msra.mxu1 %v7003_v2 }
 0x26f   : > { %7005 = vmatprep.subr.bf16.mxu1 %v7159_v15 }
 0x270   : > { %7031 = vmatpush3.bf16.msra.mxu0 %v7030_v13 }
 0x271   : > { %7032 = vmatprep.subr.bf16.mxu0 %v7159_v15 }
 0x272   : > { %7007 = vmatpush3.bf16.msra.mxu1 %v7006_v54 }
 0x273   : > { %7008 = vmatprep.subr.bf16.mxu1 %v7159_v15 }
 0x274   : > { %7034 = vmatpush3.bf16.msra.mxu0 %v7033_v14 }
 0x275   : > { %7035 = vmatprep.subr.bf16.mxu0 %v7159_v15 }
 0x276   : > { %7010 = vmatpush3.bf16.msra.mxu1 %v7009_v32 }
 0x277   : > { %7011 = vmatprep.subr.bf16.mxu1 %v7159_v15 }
 0x27a   : > { %7013 = vmatpush3.bf16.msra.mxu1 %v7012_v4 }
 0x2da   : > { %v8192_v0 = vpop.f32.mrb[14].mxu1 }
 0x2db   : > { %v6741_v34 = vpop.f32.mrb[15].mxu1 }
 0x2e1   : > { %v8208_v41 = vpop.f32.mrb[14].mxu0 }
 0x2e2   : > { %v6835_v42 = vpop.f32.mrb[15].mxu0 }
 0x2e6   : > { %v8217_v30 = vpop.f32.mrb[16].mxu1 }
 0x2e7   : > { %v6744_v23 = vpop.f32.mrb[17].mxu1 }
 0x2ed   : > { %v8233_v58 = vpop.f32.mrb[16].mxu0 }
 0x2ee   : > { %v6838_v45 = vpop.f32.mrb[17].mxu0 }
 0x2f4   : > { %v4379_v55 = vpop.f32.mrb[18].mxu1 }
 0x2f5   : > { %v6747_v22 = vpop.f32.mrb[19].mxu1 }
 0x2fa   : > { %v5404_v60 = vpop.f32.mrb[18].mxu0 }
 0x2fb   : > { %v6841_v16 = vpop.f32.mrb[19].mxu0 }
 0x301   : > { %v8276_v17 = vpop.f32.mrb[20].mxu1 }
 0x302   : > { %v6750_v5 = vpop.f32.mrb[21].mxu1 }
 0x309   : > { %v8287_v10 = vpop.f32.mrb[20].mxu0 }
 0x30a   : > { %v6844_v28 = vpop.f32.mrb[21].mxu0 }
 0x30f   : > { %v8289_v29 = vpop.f32.mrb[22].mxu1 }
 0x310   : > { %v6753_v44 = vpop.f32.mrb[23].mxu1 }
 0x314   : > { %v8291_v12 = vpop.f32.mrb[22].mxu0 }
 0x315   : > { %v6847_v18 = vpop.f32.mrb[23].mxu0 }
 0x31b   : > { %v4709_v35 = vpop.f32.mrb[24].mxu1 }
 0x31c   : > { %v4710_v47 = vadd.f32 %v4709_v35, %v8192_v0  ;;  %v6788_v48 = vpop.f32.mrb[25].mxu1 }
 0x31e   : > { %v5418_v15 = vadd.f32 %v8208_v41, %v4710_v47 }
 0x320   : > { %v5430_v59 = vadd.f32 %v8297_v38, %v5418_v15 }
 0x321   : > { %v4714_v62 = vpop.f32.mrb[26].mxu1 }
 0x322   : > { %v5435_v34 = vmax.f32 %v5430_v59, 0.0  ;;  %v4715_v25 = vadd.f32 %v4714_v62, %v8217_v30  ;;  %v6791_v26 = vpop.f32.mrb[27].mxu1 }
 0x324   : > { %v5445_v36 = vcombine.high %v5435_v34, %v5435_v34  ;;  %v5452_v21 = vrot.slane %v5435_v34, %v7703_v33  ;;  %v5419_v0 = vadd.f32 %v8233_v58, %v4715_v25 }
 0x326   : > { %v5459_v6 = vrot.slane %v5445_v36, %v7703_v33  ;;  %v5460_v42 = vcombine.high %v5452_v21, %v5452_v21  ;;  %v5431_v2 = vadd.f32 %v8297_v38, %v5419_v0  ;;  %v4719_v57 = vpop.f32.mrb[28].mxu1  ;;  %v5468_v41 = vrot.slane %v5452_v21, %v7703_v33 }
 0x327   : > { %v4720_v24 = vadd.f32 %v4719_v57, %v4379_v55  ;;  %v6794_v54 = vpop.f32.mrb[29].mxu1 }
 0x328   : > { %v5461_v23 = vcombine.high %v5459_v6, %v5459_v6  ;;  %v5475_v7 = vrot.slane %v5459_v6, %v7703_v33  ;;  %v5482_v30 = vrot.slane %v5460_v42, %v7703_v33  ;;  %v5436_v31 = vmax.f32 %v5431_v2, 0.0 }
 0x329   : > { %v5420_v32 = vadd.f32 %v5404_v60, %v4720_v24 }
 0x32a   : > { %v5489_v51 = vrot.slane %v5461_v23, %v7703_v33  ;;  %v5491_v50 = vcombine.high %v5475_v7, %v5475_v7  ;;  %v5690_v58 = vcombine.low %v5468_v41, %v5482_v30  ;;  %v6488_v52 = vcombine.high %v5468_v41, %v5482_v30 }
 0x32b   : > { %v5712_v9 = vrot.slane %v5475_v7, %v7703_v33  ;;  %v5494_v1 = vcombine.high %v5436_v31, %v5436_v31  ;;  %v5501_v45 = vrot.slane %v5436_v31, %v7703_v33  ;;  %v5432_v4 = vadd.f32 %v8297_v38, %v5420_v32 }
 0x32c   : > { %v5698_v20 = vrot.slane %v5690_v58, %v7703_v33  ;;  %v5705_v19 = vrot.slane %v6488_v52, %v7703_v33  ;;  %v5729_v43 = vcombine.low %v5489_v51, %v5491_v50  ;;  %v5493_v37 = vcombine.high %v5489_v51, %v5489_v51 }
 0x32d   : > { %v5508_v53 = vrot.slane %v5494_v1, %v7703_v33  ;;  %v5509_v55 = vcombine.high %v5501_v45, %v5501_v45  ;;  %v5517_v8 = vrot.slane %v5501_v45, %v7703_v33  ;;  %v5727_v56 = vrot.slane %v5712_v9, %v7703_v33 }
 0x32e   : > { %v5713_v22 = vcombine.low %v5698_v20, %v5705_v19  ;;  %v5737_v39 = vrot.slane %v5729_v43, %v7703_v33  ;;  %v5437_v40 = vmax.f32 %v5432_v4, 0.0  ;;  %v4724_v49 = vpop.f32.mrb[30].mxu1 }
 0x32f   : > { %v5510_v27 = vcombine.high %v5508_v53, %v5508_v53  ;;  %v5524_v46 = vrot.slane %v5508_v53, %v7703_v33  ;;  %v5531_v60 = vrot.slane %v5509_v55, %v7703_v33  ;;  %v5730_v16 = vcombine.low %v5493_v37, %v5517_v8  ;;  %v6797_v61 = vpop.f32.mrb[31].mxu1 }
 0x330   : > { %v5720_v63 = vrot.slane %v5713_v22, %v7703_v33  ;;  %v5543_v11 = vcombine.high %v5437_v40, %v5437_v40  ;;  %v5550_v13 = vrot.slane %v5437_v40, %v7703_v33  ;;  %v4725_v3 = vadd.f32 %v4724_v49, %v8276_v17 }
 0x331   : > { %v5538_v5 = vrot.slane %v5510_v27, %v7703_v33  ;;  %v5540_v14 = vcombine.high %v5524_v46, %v5524_v46  ;;  %v5744_v28 = vrot.slane %v5730_v16, %v7703_v33  ;;  %v5751_v44 = vrot.slane %v5531_v60, %v7703_v33 }
 0x332   : > { %v5728_v18 = vcombine.low %v5720_v63, %v5727_v56  ;;  %v6489_v35 = vcombine.high %v5517_v8, %v5531_v60  ;;  %v5557_v47 = vrot.slane %v5543_v11, %v7703_v33  ;;  %v5558_v48 = vcombine.high %v5550_v13, %v5550_v13 }
 0x333   : > { %v5752_v15 = vcombine.low %v5737_v39, %v5744_v28  ;;  %v5766_v59 = vrot.slane %v5751_v44, %v7703_v33  ;;  %v5769_v62 = vcombine.low %v5524_v46, %v5538_v5  ;;  %v5790_v34 = vrot.slane %v5540_v14, %v7703_v33 }
 0x334   : > { %6010 = vst [vmem:[#allocation5] sm:$0x1f] %v5728_v18  ;;  %v5776_v17 = vrot.slane %v6489_v35, %v7703_v33  ;;  %v5542_v25 = vcombine.high %v5538_v5, %v5538_v5  ;;  %v5559_v26 = vcombine.high %v5557_v47, %v5557_v47  ;;  %v5566_v36 = vrot.slane %v5550_v13, %v7703_v33 }
 0x335   : > { %v5759_v21 = vrot.slane %v5752_v15, %v7703_v33  ;;  %v5783_v0 = vrot.slane %v5769_v62, %v7703_v33  ;;  %v5805_v6 = vrot.slane %v5790_v34, %v7703_v33  ;;  %v5573_v42 = vrot.slane %v5557_v47, %v7703_v33  ;;  %v4729_v2 = vpop.f32.mrb[32].mxu1 }
 0x336   : > { %v5580_v57 = vrot.slane %v5558_v48, %v7703_v33  ;;  %v5587_v41 = vrot.slane %v5559_v26, %v7703_v33  ;;  %v5588_v24 = vcombine.high %v5566_v36, %v5566_v36  ;;  %v5807_v54 = vcombine.low %v5542_v25, %v5566_v36  ;;  %v6800_v23 = vpop.f32.mrb[33].mxu1 }
 0x337   : > { %v5767_v7 = vcombine.low %v5759_v21, %v5766_v59  ;;  %v5791_v30 = vcombine.low %v5776_v17, %v5783_v0  ;;  %v5421_v31 = vadd.f32 %v8287_v10, %v4725_v3  ;;  %v4730_v32 = vadd.f32 %v4729_v2, %v8289_v29 }
 0x338   : > { %v5590_v51 = vcombine.high %v5580_v57, %v5580_v57  ;;  %v5808_v50 = vcombine.low %v5580_v57, %v5588_v24  ;;  %v5815_v58 = vrot.slane %v5807_v54, %v7703_v33  ;;  %v5846_v52 = vcombine.low %v5573_v42, %v5587_v41 }
 0x339   : > { %v5798_v9 = vrot.slane %v5791_v30, %v7703_v33  ;;  %6011 = vst [vmem:[#allocation5 + $0x8] sm:$0x1f] %v5767_v7  ;;  %v6490_v1 = vcombine.high %v5573_v42, %v5587_v41  ;;  %v5433_v45 = vadd.f32 %v8297_v38, %v5421_v31  ;;  %v5422_v4 = vadd.f32 %v8291_v12, %v4730_v32 }
 0x33a   : > { %v5822_v20 = vrot.slane %v5808_v50, %v7703_v33  ;;  %v5829_v19 = vrot.slane %v5590_v51, %v7703_v33  ;;  %v5854_v10 = vrot.slane %v5846_v52, %v7703_v33 }
 0x33b   : > { %v5806_v29 = vcombine.low %v5798_v9, %v5805_v6  ;;  %v5861_v43 = vrot.slane %v6490_v1, %v7703_v33  ;;  %v5438_v37 = vmax.f32 %v5433_v45, 0.0  ;;  %v5434_v53 = vadd.f32 %v8297_v38, %v5422_v4  ;;  %v6018_v44 = vld [vmem:[#allocation5] ss:$2 sm:$0x3] }
 0x33c   : > { %v5830_v55 = vcombine.low %v5815_v58, %v5822_v20  ;;  %v5844_v40 = vrot.slane %v5829_v19, %v7703_v33  ;;  %v6034_v18 = vld [vmem:[#allocation5 + $0x1] ss:$2 sm:$0x3] }
 0x33d   : > { %6012 = vst [vmem:[#allocation5 + $0x10] sm:$0x1f] %v5806_v29  ;;  %v5869_v8 = vcombine.low %v5854_v10, %v5861_v43  ;;  %v5592_v22 = vcombine.high %v5438_v37, %v5438_v37  ;;  %v5599_v56 = vrot.slane %v5438_v37, %v7703_v33  ;;  %v5439_v39 = vmax.f32 %v5434_v53, 0.0 }
 0x33e   : > { %v5837_v12 = vrot.slane %v5830_v55, %v7703_v33  ;;  %v6049_v6 = vmax.f32 %v6018_v44, %v6034_v18 }
 0x33f   : > { %v5606_v27 = vrot.slane %v5592_v22, %v7703_v33  ;;  %v5607_v46 = vcombine.high %v5599_v56, %v5599_v56  ;;  %v5615_v60 = vrot.slane %v5599_v56, %v7703_v33  ;;  %v5641_v49 = vcombine.high %v5439_v39, %v5439_v39 }
 0x340   : > { %v5845_v16 = vcombine.low %v5837_v12, %v5844_v40  ;;  %v5648_v38 = vrot.slane %v5439_v39, %v7703_v33  ;;  %v5876_v3 = vrot.slane %v5869_v8, %v7703_v33  ;;  %v6020_v25 = vld [vmem:[#allocation5 + $0x8] ss:$2 sm:$0x3]  ;;  %v6036_v26 = vld [vmem:[#allocation5 + $0x9] ss:$2 sm:$0x3] }
 0x341   : > { %v5608_v63 = vcombine.high %v5606_v27, %v5606_v27  ;;  %v5629_v11 = vrot.slane %v5607_v46, %v7703_v33  ;;  %v5637_v13 = vcombine.high %v5615_v60, %v5615_v60  ;;  %v5868_v61 = vrot.slane %v5615_v60, %v7703_v33 }
 0x342   : > { %6013 = vst [vmem:[#allocation5 + $0x18] sm:$0x1f] %v5845_v16  ;;  %v5655_v5 = vrot.slane %v5641_v49, %v7703_v33  ;;  %v5656_v14 = vcombine.high %v5648_v38, %v5648_v38  ;;  %v5664_v28 = vrot.slane %v5648_v38, %v7703_v33  ;;  %v5622_v35 = vrot.slane %v5606_v27, %v7703_v33 }
 0x343   : > { %v5636_v47 = vrot.slane %v5608_v63, %v7703_v33  ;;  %v5639_v48 = vcombine.high %v5629_v11, %v5629_v11  ;;  %v5885_v15 = vcombine.low %v5629_v11, %v5637_v13  ;;  %v5883_v59 = vrot.slane %v5868_v61, %v7703_v33 }
 0x344   : > { %v5657_v62 = vcombine.high %v5655_v5, %v5655_v5  ;;  %v5671_v34 = vrot.slane %v5655_v5, %v7703_v33  ;;  %v5678_v17 = vrot.slane %v5656_v14, %v7703_v33  ;;  %v5686_v57 = vcombine.high %v5664_v28, %v5664_v28  ;;  %v6022_v24 = vld [vmem:[#allocation5 + $0x10] ss:$2 sm:$0x3]  ;;  %v6038_v54 = vld [vmem:[#allocation5 + $0x11] ss:$2 sm:$0x3] }
 0x345   : > { %v5886_v36 = vcombine.low %v5639_v48, %v5622_v35  ;;  %v5907_v21 = vrot.slane %v5636_v47, %v7703_v33  ;;  %v6491_v0 = vcombine.high %v5622_v35, %v5636_v47  ;;  %v5884_v42 = vcombine.low %v5876_v3, %v5883_v59 }
 0x346   : > { %v5685_v2 = vrot.slane %v5657_v62, %v7703_v33  ;;  %v5687_v41 = vcombine.high %v5671_v34, %v5671_v34  ;;  %v5893_v23 = vrot.slane %v5885_v15, %v7703_v33  ;;  %v5688_v30 = vcombine.high %v5678_v17, %v5678_v17 }
 0x347   : > { %v5900_v7 = vrot.slane %v5886_v36, %v7703_v33  ;;  %v6050_v31 = vmax.f32 %v6020_v25, %v6036_v26  ;;  %6014 = vst [vmem:[#allocation5 + $0x20] sm:$0x1f] %v5884_v42  ;;  %v5925_v51 = vcombine.low %v5664_v28, %v5678_v17  ;;  %v5946_v50 = vrot.slane %v5686_v57, %v7703_v33 }
 0x348   : > { %v5689_v32 = vcombine.high %v5685_v2, %v5685_v2  ;;  %v5964_v58 = vcombine.low %v5685_v2, %v5687_v41  ;;  %v5922_v9 = vrot.slane %v5907_v21, %v7703_v33  ;;  %v5963_v1 = vcombine.low %v5688_v30, %v5671_v34 }
 0x349   : > { %v5908_v52 = vcombine.low %v5893_v23, %v5900_v7  ;;  %v6024_v45 = vld [vmem:[#allocation5 + $0x18] ss:$2 sm:$0x3]  ;;  %v6040_v4 = vld [vmem:[#allocation5 + $0x19] ss:$2 sm:$0x3]  ;;  %v6051_v20 = vmax.f32 %v6022_v24, %v6038_v54  ;;  %v5932_v19 = vrot.slane %v6491_v0, %v7703_v33  ;;  %v5939_v10 = vrot.slane %v5925_v51, %v7703_v33 }
 0x34a   : > { %v5978_v29 = vrot.slane %v5964_v58, %v7703_v33  ;;  %v5985_v43 = vrot.slane %v5689_v32, %v7703_v33  ;;  %v5971_v53 = vrot.slane %v5963_v1, %v7703_v33  ;;  %v6052_v55 = vmax.f32 %v6024_v45, %v6040_v4 }
 0x34b   : > { %v5915_v37 = vrot.slane %v5908_v52, %v7703_v33  ;;  %v6058_v8 = vsel %vm6057_vm3, %v6049_v6, 0.0  ;;  %v5947_v22 = vcombine.low %v5932_v19, %v5939_v10  ;;  %v5961_v56 = vrot.slane %v5946_v50, %v7703_v33 }
 0x34c   : > { %v6059_v39 = vrot.slane %v6058_v8, 4  ;;  %v6065_v12 = vsel %vm6057_vm3, %v6050_v31, 0.0  ;;  %v5986_v27 = vcombine.low %v5971_v53, %v5978_v29  ;;  %v6072_v60 = vsel %vm6057_vm3, %v6051_v20, 0.0 }
 0x34d   : > { %v5923_v40 = vcombine.low %v5915_v37, %v5922_v9  ;;  %v6066_v46 = vrot.slane %v6065_v12, 4  ;;  %v5954_v16 = vrot.slane %v5947_v22, %v7703_v33  ;;  %v6073_v38 = vrot.slane %v6072_v60, 4 }
 0x34e   : > { %v6060_v49 = vadd.f32 %v6059_v39, %v6058_v8  ;;  %v6079_v63 = vsel %vm6057_vm3, %v6052_v55, 0.0  ;;  %v5993_v11 = vrot.slane %v5986_v27, %v7703_v33  ;;  %v6000_v13 = vrot.slane %v5985_v43, %v7703_v33  ;;  %v6026_v3 = vld [vmem:[#allocation5 + $0x20] ss:$2 sm:$0x3] }
 0x34f   : > { %6015 = vst [vmem:[#allocation5 + $0x28] sm:$0x1f] %v5923_v40  ;;  %v6042_v61 = vld [vmem:[#allocation5 + $0x21] ss:$2 sm:$0x3]  ;;  %v6067_v5 = vadd.f32 %v6066_v46, %v6065_v12  ;;  %v5962_v14 = vcombine.low %v5954_v16, %v5961_v56  ;;  %v6074_v18 = vadd.f32 %v6073_v38, %v6072_v60  ;;  %v6080_v48 = vrot.slane %v6079_v63, 4 }
 0x350   : > { %v6053_v28 = vmax.f32 %v6026_v3, %v6042_v61  ;;  %v6061_v44 = vrot.slane %v6060_v49, 2  ;;  %v6001_v35 = vcombine.low %v5993_v11, %v6000_v13 }
 0x351   : > { %v6068_v47 = vrot.slane %v6067_v5, 2  ;;  %6016 = vst [vmem:[#allocation5 + $0x30] sm:$0x1f] %v5962_v14  ;;  %v6075_v59 = vrot.slane %v6074_v18, 2  ;;  %v6081_v17 = vadd.f32 %v6080_v48, %v6079_v63 }
 0x352   : > { %v6062_v15 = vadd.f32 %v6061_v44, %v6060_v49  ;;  %v6086_v62 = vsel %vm6057_vm3, %v6053_v28, 0.0  ;;  %6017 = vst [vmem:[#allocation5 + $0x38] sm:$0x1f] %v6001_v35 }
 0x353   : > { %v6069_v34 = vadd.f32 %v6068_v47, %v6067_v5  ;;  %v6087_v25 = vrot.slane %v6086_v62, 4  ;;  %v6076_v33 = vadd.f32 %v6075_v59, %v6074_v18  ;;  %v6082_v21 = vrot.slane %v6081_v17, 2 }
 0x354   : > { %v6063_v26 = vrot.slane %v6062_v15, 1 }
 0x355   : > { %v6070_v36 = vrot.slane %v6069_v34, 1  ;;  %v6088_v0 = vadd.f32 %v6087_v25, %v6086_v62  ;;  %v6077_v57 = vrot.slane %v6076_v33, 1  ;;  %v6083_v41 = vadd.f32 %v6082_v21, %v6081_v17  ;;  %v6255_v17 = vld [vmem:[%s8416_s7 + $0x78] sm:$0xff] }
 0x356   : > { %v6028_v6 = vld [vmem:[#allocation5 + $0x28] ss:$2 sm:$0x3]  ;;  %v6044_v42 = vld [vmem:[#allocation5 + $0x29] ss:$2 sm:$0x3]  ;;  %v6064_v51 = vadd.f32 %v6063_v26, %v6062_v15 }
 0x357   : > { %v6054_v2 = vmax.f32 %v6028_v6, %v6044_v42  ;;  %v6071_v24 = vadd.f32 %v6070_v36, %v6069_v34  ;;  %v6089_v54 = vrot.slane %v6088_v0, 2  ;;  %v6078_v52 = vadd.f32 %v6077_v57, %v6076_v33  ;;  %v6254_v34 = vld [vmem:[%s8416_s7 + $0x70] sm:$0xff]  ;;  %v6492_v33 = vld [vmem:[%s8415_s6] ss:$0 sm:$0xff] }
 0x358   : > { %v6030_v23 = vld [vmem:[#allocation5 + $0x30] ss:$2 sm:$0x3]  ;;  %v6046_v7 = vld [vmem:[#allocation5 + $0x31] ss:$2 sm:$0x3]  ;;  %v7036_v25 = vpack.c.bf16 %v6255_v17, %v6254_v34 }
 0x359   : > { %v6032_v30 = vld [vmem:[#allocation5 + $0x38] ss:$2 sm:$0x3]  ;;  %v6048_v31 = vld [vmem:[#allocation5 + $0x39] ss:$2 sm:$0x3]  ;;  %v6055_v32 = vmax.f32 %v6030_v23, %v6046_v7  ;;  %v6090_v50 = vadd.f32 %v6089_v54, %v6088_v0 }
 0x35a   : > { %v6056_v58 = vmax.f32 %v6032_v30, %v6048_v31  ;;  %v6084_v9 = vrot.slane %v6083_v41, 1  ;;  %v6093_v1 = vsel %vm6057_vm3, %v6054_v2, 0.0  ;;  %v6116_v20 = vmul.f32 0.5, %v6071_v24  ;;  %7037 = vmatpush3.bf16.msra.mxu0 %v7036_v25  ;;  %v6493_v6 = vld [vmem:[%s8417_s8] ss:$0 sm:$0xff] }
 0x35b   : > { %v6094_v45 = vrot.slane %v6093_v1, 4  ;;  %v6100_v4 = vsel %vm6057_vm3, %v6055_v32, 0.0  ;;  %v6091_v19 = vrot.slane %v6090_v50, 1  ;;  %v6115_v55 = vmul.f32 0.5, %v6064_v51 }
 0x35c   : > { %v6101_v10 = vrot.slane %v6100_v4, 4  ;;  %v6107_v29 = vsel %vm6057_vm3, %v6056_v58, 0.0  ;;  %v6085_v43 = vadd.f32 %v6084_v9, %v6083_v41  ;;  %v6117_v22 = vmul.f32 0.5, %v6078_v52 }
 0x35d   : > { %v6095_v37 = vadd.f32 %v6094_v45, %v6093_v1  ;;  %v6108_v53 = vrot.slane %v6107_v29, 4  ;;  %v6155_v12 = vsel %vm6154_vm4, %v6116_v20, %v6115_v55  ;;  %v6092_v40 = vadd.f32 %v6091_v19, %v6090_v50 }
 0x35e   : > { %v6102_v8 = vadd.f32 %v6101_v10, %v6100_v4  ;;  %v6118_v16 = vmul.f32 0.5, %v6085_v43  ;;  %v6157_v38 = vsel %vm6156_vm5, %v6117_v22, %v6155_v12 }
 0x35f   : > { %v6096_v56 = vrot.slane %v6095_v37, 2  ;;  %v6109_v39 = vadd.f32 %v6108_v53, %v6107_v29  ;;  %v6119_v3 = vmul.f32 0.5, %v6092_v40 }
 0x360   : > { %v6103_v27 = vrot.slane %v6102_v8, 2  ;;  %v6159_v14 = vsel %vm6158_vm6, %v6118_v16, %v6157_v38 }
 0x361   : > { %v6097_v46 = vadd.f32 %v6096_v56, %v6095_v37  ;;  %v6110_v60 = vrot.slane %v6109_v39, 2  ;;  %v6161_v47 = vsel %vm6160_vm7, %v6119_v3, %v6159_v14 }
 0x362   : > { %v6104_v49 = vadd.f32 %v6103_v27, %v6102_v8 }
 0x363   : > { %v6098_v63 = vrot.slane %v6097_v46, 1  ;;  %v6111_v11 = vadd.f32 %v6110_v60, %v6109_v39 }
 0x364   : > { %v6105_v13 = vrot.slane %v6104_v49, 1 }
 0x365   : > { %v6099_v61 = vadd.f32 %v6098_v63, %v6097_v46  ;;  %v6112_v5 = vrot.slane %v6111_v11, 1 }
 0x366   : > { %v6106_v28 = vadd.f32 %v6105_v13, %v6104_v49 }
 0x367   : > { %v6113_v44 = vadd.f32 %v6112_v5, %v6111_v11  ;;  %v6120_v18 = vmul.f32 0.5, %v6099_v61 }
 0x368   : > { %v6121_v35 = vmul.f32 0.5, %v6106_v28 }
 0x369   : > { %v6122_v48 = vmul.f32 0.5, %v6113_v44  ;;  %v6163_v15 = vsel %vm6162_vm8, %v6120_v18, %v6161_v47 }
 0x36a   : > { %v6165_v59 = vsel %vm6164_vm9, %v6121_v35, %v6163_v15 }
 0x36b   : > { %v6167_v62 = vsel %vm6166_vm10, %v6122_v48, %v6165_v59 }
 0x36c   : > { %6881 = vmatmul.mubr.f32.vlgmr.msra.gmra.mrb[34].mxu1 %v6167_v62 }
 0x43f   : > { %v6235_v26 = vpop.f32.mrb[34].mxu1 }
 0x440   : > { %v6236_v36 = vadd.f32 %v6492_v33, %v6235_v26  ;;  %v6882_v21 = vpop.f32.mrb[35].mxu1 }
 0x442   : > { %v6239_v0 = vmax.f32 %v6236_v36, 0.0 }
 0x444   : > { %6916 = vmatmul.mubr.f32.vlgmr.msra.gmra.mrb[24].mxu0 %v6239_v0 }
 0x517   : > { %v6329_v42 = vpop.f32.mrb[24].mxu0 }
 0x518   : > { %v6330_v2 = vadd.f32 %v6493_v6, %v6329_v42  ;;  %v6917_v57 = vpop.f32.mrb[25].mxu0 }
 0x51a   : > { %6333 = vst [vmem:[%s332_s22] sm:$0xff] %v6330_v2 }
 0x51b PF: > { %s19_s30 = sadd.s32 1, %s7156_s30  }
 0x51c   : > { %p16_p5 = scmp.ge.s32.totalorder %s19_s30, 4  }
 0x51e   :  { %18 = sbr.rel (!%p16_p5) target bundleno = 1 (0x1), region = 120 }

</bundles_post_ra>
